<compile_context>
chip_gen: v7x
topology: tpu7x:2x2x1
jax: 0.10.0
libtpu: 0.0.40
codegen_flags: <defaults>
</compile_context>

<pallas_src>
import numpy as np
import jax
import jax.numpy as jnp
from jax.experimental import pallas as pl
from jax.experimental.pallas import tpu as pltpu

NEG_SLOPE = 0.01  # PyTorch F.leaky_relu default negative_slope

# ----------------------------- model config ---------------------------------
OBS_SHAPE = (4, 16, 16)      # (C, H, W), PyTorch layout
NUM_ACTIONS = 6
NUM_FILTERS = 8
SIZE_HIDDEN = 32
BATCH = 2

C_IN, H, W = OBS_SHAPE
OH3 = OW3 = 14                       # conv3 ('valid' 3x3) output spatial size
CONV_OUT = OH3 * OW3 * NUM_FILTERS   # 1568 flattened conv features
WC = OW3 * NUM_FILTERS               # 112 lanes per conv3 output row
NCOMB = 2 * SIZE_HIDDEN              # 64  (dense0 cols | d2rl-skip cols)
NCOL = OH3 * NCOMB                   # 896 columns of the combined dense weight
HEAD_PAD = 128                       # lane-dense merged policy/value head

LIN = W * C_IN                       # 64 input lanes (w, cin)
LMID = W * NUM_FILTERS               # 128 conv1/conv2 lanes (w, cout)

GOFF = 8                             # zero rows above the real data per slab
SLAB = 32                            # rows per sample slab (power of two)
LOG2_SLAB = 5
LOG2_NCOMB = 6


# ----------------------------- fused Pallas kernel ---------------------------
def _ppo_fused_kernel(
    xpad_ref,   # (B*SLAB, 64)  zero-padded layout-L obs: rows=(b,h), lanes=(w,cin)
    bw1_ref,    # (5, 64, 128)  conv1 banded weights (one slab per kh)
    bc1_ref,    # (1, 128)      conv1 bias tiled over w
    bw2_ref,    # (3, 128, 128)
    bc2_ref,    # (1, 128)
    bw3_ref,    # (3, 128, 112)
    bc3_ref,    # (1, 112)
    wcl_ref,    # (112, 896)    dense0|skip weights, lane-stacked per h
    bd0_ref,    # (1, 32)
    w1a_ref,    # (32, 32)      dense1 weight rows acting on hidden h0
    bd1_ref,    # (1, 32)
    whv_ref,    # (32, 128)     merged policy|value head (zero padded)
    bhv_ref,    # (1, 128)
    out_ref,    # (B, 128)
    xp2_ref,    # scratch (B*SLAB, 128)  padded conv2/conv3 activation slab
):
    f32 = jnp.float32
    B = xpad_ref.shape[0] // SLAB
    M12 = (B - 1) * SLAB + H      # rows of the batched conv1/conv2 matmuls
    M3 = (B - 1) * SLAB + OH3     # rows of the batched conv3 matmul

    def leaky(v):
        return jnp.where(v > 0, v, NEG_SLOPE * v)

    # -------- conv1: 5x5 'same' — ONE matmul per kh over every sample at once.
    # Output row i corresponds to padded row i+GOFF; real rows are i = b*SLAB+h.
    acc1 = jnp.dot(xpad_ref[GOFF - 2: GOFF - 2 + M12, :], bw1_ref[0],
                   preferred_element_type=f32)
    for kh in range(1, 5):
        acc1 = acc1 + jnp.dot(
            xpad_ref[GOFF - 2 + kh: GOFF - 2 + kh + M12, :], bw1_ref[kh],
            preferred_element_type=f32)

    # Zero only the 8-row pad bands conv2 actually reads, and write leaky(conv1)
    # straight into the padded conv2 input slab (no full memset, no a1 copies).
    for b in range(B):
        xp2_ref[b * SLAB: b * SLAB + GOFF, :] = jnp.zeros((GOFF, LMID), f32)
        xp2_ref[b * SLAB + GOFF + H: (b + 1) * SLAB, :] = \
            jnp.zeros((SLAB - GOFF - H, LMID), f32)
        xp2_ref[b * SLAB + GOFF: b * SLAB + GOFF + H, :] = leaky(
            acc1[b * SLAB: b * SLAB + H, :] + bc1_ref[...])

    # -------- conv2: 3x3 'same', batched the same way.
    acc2 = jnp.dot(xp2_ref[GOFF - 1: GOFF - 1 + M12, :], bw2_ref[0],
                   preferred_element_type=f32)
    for kh in range(1, 3):
        acc2 = acc2 + jnp.dot(
            xp2_ref[GOFF - 1 + kh: GOFF - 1 + kh + M12, :], bw2_ref[kh],
            preferred_element_type=f32)
    # Overwrite the real rows with conv2 activations (pad bands stay zero;
    # conv3 is 'valid' so it never reads them).
    for b in range(B):
        xp2_ref[b * SLAB + GOFF: b * SLAB + GOFF + H, :] = leaky(
            acc2[b * SLAB: b * SLAB + H, :] + bc2_ref[...])

    # -------- conv3: 3x3 'valid', batched; rows with (i & 31) >= 14 are junk
    # and get masked out in the flatten stage below.
    acc3 = jnp.dot(xp2_ref[GOFF: GOFF + M3, :], bw3_ref[0],
                   preferred_element_type=f32)
    for kh in range(1, 3):
        acc3 = acc3 + jnp.dot(
            xp2_ref[GOFF + kh: GOFF + kh + M3, :], bw3_ref[kh],
            preferred_element_type=f32)
    a3 = leaky(acc3 + bc3_ref[...])                       # (M3, 112)

    # -------- flatten(NHWC) + dense0 + D2RL skip, batched, no reshape/concat:
    #   g[r, h'*64+o] = <a3[r,:], Wcomb[h'*112:(h'+1)*112, o]>
    #   keep h' == (r & 31), fold the 14 lane chunks with a stacked identity
    #   (M=46 MXU matmul), then sum rows per sample with a tiny selection
    #   matmul.  mask / identity / selector are generated in-kernel from iota.
    g = jnp.dot(a3, wcl_ref[...], preferred_element_type=f32)        # (M3, 896)
    ri = jax.lax.broadcasted_iota(jnp.int32, (M3, NCOL), 0)
    ci = jax.lax.broadcasted_iota(jnp.int32, (M3, NCOL), 1)
    g = jnp.where((ri & (SLAB - 1)) == (ci >> LOG2_NCOMB), g, 0.0)
    si = jax.lax.broadcasted_iota(jnp.int32, (NCOL, NCOMB), 0)
    so = jax.lax.broadcasted_iota(jnp.int32, (NCOL, NCOMB), 1)
    stk = ((si & (NCOMB - 1)) == so).astype(f32)                     # (896, 64)
    fld = jnp.dot(g, stk, preferred_element_type=f32)                # (M3, 64)
    bi = jax.lax.broadcasted_iota(jnp.int32, (B, M3), 0)
    br = jax.lax.broadcasted_iota(jnp.int32, (B, M3), 1)
    sel = ((br >> LOG2_SLAB) == bi).astype(f32)                      # (B, M3)
    acc01 = jnp.dot(sel, fld, preferred_element_type=f32)            # (B, 64)

    # -------- dense0 / dense1 (+ D2RL skip) / merged heads, batched (M = B),
    # with a single lane-dense (B, 128) output store.
    h0 = leaky(acc01[:, :SIZE_HIDDEN] + bd0_ref[...])
    h1 = leaky(jnp.dot(h0, w1a_ref[...], preferred_element_type=f32)
               + acc01[:, SIZE_HIDDEN:] + bd1_ref[...])
    out_ref[...] = (jnp.dot(h1, whv_ref[...], preferred_element_type=f32)
                    + bhv_ref[...]).astype(out_ref.dtype)


# ----------------------------- parameters (torch semantics) ------------------
def init_params(key):
    """Conv weights as HWIO; dense rows indexed in torch NCHW-flatten order."""
    def nrm(k, shape, scale):
        return scale * jax.random.normal(k, shape, dtype=jnp.float32)

    keys = iter(jax.random.split(key, 16))
    p = {}
    p["conv1"] = (nrm(next(keys), (5, 5, C_IN, NUM_FILTERS), 0.1),
                  nrm(next(keys), (NUM_FILTERS,), 0.1))
    p["conv2"] = (nrm(next(keys), (3, 3, NUM_FILTERS, NUM_FILTERS), 0.1),
                  nrm(next(keys), (NUM_FILTERS,), 0.1))
    p["conv3"] = (nrm(next(keys), (3, 3, NUM_FILTERS, NUM_FILTERS), 0.1),
                  nrm(next(keys), (NUM_FILTERS,), 0.1))
    p["dense0"] = (nrm(next(keys), (CONV_OUT, SIZE_HIDDEN), 0.05),
                   nrm(next(keys), (SIZE_HIDDEN,), 0.05))
    p["dense1"] = (nrm(next(keys), (SIZE_HIDDEN + CONV_OUT, SIZE_HIDDEN), 0.05),
                   nrm(next(keys), (SIZE_HIDDEN,), 0.05))
    p["policy"] = (nrm(next(keys), (SIZE_HIDDEN, NUM_ACTIONS), 0.05),
                   nrm(next(keys), (NUM_ACTIONS,), 0.05))
    p["value"] = (nrm(next(keys), (SIZE_HIDDEN, 1), 0.05),
                  nrm(next(keys), (1,), 0.05))
    return p


def _np(x):
    return np.asarray(x, np.float32)


def _banded(w_hwio, width_in, width_out, pad_w):
    """Fold the conv's W axis into per-kh banded matmul weights.
    Returns (KH, width_in*Cin, width_out*Cout)."""
    w = _np(w_hwio)
    KH, KW, cin, cout = w.shape
    bw = np.zeros((KH, width_in * cin, width_out * cout), np.float32)
    for kh in range(KH):
        for ow in range(width_out):
            for kw in range(KW):
                wi = ow + kw - pad_w
                if 0 <= wi < width_in:
                    bw[kh, wi * cin:(wi + 1) * cin,
                       ow * cout:(ow + 1) * cout] = w[kh, kw]
    return bw


def prepare_kernel_params(p):
    """One-time (numpy) re-layout of the torch-semantic params for the kernel."""
    kp = {}
    (w1, b1), (w2, b2), (w3, b3) = p["conv1"], p["conv2"], p["conv3"]
    kp["bw1"] = jnp.asarray(_banded(w1, W, W, 2))            # (5, 64, 128)
    kp["bc1"] = jnp.asarray(np.tile(_np(b1), W)[None, :])    # (1, 128)
    kp["bw2"] = jnp.asarray(_banded(w2, W, W, 1))            # (3, 128, 128)
    kp["bc2"] = jnp.asarray(np.tile(_np(b2), W)[None, :])
    kp["bw3"] = jnp.asarray(_banded(w3, W, OW3, 0))          # (3, 128, 112)
    kp["bc3"] = jnp.asarray(np.tile(_np(b3), OW3)[None, :])  # (1, 112)

    # torch NCHW-flatten row order -> kernel NHWC row order
    idx = np.arange(CONV_OUT)
    perm = (idx % NUM_FILTERS) * (OH3 * OW3) + (idx // NUM_FILTERS)
    w0 = _np(p["dense0"][0])[perm]                            # (1568, 32)
    w1d = _np(p["dense1"][0])
    w1a, w1b = w1d[:SIZE_HIDDEN], w1d[SIZE_HIDDEN:][perm]     # (32,32), (1568,32)
    wcomb = np.concatenate([w0, w1b], axis=1)                 # (1568, 64)
    kp["wcl"] = jnp.asarray(
        wcomb.reshape(OH3, WC, NCOMB).transpose(1, 0, 2).reshape(WC, NCOL))

    kp["bd0"] = jnp.asarray(_np(p["dense0"][1])[None, :])
    kp["w1a"] = jnp.asarray(w1a)
    kp["bd1"] = jnp.asarray(_np(p["dense1"][1])[None, :])

    whv = np.zeros((SIZE_HIDDEN, HEAD_PAD), np.float32)       # merged, lane-dense
    whv[:, :NUM_ACTIONS] = _np(p["policy"][0])
    whv[:, NUM_ACTIONS:NUM_ACTIONS + 1] = _np(p["value"][0])
    bhv = np.zeros((1, HEAD_PAD), np.float32)
    bhv[0, :NUM_ACTIONS] = _np(p["policy"][1])
    bhv[0, NUM_ACTIONS] = _np(p["value"][1])[0]
    kp["whv"] = jnp.asarray(whv)
    kp["bhv"] = jnp.asarray(bhv)
    return kp


# ----------------------------- forward (single pallas_call) ------------------
@jax.jit
def ppo_forward(kp, obs_nchw):
    n = obs_nchw.shape[0]
    # NCHW -> layout-L (rows=(b,h), lanes=(w,c)) plus the per-slab H zero-pads;
    # pure layout plumbing done once by XLA on the (tiny) input.
    obs_l = jnp.transpose(obs_nchw, (0, 2, 3, 1)).reshape(n, H, LIN)
    xpad = jnp.pad(obs_l, ((0, 0), (GOFF, SLAB - GOFF - H), (0, 0)))
    xpad = xpad.reshape(n * SLAB, LIN)                        # (n*32, 64)

    m12 = (n - 1) * SLAB + H
    m3 = (n - 1) * SLAB + OH3
    macs = (5 * m12 * LIN * LMID            # conv1
            + 3 * m12 * LMID * LMID         # conv2
            + 3 * m3 * LMID * WC            # conv3
            + m3 * WC * NCOL                # flatten/dense0/skip matmul
            + m3 * NCOL * NCOMB             # lane-chunk fold (stacked identity)
            + n * m3 * NCOMB                # per-sample row selection
            + n * SIZE_HIDDEN * SIZE_HIDDEN # dense1
            + n * SIZE_HIDDEN * HEAD_PAD)   # merged heads

    operands = (xpad, kp["bw1"], kp["bc1"], kp["bw2"], kp["bc2"], kp["bw3"],
                kp["bc3"], kp["wcl"], kp["bd0"], kp["w1a"], kp["bd1"],
                kp["whv"], kp["bhv"])
    bytes_accessed = sum(int(np.prod(o.shape)) * o.dtype.itemsize
                         for o in operands) + n * HEAD_PAD * 4

    vmem_spec = pl.BlockSpec(memory_space=pltpu.MemorySpace.VMEM)
    out = pl.pallas_call(
        _ppo_fused_kernel,
        out_shape=jax.ShapeDtypeStruct((n, HEAD_PAD), jnp.float32),
        in_specs=[vmem_spec] * len(operands),
        out_specs=vmem_spec,
        scratch_shapes=[pltpu.VMEM((n * SLAB, LMID), jnp.float32)],
        cost_estimate=pl.CostEstimate(
            flops=2 * macs, transcendentals=0, bytes_accessed=bytes_accessed),
    )(*operands)
    return out[:, :NUM_ACTIONS], out[:, NUM_ACTIONS:NUM_ACTIONS + 1]
# TODO(synk): Categorical helpers (get_action_dist / evaluate_actions) are
# sampling/distribution utilities outside the forward hot path; not kernelized.


# ----------------------------- pure-JAX reference (torch semantics) ----------
def ref_forward(p, obs_nchw):
    x = jnp.transpose(obs_nchw, (0, 2, 3, 1))   # NHWC
    for (w, b), pad in ((p["conv1"], "SAME"), (p["conv2"], "SAME"),
                        (p["conv3"], "VALID")):
        y = jax.lax.conv_general_dilated(
            x, w, window_strides=(1, 1), padding=pad,
            dimension_numbers=("NHWC", "HWIO", "NHWC")) + b
        x = jnp.where(y > 0, y, NEG_SLOPE * y)
    n = x.shape[0]
    xf = jnp.transpose(x, (0, 3, 1, 2)).reshape(n, -1)   # torch NCHW flatten
    w0, b0 = p["dense0"]
    h = xf @ w0 + b0
    h = jnp.where(h > 0, h, NEG_SLOPE * h)
    w1, b1 = p["dense1"]
    h = jnp.concatenate([h, xf], axis=1) @ w1 + b1       # D2RL skip-concat
    h = jnp.where(h > 0, h, NEG_SLOPE * h)
    pw, pb = p["policy"]
    vw, vb = p["value"]
    return h @ pw + pb, h @ vw + vb


# ----------------------------- main ------------------------------------------
if __name__ == "__main__":
    root = jax.random.PRNGKey(0)
    k_obs, k_par = jax.random.split(root)
    obs = jax.random.normal(k_obs, (BATCH, *OBS_SHAPE), dtype=jnp.float32)

    params = init_params(k_par)
    kparams = prepare_kernel_params(params)

    logits, value = ppo_forward(kparams, obs)
    (logits, value) = jax.block_until_ready((logits, value))

    assert logits.shape == (BATCH, NUM_ACTIONS), logits.shape
    assert value.shape == (BATCH, 1), value.shape

    ref_logits, ref_value = ref_forward(params, obs)
    assert jnp.allclose(logits, ref_logits, rtol=1e-3, atol=1e-3), "logits mismatch"
    assert jnp.allclose(value, ref_value, rtol=1e-3, atol=1e-3), "value mismatch"

    print("KERNEL_OK")
</pallas_src>

<mosaic_0001>
module attributes {stable_mosaic.version = 11 : i64} {
  func.func @_ppo_fused_kernel(%arg0: memref<64x64xf32, #tpu.memory_space<vmem>>, %arg1: memref<5x64x128xf32, #tpu.memory_space<vmem>>, %arg2: memref<1x128xf32, #tpu.memory_space<vmem>>, %arg3: memref<3x128x128xf32, #tpu.memory_space<vmem>>, %arg4: memref<1x128xf32, #tpu.memory_space<vmem>>, %arg5: memref<3x128x112xf32, #tpu.memory_space<vmem>>, %arg6: memref<1x112xf32, #tpu.memory_space<vmem>>, %arg7: memref<112x896xf32, #tpu.memory_space<vmem>>, %arg8: memref<1x32xf32, #tpu.memory_space<vmem>>, %arg9: memref<32x32xf32, #tpu.memory_space<vmem>>, %arg10: memref<1x32xf32, #tpu.memory_space<vmem>>, %arg11: memref<32x128xf32, #tpu.memory_space<vmem>>, %arg12: memref<1x128xf32, #tpu.memory_space<vmem>>, %arg13: memref<2x128xf32, #tpu.memory_space<vmem>>, %arg14: memref<64x128xf32, #tpu.memory_space<vmem>>) attributes {dimension_semantics = [], scalar_prefetch = 0 : i64, scratch_operands = 1 : i64, tpu.core_type = #tpu.core_type<tc>} {
    %c6 = arith.constant 6 : index
    %c0 = arith.constant 0 : index
    %0 = vector.load %arg0[%c6, %c0] : memref<64x64xf32, #tpu.memory_space<vmem>>, vector<48x64xf32>
    %c0_0 = arith.constant 0 : index
    %c0_1 = arith.constant 0 : index
    %c0_2 = arith.constant 0 : index
    %1 = vector.load %arg1[%c0_0, %c0_1, %c0_2] : memref<5x64x128xf32, #tpu.memory_space<vmem>>, vector<1x64x128xf32>
    %2 = vector.shape_cast %1 : vector<1x64x128xf32> to vector<64x128xf32>
    %cst = arith.constant dense<0.000000e+00> : vector<48x128xf32>
    %3 = tpu.matmul %0, %2, %cst {dimension_numbers = #tpu.dot_dimension_numbers<[1], [0], [0], [1], [0, 0, 1, 1], [], []>} : vector<48x64xf32>, vector<64x128xf32>, vector<48x128xf32> -> vector<48x128xf32>
    %c7 = arith.constant 7 : index
    %c0_3 = arith.constant 0 : index
    %4 = vector.load %arg0[%c7, %c0_3] : memref<64x64xf32, #tpu.memory_space<vmem>>, vector<48x64xf32>
    %c1 = arith.constant 1 : index
    %c0_4 = arith.constant 0 : index
    %c0_5 = arith.constant 0 : index
    %5 = vector.load %arg1[%c1, %c0_4, %c0_5] : memref<5x64x128xf32, #tpu.memory_space<vmem>>, vector<1x64x128xf32>
    %6 = vector.shape_cast %5 : vector<1x64x128xf32> to vector<64x128xf32>
    %cst_6 = arith.constant dense<0.000000e+00> : vector<48x128xf32>
    %7 = tpu.matmul %4, %6, %cst_6 {dimension_numbers = #tpu.dot_dimension_numbers<[1], [0], [0], [1], [0, 0, 1, 1], [], []>} : vector<48x64xf32>, vector<64x128xf32>, vector<48x128xf32> -> vector<48x128xf32>
    %8 = arith.addf %3, %7 : vector<48x128xf32>
    %c8 = arith.constant 8 : index
    %c0_7 = arith.constant 0 : index
    %9 = vector.load %arg0[%c8, %c0_7] : memref<64x64xf32, #tpu.memory_space<vmem>>, vector<48x64xf32>
    %c2 = arith.constant 2 : index
    %c0_8 = arith.constant 0 : index
    %c0_9 = arith.constant 0 : index
    %10 = vector.load %arg1[%c2, %c0_8, %c0_9] : memref<5x64x128xf32, #tpu.memory_space<vmem>>, vector<1x64x128xf32>
    %11 = vector.shape_cast %10 : vector<1x64x128xf32> to vector<64x128xf32>
    %cst_10 = arith.constant dense<0.000000e+00> : vector<48x128xf32>
    %12 = tpu.matmul %9, %11, %cst_10 {dimension_numbers = #tpu.dot_dimension_numbers<[1], [0], [0], [1], [0, 0, 1, 1], [], []>} : vector<48x64xf32>, vector<64x128xf32>, vector<48x128xf32> -> vector<48x128xf32>
    %13 = arith.addf %8, %12 : vector<48x128xf32>
    %c9 = arith.constant 9 : index
    %c0_11 = arith.constant 0 : index
    %14 = vector.load %arg0[%c9, %c0_11] : memref<64x64xf32, #tpu.memory_space<vmem>>, vector<48x64xf32>
    %c3 = arith.constant 3 : index
    %c0_12 = arith.constant 0 : index
    %c0_13 = arith.constant 0 : index
    %15 = vector.load %arg1[%c3, %c0_12, %c0_13] : memref<5x64x128xf32, #tpu.memory_space<vmem>>, vector<1x64x128xf32>
    %16 = vector.shape_cast %15 : vector<1x64x128xf32> to vector<64x128xf32>
    %cst_14 = arith.constant dense<0.000000e+00> : vector<48x128xf32>
    %17 = tpu.matmul %14, %16, %cst_14 {dimension_numbers = #tpu.dot_dimension_numbers<[1], [0], [0], [1], [0, 0, 1, 1], [], []>} : vector<48x64xf32>, vector<64x128xf32>, vector<48x128xf32> -> vector<48x128xf32>
    %18 = arith.addf %13, %17 : vector<48x128xf32>
    %c10 = arith.constant 10 : index
    %c0_15 = arith.constant 0 : index
    %19 = vector.load %arg0[%c10, %c0_15] : memref<64x64xf32, #tpu.memory_space<vmem>>, vector<48x64xf32>
    %c4 = arith.constant 4 : index
    %c0_16 = arith.constant 0 : index
    %c0_17 = arith.constant 0 : index
    %20 = vector.load %arg1[%c4, %c0_16, %c0_17] : memref<5x64x128xf32, #tpu.memory_space<vmem>>, vector<1x64x128xf32>
    %21 = vector.shape_cast %20 : vector<1x64x128xf32> to vector<64x128xf32>
    %cst_18 = arith.constant dense<0.000000e+00> : vector<48x128xf32>
    %22 = tpu.matmul %19, %21, %cst_18 {dimension_numbers = #tpu.dot_dimension_numbers<[1], [0], [0], [1], [0, 0, 1, 1], [], []>} : vector<48x64xf32>, vector<64x128xf32>, vector<48x128xf32> -> vector<48x128xf32>
    %23 = arith.addf %18, %22 : vector<48x128xf32>
    %cst_19 = arith.constant 0.000000e+00 : f32
    %24 = vector.broadcast %cst_19 : f32 to vector<8x128xf32>
    %c0_20 = arith.constant 0 : index
    %c0_21 = arith.constant 0 : index
    %25 = vector.load %arg14[%c0_20, %c0_21] : memref<64x128xf32, #tpu.memory_space<vmem>>, vector<8x128xf32>
    tpu.vector_store %arg14[%c0_20, %c0_21], %24 {strides = array<i32>} : memref<64x128xf32, #tpu.memory_space<vmem>>, vector<8x128xf32>,
    %cst_22 = arith.constant 0.000000e+00 : f32
    %26 = vector.broadcast %cst_22 : f32 to vector<8x128xf32>
    %c24 = arith.constant 24 : index
    %c0_23 = arith.constant 0 : index
    %27 = vector.load %arg14[%c24, %c0_23] : memref<64x128xf32, #tpu.memory_space<vmem>>, vector<8x128xf32>
    tpu.vector_store %arg14[%c24, %c0_23], %26 {strides = array<i32>} : memref<64x128xf32, #tpu.memory_space<vmem>>, vector<8x128xf32>,
    %28 = vector.extract_strided_slice %23 {offsets = [0, 0], sizes = [16, 128], strides = [1, 1]} : vector<48x128xf32> to vector<16x128xf32>
    %c0_24 = arith.constant 0 : index
    %c0_25 = arith.constant 0 : index
    %29 = vector.load %arg2[%c0_24, %c0_25] : memref<1x128xf32, #tpu.memory_space<vmem>>, vector<1x128xf32>
    %30 = vector.broadcast %29 : vector<1x128xf32> to vector<16x128xf32>
    %31 = arith.addf %28, %30 : vector<16x128xf32>
    %cst_26 = arith.constant 0.000000e+00 : f32
    %32 = vector.broadcast %cst_26 : f32 to vector<16x128xf32>
    %33 = arith.cmpf ogt, %31, %32 : vector<16x128xf32>
    %cst_27 = arith.constant 0.00999999977 : f32
    %34 = vector.broadcast %cst_27 : f32 to vector<16x128xf32>
    %35 = arith.mulf %34, %31 : vector<16x128xf32>
    %36 = arith.select %33, %31, %35 : vector<16x128xi1>, vector<16x128xf32>
    %c8_28 = arith.constant 8 : index
    %c0_29 = arith.constant 0 : index
    %37 = vector.load %arg14[%c8_28, %c0_29] : memref<64x128xf32, #tpu.memory_space<vmem>>, vector<16x128xf32>
    tpu.vector_store %arg14[%c8_28, %c0_29], %36 {strides = array<i32>} : memref<64x128xf32, #tpu.memory_space<vmem>>, vector<16x128xf32>,
    %cst_30 = arith.constant 0.000000e+00 : f32
    %38 = vector.broadcast %cst_30 : f32 to vector<8x128xf32>
    %c32 = arith.constant 32 : index
    %c0_31 = arith.constant 0 : index
    %39 = vector.load %arg14[%c32, %c0_31] : memref<64x128xf32, #tpu.memory_space<vmem>>, vector<8x128xf32>
    tpu.vector_store %arg14[%c32, %c0_31], %38 {strides = array<i32>} : memref<64x128xf32, #tpu.memory_space<vmem>>, vector<8x128xf32>,
    %cst_32 = arith.constant 0.000000e+00 : f32
    %40 = vector.broadcast %cst_32 : f32 to vector<8x128xf32>
    %c56 = arith.constant 56 : index
    %c0_33 = arith.constant 0 : index
    %41 = vector.load %arg14[%c56, %c0_33] : memref<64x128xf32, #tpu.memory_space<vmem>>, vector<8x128xf32>
    tpu.vector_store %arg14[%c56, %c0_33], %40 {strides = array<i32>} : memref<64x128xf32, #tpu.memory_space<vmem>>, vector<8x128xf32>,
    %42 = vector.extract_strided_slice %23 {offsets = [32, 0], sizes = [16, 128], strides = [1, 1]} : vector<48x128xf32> to vector<16x128xf32>
    %c0_34 = arith.constant 0 : index
    %c0_35 = arith.constant 0 : index
    %43 = vector.load %arg2[%c0_34, %c0_35] : memref<1x128xf32, #tpu.memory_space<vmem>>, vector<1x128xf32>
    %44 = vector.broadcast %43 : vector<1x128xf32> to vector<16x128xf32>
    %45 = arith.addf %42, %44 : vector<16x128xf32>
    %cst_36 = arith.constant 0.000000e+00 : f32
    %46 = vector.broadcast %cst_36 : f32 to vector<16x128xf32>
    %47 = arith.cmpf ogt, %45, %46 : vector<16x128xf32>
    %cst_37 = arith.constant 0.00999999977 : f32
    %48 = vector.broadcast %cst_37 : f32 to vector<16x128xf32>
    %49 = arith.mulf %48, %45 : vector<16x128xf32>
    %50 = arith.select %47, %45, %49 : vector<16x128xi1>, vector<16x128xf32>
    %c40 = arith.constant 40 : index
    %c0_38 = arith.constant 0 : index
    %51 = vector.load %arg14[%c40, %c0_38] : memref<64x128xf32, #tpu.memory_space<vmem>>, vector<16x128xf32>
    tpu.vector_store %arg14[%c40, %c0_38], %50 {strides = array<i32>} : memref<64x128xf32, #tpu.memory_space<vmem>>, vector<16x128xf32>,
    %c7_39 = arith.constant 7 : index
    %c0_40 = arith.constant 0 : index
    %52 = vector.load %arg14[%c7_39, %c0_40] : memref<64x128xf32, #tpu.memory_space<vmem>>, vector<48x128xf32>
    %c0_41 = arith.constant 0 : index
    %c0_42 = arith.constant 0 : index
    %c0_43 = arith.constant 0 : index
    %53 = vector.load %arg3[%c0_41, %c0_42, %c0_43] : memref<3x128x128xf32, #tpu.memory_space<vmem>>, vector<1x128x128xf32>
    %54 = vector.shape_cast %53 : vector<1x128x128xf32> to vector<128x128xf32>
    %cst_44 = arith.constant dense<0.000000e+00> : vector<48x128xf32>
    %55 = tpu.matmul %52, %54, %cst_44 {dimension_numbers = #tpu.dot_dimension_numbers<[1], [0], [0], [1], [0, 0, 1, 1], [], []>} : vector<48x128xf32>, vector<128x128xf32>, vector<48x128xf32> -> vector<48x128xf32>
    %c8_45 = arith.constant 8 : index
    %c0_46 = arith.constant 0 : index
    %56 = vector.load %arg14[%c8_45, %c0_46] : memref<64x128xf32, #tpu.memory_space<vmem>>, vector<48x128xf32>
    %c1_47 = arith.constant 1 : index
    %c0_48 = arith.constant 0 : index
    %c0_49 = arith.constant 0 : index
    %57 = vector.load %arg3[%c1_47, %c0_48, %c0_49] : memref<3x128x128xf32, #tpu.memory_space<vmem>>, vector<1x128x128xf32>
    %58 = vector.shape_cast %57 : vector<1x128x128xf32> to vector<128x128xf32>
    %cst_50 = arith.constant dense<0.000000e+00> : vector<48x128xf32>
    %59 = tpu.matmul %56, %58, %cst_50 {dimension_numbers = #tpu.dot_dimension_numbers<[1], [0], [0], [1], [0, 0, 1, 1], [], []>} : vector<48x128xf32>, vector<128x128xf32>, vector<48x128xf32> -> vector<48x128xf32>
    %60 = arith.addf %55, %59 : vector<48x128xf32>
    %c9_51 = arith.constant 9 : index
    %c0_52 = arith.constant 0 : index
    %61 = vector.load %arg14[%c9_51, %c0_52] : memref<64x128xf32, #tpu.memory_space<vmem>>, vector<48x128xf32>
    %c2_53 = arith.constant 2 : index
    %c0_54 = arith.constant 0 : index
    %c0_55 = arith.constant 0 : index
    %62 = vector.load %arg3[%c2_53, %c0_54, %c0_55] : memref<3x128x128xf32, #tpu.memory_space<vmem>>, vector<1x128x128xf32>
    %63 = vector.shape_cast %62 : vector<1x128x128xf32> to vector<128x128xf32>
    %cst_56 = arith.constant dense<0.000000e+00> : vector<48x128xf32>
    %64 = tpu.matmul %61, %63, %cst_56 {dimension_numbers = #tpu.dot_dimension_numbers<[1], [0], [0], [1], [0, 0, 1, 1], [], []>} : vector<48x128xf32>, vector<128x128xf32>, vector<48x128xf32> -> vector<48x128xf32>
    %65 = arith.addf %60, %64 : vector<48x128xf32>
    %66 = vector.extract_strided_slice %65 {offsets = [0, 0], sizes = [16, 128], strides = [1, 1]} : vector<48x128xf32> to vector<16x128xf32>
    %c0_57 = arith.constant 0 : index
    %c0_58 = arith.constant 0 : index
    %67 = vector.load %arg4[%c0_57, %c0_58] : memref<1x128xf32, #tpu.memory_space<vmem>>, vector<1x128xf32>
    %68 = vector.broadcast %67 : vector<1x128xf32> to vector<16x128xf32>
    %69 = arith.addf %66, %68 : vector<16x128xf32>
    %cst_59 = arith.constant 0.000000e+00 : f32
    %70 = vector.broadcast %cst_59 : f32 to vector<16x128xf32>
    %71 = arith.cmpf ogt, %69, %70 : vector<16x128xf32>
    %cst_60 = arith.constant 0.00999999977 : f32
    %72 = vector.broadcast %cst_60 : f32 to vector<16x128xf32>
    %73 = arith.mulf %72, %69 : vector<16x128xf32>
    %74 = arith.select %71, %69, %73 : vector<16x128xi1>, vector<16x128xf32>
    %c8_61 = arith.constant 8 : index
    %c0_62 = arith.constant 0 : index
    %75 = vector.load %arg14[%c8_61, %c0_62] : memref<64x128xf32, #tpu.memory_space<vmem>>, vector<16x128xf32>
    tpu.vector_store %arg14[%c8_61, %c0_62], %74 {strides = array<i32>} : memref<64x128xf32, #tpu.memory_space<vmem>>, vector<16x128xf32>,
    %76 = vector.extract_strided_slice %65 {offsets = [32, 0], sizes = [16, 128], strides = [1, 1]} : vector<48x128xf32> to vector<16x128xf32>
    %c0_63 = arith.constant 0 : index
    %c0_64 = arith.constant 0 : index
    %77 = vector.load %arg4[%c0_63, %c0_64] : memref<1x128xf32, #tpu.memory_space<vmem>>, vector<1x128xf32>
    %78 = vector.broadcast %77 : vector<1x128xf32> to vector<16x128xf32>
    %79 = arith.addf %76, %78 : vector<16x128xf32>
    %cst_65 = arith.constant 0.000000e+00 : f32
    %80 = vector.broadcast %cst_65 : f32 to vector<16x128xf32>
    %81 = arith.cmpf ogt, %79, %80 : vector<16x128xf32>
    %cst_66 = arith.constant 0.00999999977 : f32
    %82 = vector.broadcast %cst_66 : f32 to vector<16x128xf32>
    %83 = arith.mulf %82, %79 : vector<16x128xf32>
    %84 = arith.select %81, %79, %83 : vector<16x128xi1>, vector<16x128xf32>
    %c40_67 = arith.constant 40 : index
    %c0_68 = arith.constant 0 : index
    %85 = vector.load %arg14[%c40_67, %c0_68] : memref<64x128xf32, #tpu.memory_space<vmem>>, vector<16x128xf32>
    tpu.vector_store %arg14[%c40_67, %c0_68], %84 {strides = array<i32>} : memref<64x128xf32, #tpu.memory_space<vmem>>, vector<16x128xf32>,
    %c8_69 = arith.constant 8 : index
    %c0_70 = arith.constant 0 : index
    %86 = vector.load %arg14[%c8_69, %c0_70] : memref<64x128xf32, #tpu.memory_space<vmem>>, vector<46x128xf32>
    %c0_71 = arith.constant 0 : index
    %c0_72 = arith.constant 0 : index
    %c0_73 = arith.constant 0 : index
    %87 = vector.load %arg5[%c0_71, %c0_72, %c0_73] : memref<3x128x112xf32, #tpu.memory_space<vmem>>, vector<1x128x112xf32>
    %88 = vector.shape_cast %87 : vector<1x128x112xf32> to vector<128x112xf32>
    %cst_74 = arith.constant dense<0.000000e+00> : vector<46x112xf32>
    %89 = tpu.matmul %86, %88, %cst_74 {dimension_numbers = #tpu.dot_dimension_numbers<[1], [0], [0], [1], [0, 0, 1, 1], [], []>} : vector<46x128xf32>, vector<128x112xf32>, vector<46x112xf32> -> vector<46x112xf32>
    %c9_75 = arith.constant 9 : index
    %c0_76 = arith.constant 0 : index
    %90 = vector.load %arg14[%c9_75, %c0_76] : memref<64x128xf32, #tpu.memory_space<vmem>>, vector<46x128xf32>
    %c1_77 = arith.constant 1 : index
    %c0_78 = arith.constant 0 : index
    %c0_79 = arith.constant 0 : index
    %91 = vector.load %arg5[%c1_77, %c0_78, %c0_79] : memref<3x128x112xf32, #tpu.memory_space<vmem>>, vector<1x128x112xf32>
    %92 = vector.shape_cast %91 : vector<1x128x112xf32> to vector<128x112xf32>
    %cst_80 = arith.constant dense<0.000000e+00> : vector<46x112xf32>
    %93 = tpu.matmul %90, %92, %cst_80 {dimension_numbers = #tpu.dot_dimension_numbers<[1], [0], [0], [1], [0, 0, 1, 1], [], []>} : vector<46x128xf32>, vector<128x112xf32>, vector<46x112xf32> -> vector<46x112xf32>
    %94 = arith.addf %89, %93 : vector<46x112xf32>
    %c10_81 = arith.constant 10 : index
    %c0_82 = arith.constant 0 : index
    %95 = vector.load %arg14[%c10_81, %c0_82] : memref<64x128xf32, #tpu.memory_space<vmem>>, vector<46x128xf32>
    %c2_83 = arith.constant 2 : index
    %c0_84 = arith.constant 0 : index
    %c0_85 = arith.constant 0 : index
    %96 = vector.load %arg5[%c2_83, %c0_84, %c0_85] : memref<3x128x112xf32, #tpu.memory_space<vmem>>, vector<1x128x112xf32>
    %97 = vector.shape_cast %96 : vector<1x128x112xf32> to vector<128x112xf32>
    %cst_86 = arith.constant dense<0.000000e+00> : vector<46x112xf32>
    %98 = tpu.matmul %95, %97, %cst_86 {dimension_numbers = #tpu.dot_dimension_numbers<[1], [0], [0], [1], [0, 0, 1, 1], [], []>} : vector<46x128xf32>, vector<128x112xf32>, vector<46x112xf32> -> vector<46x112xf32>
    %99 = arith.addf %94, %98 : vector<46x112xf32>
    %c0_87 = arith.constant 0 : index
    %c0_88 = arith.constant 0 : index
    %100 = vector.load %arg6[%c0_87, %c0_88] : memref<1x112xf32, #tpu.memory_space<vmem>>, vector<1x112xf32>
    %101 = vector.broadcast %100 : vector<1x112xf32> to vector<46x112xf32>
    %102 = arith.addf %99, %101 : vector<46x112xf32>
    %cst_89 = arith.constant 0.000000e+00 : f32
    %103 = vector.broadcast %cst_89 : f32 to vector<46x112xf32>
    %104 = arith.cmpf ogt, %102, %103 : vector<46x112xf32>
    %cst_90 = arith.constant 0.00999999977 : f32
    %105 = vector.broadcast %cst_90 : f32 to vector<46x112xf32>
    %106 = arith.mulf %105, %102 : vector<46x112xf32>
    %107 = arith.select %104, %102, %106 : vector<46x112xi1>, vector<46x112xf32>
    %c0_91 = arith.constant 0 : index
    %c0_92 = arith.constant 0 : index
    %108 = vector.load %arg7[%c0_91, %c0_92] : memref<112x896xf32, #tpu.memory_space<vmem>>, vector<112x896xf32>
    %cst_93 = arith.constant dense<0.000000e+00> : vector<46x896xf32>
    %109 = tpu.matmul %107, %108, %cst_93 {dimension_numbers = #tpu.dot_dimension_numbers<[1], [0], [0], [1], [0, 0, 1, 1], [], []>} : vector<46x112xf32>, vector<112x896xf32>, vector<46x896xf32> -> vector<46x896xf32>
    %110 = tpu.iota {dimensions = array<i32: 0>} : vector<46x896xi32>
    %111 = tpu.iota {dimensions = array<i32: 1>} : vector<46x896xi32>
    %c31_i32 = arith.constant 31 : i32
    %112 = vector.broadcast %c31_i32 : i32 to vector<46x896xi32>
    %113 = arith.andi %110, %112 : vector<46x896xi32>
    %c6_i32 = arith.constant 6 : i32
    %114 = vector.broadcast %c6_i32 : i32 to vector<46x896xi32>
    %115 = arith.shrsi %111, %114 : vector<46x896xi32>
    %116 = arith.cmpi eq, %113, %115 : vector<46x896xi32>
    %cst_94 = arith.constant 0.000000e+00 : f32
    %117 = vector.broadcast %cst_94 : f32 to vector<46x896xf32>
    %118 = arith.select %116, %109, %117 : vector<46x896xi1>, vector<46x896xf32>
    %119 = tpu.iota {dimensions = array<i32: 0>} : vector<896x64xi32>
    %120 = tpu.iota {dimensions = array<i32: 1>} : vector<896x64xi32>
    %c63_i32 = arith.constant 63 : i32
    %121 = vector.broadcast %c63_i32 : i32 to vector<896x64xi32>
    %122 = arith.andi %119, %121 : vector<896x64xi32>
    %123 = arith.cmpi eq, %122, %120 : vector<896x64xi32>
    %124 = arith.extui %123 : vector<896x64xi1> to vector<896x64xi32>
    %125 = arith.sitofp %124 : vector<896x64xi32> to vector<896x64xf32>
    %cst_95 = arith.constant dense<0.000000e+00> : vector<46x64xf32>
    %126 = tpu.matmul %118, %125, %cst_95 {dimension_numbers = #tpu.dot_dimension_numbers<[1], [0], [0], [1], [0, 0, 1, 1], [], []>} : vector<46x896xf32>, vector<896x64xf32>, vector<46x64xf32> -> vector<46x64xf32>
    %127 = tpu.iota {dimensions = array<i32: 0>} : vector<2x46xi32>
    %128 = tpu.iota {dimensions = array<i32: 1>} : vector<2x46xi32>
    %c5_i32 = arith.constant 5 : i32
    %129 = vector.broadcast %c5_i32 : i32 to vector<2x46xi32>
    %130 = arith.shrsi %128, %129 : vector<2x46xi32>
    %131 = arith.cmpi eq, %130, %127 : vector<2x46xi32>
    %132 = arith.extui %131 : vector<2x46xi1> to vector<2x46xi32>
    %133 = arith.sitofp %132 : vector<2x46xi32> to vector<2x46xf32>
    %cst_96 = arith.constant dense<0.000000e+00> : vector<2x64xf32>
    %134 = tpu.matmul %133, %126, %cst_96 {dimension_numbers = #tpu.dot_dimension_numbers<[1], [0], [0], [1], [0, 0, 1, 1], [], []>} : vector<2x46xf32>, vector<46x64xf32>, vector<2x64xf32> -> vector<2x64xf32>
    %135 = vector.extract_strided_slice %134 {offsets = [0, 0], sizes = [2, 32], strides = [1, 1]} : vector<2x64xf32> to vector<2x32xf32>
    %c0_97 = arith.constant 0 : index
    %c0_98 = arith.constant 0 : index
    %136 = vector.load %arg8[%c0_97, %c0_98] : memref<1x32xf32, #tpu.memory_space<vmem>>, vector<1x32xf32>
    %137 = vector.broadcast %136 : vector<1x32xf32> to vector<2x32xf32>
    %138 = arith.addf %135, %137 : vector<2x32xf32>
    %cst_99 = arith.constant 0.000000e+00 : f32
    %139 = vector.broadcast %cst_99 : f32 to vector<2x32xf32>
    %140 = arith.cmpf ogt, %138, %139 : vector<2x32xf32>
    %cst_100 = arith.constant 0.00999999977 : f32
    %141 = vector.broadcast %cst_100 : f32 to vector<2x32xf32>
    %142 = arith.mulf %141, %138 : vector<2x32xf32>
    %143 = arith.select %140, %138, %142 : vector<2x32xi1>, vector<2x32xf32>
    %c0_101 = arith.constant 0 : index
    %c0_102 = arith.constant 0 : index
    %144 = vector.load %arg9[%c0_101, %c0_102] : memref<32x32xf32, #tpu.memory_space<vmem>>, vector<32x32xf32>
    %cst_103 = arith.constant dense<0.000000e+00> : vector<2x32xf32>
    %145 = tpu.matmul %143, %144, %cst_103 {dimension_numbers = #tpu.dot_dimension_numbers<[1], [0], [0], [1], [0, 0, 1, 1], [], []>} : vector<2x32xf32>, vector<32x32xf32>, vector<2x32xf32> -> vector<2x32xf32>
    %146 = vector.extract_strided_slice %134 {offsets = [0, 32], sizes = [2, 32], strides = [1, 1]} : vector<2x64xf32> to vector<2x32xf32>
    %147 = arith.addf %145, %146 : vector<2x32xf32>
    %c0_104 = arith.constant 0 : index
    %c0_105 = arith.constant 0 : index
    %148 = vector.load %arg10[%c0_104, %c0_105] : memref<1x32xf32, #tpu.memory_space<vmem>>, vector<1x32xf32>
    %149 = vector.broadcast %148 : vector<1x32xf32> to vector<2x32xf32>
    %150 = arith.addf %147, %149 : vector<2x32xf32>
    %cst_106 = arith.constant 0.000000e+00 : f32
    %151 = vector.broadcast %cst_106 : f32 to vector<2x32xf32>
    %152 = arith.cmpf ogt, %150, %151 : vector<2x32xf32>
    %cst_107 = arith.constant 0.00999999977 : f32
    %153 = vector.broadcast %cst_107 : f32 to vector<2x32xf32>
    %154 = arith.mulf %153, %150 : vector<2x32xf32>
    %155 = arith.select %152, %150, %154 : vector<2x32xi1>, vector<2x32xf32>
    %c0_108 = arith.constant 0 : index
    %c0_109 = arith.constant 0 : index
    %156 = vector.load %arg11[%c0_108, %c0_109] : memref<32x128xf32, #tpu.memory_space<vmem>>, vector<32x128xf32>
    %cst_110 = arith.constant dense<0.000000e+00> : vector<2x128xf32>
    %157 = tpu.matmul %155, %156, %cst_110 {dimension_numbers = #tpu.dot_dimension_numbers<[1], [0], [0], [1], [0, 0, 1, 1], [], []>} : vector<2x32xf32>, vector<32x128xf32>, vector<2x128xf32> -> vector<2x128xf32>
    %c0_111 = arith.constant 0 : index
    %c0_112 = arith.constant 0 : index
    %158 = vector.load %arg12[%c0_111, %c0_112] : memref<1x128xf32, #tpu.memory_space<vmem>>, vector<1x128xf32>
    %159 = vector.broadcast %158 : vector<1x128xf32> to vector<2x128xf32>
    %160 = arith.addf %157, %159 : vector<2x128xf32>
    %c0_113 = arith.constant 0 : index
    %c0_114 = arith.constant 0 : index
    %161 = vector.load %arg13[%c0_113, %c0_114] : memref<2x128xf32, #tpu.memory_space<vmem>>, vector<2x128xf32>
    tpu.vector_store %arg13[%c0_113, %c0_114], %160 {strides = array<i32>} : memref<2x128xf32, #tpu.memory_space<vmem>>, vector<2x128xf32>,
    return
  }
}

</mosaic_0001>

<bundles_post_ra>
// kernel: ppo_forward.1
= control target key start
LH: loop header
LB: loop body
LE: loop exit
PB: predicated region body
PF: predicated region fallthrough
CT: control target
= control target key end

     0   :  { %18 = vsyncpa [#allocation4], 0  ;;  %s5249_s25 = smov [#allocation3]   ;;  %s7278_s0 = inlined_call_operand.vmem [shape: f32[64,64], index: 0, kind: input, shape index: {}]   ;;  %s7279_s1 = inlined_call_operand.hbm [shape: f32[5,64,128], index: 1, kind: input, shape index: {}]   ;;  %s7280_s2 = inlined_call_operand.vmem [shape: f32[1,128], index: 2, kind: input, shape index: {}]   ;;  %s7281_s3 = inlined_call_operand.vmem [shape: f32[3,128,128], index: 3, kind: input, shape index: {}]   ;;  %s7282_s4 = inlined_call_operand.vmem [shape: f32[1,128], index: 4, kind: input, shape index: {}]   ;;  %s7283_s5 = inlined_call_operand.vmem [shape: f32[3,128,112], index: 5, kind: input, shape index: {}]   ;;  %s7284_s6 = inlined_call_operand.vmem [shape: f32[1,112], index: 6, kind: input, shape index: {}]   ;;  %s7285_s7 = inlined_call_operand.vmem [shape: f32[112,896], index: 7, kind: input, shape index: {}]   ;;  %s7286_s8 = inlined_call_operand.vmem [shape: f32[1,32], index: 8, kind: input, shape index: {}]   ;;  %s7287_s9 = inlined_call_operand.vmem [shape: f32[32,32], index: 9, kind: input, shape index: {}]   ;;  %s7288_s10 = inlined_call_operand.vmem [shape: f32[1,32], index: 10, kind: input, shape index: {}]   ;;  %s7289_s11 = inlined_call_operand.vmem [shape: f32[32,128], index: 11, kind: input, shape index: {}]   ;;  %s7290_s12 = inlined_call_operand.vmem [shape: f32[1,128], index: 12, kind: input, shape index: {}]   ;;  %s7291_s13 = inlined_call_operand.vmem [shape: f32[2,128], index: 13, kind: output, shape index: {}]  }
   0x1   :  { %s26_s26 = sshll.u32 %s5249_s25, 4  ;;  %s5225_s29 = scalar_lea.hbm %s7279_s1, 5120  ;;  %s27_s26 = int_to_ptr.vmem [resolvable:$true] %s26_s26 }
   0x2   :  { %p5226_p0 = scmp.ne.s32.totalorder %s7279_s1, %s5225_s29  ;;  %p5229_p1 = scmp.lt.u32.totalorder %s5225_s29, %s7279_s1 }
   0x4   :  { %p5231_p2 = pnand %p5229_p1, %p5226_p0 }
   0x6   :  { %5234 = shalt.err (!%p5231_p2)
}
   0x7   :  { %s5235_s17 = scalar_lea.vmem %s27_s26, 5120  ;;  %p5240_p4 = scmp.lt.s32.totalorder %s27_s26, %s27_s26 }
   0x8   :  { %p5236_p3 = scmp.ne.s32.totalorder %s27_s26, %s5235_s17  ;;  %p5241_p5 = scmp.lt.s32.totalorder %s5235_s17, %s5235_s17 }
   0xa   :  { %p5242_p6 = por %p5241_p5, %p5240_p4 }
   0xc   :  { %p5243_p7 = pnand %p5242_p6, %p5236_p3 }
   0xe   :  { %5246 = shalt.err (!%p5243_p7)
}
   0xf   :  { %s5250_s18 = smov 128   ;;  %s5251_s19 = smov 8  }
  0x10   :  { %32 = dma.hbm_to_vmem [thread:$0]  %s7279_s1, 5120, %s27_s26, [#allocation4], %s5250_s18, %s5250_s18, %s5251_s19  }
  0x11   :  { %5247 = dma.done.wait [#allocation4], 5120  }
  0x12   :  { %5248 = vsyncadd [#allocation4], 4294962176  ;;  %v79_v0 = vld [vmem:[#allocation3 + $0x40] sm:$0xff]  ;;  %v80_v1 = vld [vmem:[#allocation3 + $0x48] sm:$0xff]  ;;  %vm87_vm0 = vcmask 523264   ;;  %vm1611_vm12 = vcmask 916480  }
  0x13   :  { %v81_v2 = vld [vmem:[#allocation3 + $0x50] sm:$0xff]  ;;  %v4644_v3 = vpack.c.bf16 %v80_v1, %v79_v0  ;;  %v82_v4 = vld [vmem:[#allocation3 + $0x58] sm:$0xff]  ;;  %v83_v6 = vld [vmem:[#allocation3 + $0x60] sm:$0xff] }
  0x14   :  { %v4648_v5 = vpack.c.bf16 %v82_v4, %v81_v2  ;;  %v84_v7 = vld [vmem:[#allocation3 + $0x68] sm:$0xff]  ;;  %v85_v10 = vld [vmem:[#allocation3 + $0x70] sm:$0xff]  ;;  %v86_v11 = vld [vmem:[#allocation3 + $0x78] sm:$0xff] }
  0x15   :  { %v72_v8 = vld [vmem:[%s7278_s0 + $0x7] sm:$0xff]  ;;  %4645 = vmatprep.subr.bf16.mxu0 %v4644_v3  ;;  %v4652_v9 = vpack.c.bf16 %v84_v7, %v83_v6  ;;  %v4656_v12 = vpack.c.bf16 %v86_v11, %v85_v10  ;;  %v66_v16 = vld [vmem:[#allocation3 + $0x10] sm:$0xff]  ;;  %v67_v17 = vld [vmem:[#allocation3 + $0x18] sm:$0xff] }
  0x16   :  { %4174 = vmatprep.mubr.msk.f32.mxu0 %vm87_vm0, %v72_v8  ;;  %4647 = vmatpush3.bf16.msra.mxu0 %v4644_v3  ;;  %v64_v13 = vld [vmem:[#allocation3] sm:$0xff]  ;;  %v65_v14 = vld [vmem:[#allocation3 + $0x8] sm:$0xff]  ;;  %v4664_v19 = vpack.c.bf16 %v67_v17, %v66_v16  ;;  %v74_v20 = vld [vmem:[%s7278_s0 + $0x17] sm:$0xff] }
  0x17   :  { %4649 = vmatprep.subr.bf16.mxu0 %v4648_v5  ;;  %v4660_v15 = vpack.c.bf16 %v65_v14, %v64_v13  ;;  %v73_v18 = vld [vmem:[%s7278_s0 + $0xf] sm:$0xff]  ;;  %v68_v21 = vld [vmem:[#allocation3 + $0x20] sm:$0xff]  ;;  %v71_v27 = vld [vmem:[#allocation3 + $0x38] sm:$0xff] }
  0x18   :  { %v69_v22 = vld [vmem:[#allocation3 + $0x28] sm:$0xff]  ;;  %v75_v23 = vld [vmem:[%s7278_s0 + $0x1f] sm:$0xff]  ;;  %v70_v26 = vld [vmem:[#allocation3 + $0x30] sm:$0xff] }
  0x19   :  { %v4668_v24 = vpack.c.bf16 %v69_v22, %v68_v21  ;;  %v76_v25 = vld [vmem:[%s7278_s0 + $0x27] sm:$0xff]  ;;  %v77_v28 = vld [vmem:[%s7278_s0 + $0x2f] sm:$0xff]  ;;  %v4672_v29 = vpack.c.bf16 %v71_v27, %v70_v26  ;;  %v320_v35 = vld [vmem:[#allocation3 + $0x98] sm:$0xff] }
  0x1a   :  { %4651 = vmatpush3.bf16.msra.mxu0 %v4648_v5  ;;  %v58_v30 = vld [vmem:[%s7278_s0 + $0x6] sm:$0xff]  ;;  %v319_v34 = vld [vmem:[#allocation3 + $0x90] sm:$0xff]  ;;  %v61_v41 = vld [vmem:[%s7278_s0 + $0x1e] sm:$0xff] }
  0x1b   :  { %4653 = vmatprep.subr.bf16.mxu0 %v4652_v9  ;;  %v317_v31 = vld [vmem:[#allocation3 + $0x80] sm:$0xff]  ;;  %v318_v32 = vld [vmem:[#allocation3 + $0x88] sm:$0xff]  ;;  %v4680_v37 = vpack.c.bf16 %v320_v35, %v319_v34  ;;  %v60_v38 = vld [vmem:[%s7278_s0 + $0x16] sm:$0xff] }
  0x1c   :  { %v4676_v33 = vpack.c.bf16 %v318_v32, %v317_v31  ;;  %v59_v36 = vld [vmem:[%s7278_s0 + $0xe] sm:$0xff]  ;;  %v321_v39 = vld [vmem:[#allocation3 + $0xa0] sm:$0xff]  ;;  %v324_v45 = vld [vmem:[#allocation3 + $0xb8] sm:$0xff] }
  0x1d   :  { %v322_v40 = vld [vmem:[#allocation3 + $0xa8] sm:$0xff]  ;;  %v323_v44 = vld [vmem:[#allocation3 + $0xb0] sm:$0xff]  ;;  %v447_v49 = vld [vmem:[#allocation3 + $0xc0] sm:$0xff] }
  0x1e   :  { %4655 = vmatpush3.bf16.msra.mxu0 %v4652_v9  ;;  %v4684_v42 = vpack.c.bf16 %v322_v40, %v321_v39  ;;  %v62_v43 = vld [vmem:[%s7278_s0 + $0x26] sm:$0xff]  ;;  %v63_v46 = vld [vmem:[%s7278_s0 + $0x2e] sm:$0xff]  ;;  %v4688_v47 = vpack.c.bf16 %v324_v45, %v323_v44  ;;  %v450_v53 = vld [vmem:[#allocation3 + $0xd8] sm:$0xff] }
  0x1f   :  { %4657 = vmatprep.subr.bf16.mxu0 %v4656_v12  ;;  %v310_v48 = vld [vmem:[%s7278_s0 + $0x8] sm:$0xff]  ;;  %v449_v52 = vld [vmem:[#allocation3 + $0xd0] sm:$0xff]  ;;  %v312_v56 = vld [vmem:[%s7278_s0 + $0x18] sm:$0xff] }
  0x20   :  { %v448_v50 = vld [vmem:[#allocation3 + $0xc8] sm:$0xff]  ;;  %v311_v54 = vld [vmem:[%s7278_s0 + $0x10] sm:$0xff]  ;;  %v4696_v55 = vpack.c.bf16 %v450_v53, %v449_v52  ;;  %v451_v57 = vld [vmem:[#allocation3 + $0xe0] sm:$0xff]  ;;  %v5252_v53 = vmov 0.0  }
  0x21   :  { %v4692_v51 = vpack.c.bf16 %v448_v50, %v447_v49  ;;  %v452_v58 = vld [vmem:[#allocation3 + $0xe8] sm:$0xff]  ;;  %v313_v59 = vld [vmem:[%s7278_s0 + $0x20] sm:$0xff]  ;;  %v453_v62 = vld [vmem:[#allocation3 + $0xf0] sm:$0xff]  ;;  %701 = vst [vmem:[#allocation2 + $0x18] sm:$0xff] %v5252_v53 }
  0x22   :  { %4659 = vmatpush3.bf16.msra.mxu0 %v4656_v12  ;;  %v4700_v60 = vpack.c.bf16 %v452_v58, %v451_v57  ;;  %v314_v61 = vld [vmem:[%s7278_s0 + $0x28] sm:$0xff]  ;;  %v454_v63 = vld [vmem:[#allocation3 + $0xf8] sm:$0xff]  ;;  %v315_v0 = vld [vmem:[%s7278_s0 + $0x30] sm:$0xff]  ;;  %700 = vst [vmem:[#allocation2] sm:$0xff] %v5252_v53 }
  0x23   :  { %4661 = vmatprep.subr.bf16.mxu0 %v4660_v15  ;;  %v4704_v1 = vpack.c.bf16 %v454_v63, %v453_v62  ;;  %v440_v2 = vld [vmem:[%s7278_s0 + $0x9] sm:$0xff]  ;;  %v577_v3 = vld [vmem:[#allocation3 + $0x100] sm:$0xff]  ;;  %v580_v7 = vld [vmem:[#allocation3 + $0x118] sm:$0xff]  ;;  %719 = vst [vmem:[#allocation2 + $0x20] sm:$0xff] %v5252_v53 }
  0x24   :  { %v578_v4 = vld [vmem:[#allocation3 + $0x108] sm:$0xff]  ;;  %v579_v6 = vld [vmem:[#allocation3 + $0x110] sm:$0xff]  ;;  %v442_v10 = vld [vmem:[%s7278_s0 + $0x19] sm:$0xff]  ;;  %720 = vst [vmem:[#allocation2 + $0x38] sm:$0xff] %v5252_v53 }
  0x25   :  { %4175 = vmatmul.mubr.msk.f32.vlgmr.msra.gmra.mrb[0].mxu0 %vm87_vm0, %v73_v18  ;;  %v4708_v5 = vpack.c.bf16 %v578_v4, %v577_v3  ;;  %v441_v8 = vld [vmem:[%s7278_s0 + $0x11] sm:$0xff]  ;;  %v4712_v9 = vpack.c.bf16 %v580_v7, %v579_v6  ;;  %v581_v11 = vld [vmem:[#allocation3 + $0x120] sm:$0xff]  ;;  %v582_v12 = vld [vmem:[#allocation3 + $0x128] sm:$0xff] }
  0x26   :  { %4663 = vmatpush3.bf16.msra.mxu0 %v4660_v15  ;;  %4177 = vmatprep.mubr.msk.f32.mxu0 %vm87_vm0, %v74_v20  ;;  %v443_v13 = vld [vmem:[%s7278_s0 + $0x21] sm:$0xff]  ;;  %v4716_v14 = vpack.c.bf16 %v582_v12, %v581_v11  ;;  %v444_v15 = vld [vmem:[%s7278_s0 + $0x29] sm:$0xff]  ;;  %v584_v17 = vld [vmem:[#allocation3 + $0x138] sm:$0xff] }
  0x27   :  { %4665 = vmatprep.subr.bf16.mxu0 %v4664_v19  ;;  %v583_v16 = vld [vmem:[#allocation3 + $0x130] sm:$0xff]  ;;  %v572_v22 = vld [vmem:[%s7278_s0 + $0x1a] sm:$0xff]  ;;  %v3383_v27 = vld [vmem:[%s7281_s3 + $0x88] sm:$0xff] }
  0x28   :  { %v445_v18 = vld [vmem:[%s7278_s0 + $0x31] sm:$0xff]  ;;  %v3382_v26 = vld [vmem:[%s7281_s3 + $0x80] sm:$0xff]  ;;  %v3391_v39 = vld [vmem:[%s7281_s3 + $0xc8] sm:$0xff] }
  0x29   :  { %4178 = vmatmul.mubr.msk.f32.gmra.mrb[2].mxu0 %vm87_vm0, %v75_v23  ;;  %v570_v20 = vld [vmem:[%s7278_s0 + $0xa] sm:$0xff]  ;;  %v571_v21 = vld [vmem:[%s7278_s0 + $0x12] sm:$0xff]  ;;  %v573_v23 = vld [vmem:[%s7278_s0 + $0x22] sm:$0xff] }
  0x2a   :  { %4667 = vmatpush3.bf16.msra.mxu0 %v4664_v19  ;;  %4180 = vmatprep.mubr.msk.f32.mxu0 %vm87_vm0, %v76_v25  ;;  %v4720_v19 = vpack.c.bf16 %v584_v17, %v583_v16  ;;  %v575_v25 = vld [vmem:[%s7278_s0 + $0x32] sm:$0xff]  ;;  %v3386_v32 = vld [vmem:[%s7281_s3 + $0xa0] sm:$0xff]  ;;  %v3395_v45 = vld [vmem:[%s7281_s3 + $0xe8] sm:$0xff] }
  0x2b   :  { %4669 = vmatprep.subr.bf16.mxu0 %v4668_v24  ;;  %v3388_v35 = vld [vmem:[%s7281_s3 + $0xb0] sm:$0xff]  ;;  %v3394_v44 = vld [vmem:[%s7281_s3 + $0xe0] sm:$0xff] }
  0x2c   :  { %v744_v50 = vld [vmem:[%s7281_s3] sm:$0xff]  ;;  %v746_v4 = vld [vmem:[%s7281_s3 + $0x10] sm:$0xff] }
  0x2d   :  { %4181 = vmatmul.mubr.msk.f32.gmra.mrb[4].mxu0 %vm87_vm0, %v77_v28  ;;  %v4724_v28 = vpack.c.bf16 %v3383_v27, %v3382_v26  ;;  %v3380_v62 = vld [vmem:[%s7280_s2] ss:$0 sm:$0xff]  ;;  %v753_v27 = vld [vmem:[%s7281_s3 + $0x48] sm:$0xff] }
  0x2e   :  { %4671 = vmatpush3.bf16.msra.mxu0 %v4668_v24  ;;  %4199 = vmatprep.mubr.msk.f32.mxu0 %vm87_vm0, %v58_v30  ;;  %v574_v24 = vld [vmem:[%s7278_s0 + $0x2a] sm:$0xff]  ;;  %v3385_v30 = vld [vmem:[%s7281_s3 + $0x98] sm:$0xff]  ;;  %v748_v12 = vld [vmem:[%s7281_s3 + $0x20] sm:$0xff]  ;;  %s5257_s0 = smov 96  }
  0x2f   :  { %4673 = vmatprep.subr.bf16.mxu0 %v4672_v29  ;;  %4725 = vmatprep.subr.bf16.mxu1 %v4724_v28  ;;  %v752_v26 = vld [vmem:[%s7281_s3 + $0x40] sm:$0xff] }
  0x30   :  { %4727 = vmatpush3.bf16.msra.mxu1 %v4724_v28 }
  0x32   :  { %4675 = vmatpush3.bf16.msra.mxu0 %v4672_v29  ;;  %v3384_v29 = vld [vmem:[%s7281_s3 + $0x90] sm:$0xff] }
  0x33   :  { %4677 = vmatprep.subr.bf16.mxu0 %v4676_v33  ;;  %v4728_v31 = vpack.c.bf16 %v3385_v30, %v3384_v29  ;;  %v4772_v29 = vpack.c.bf16 %v753_v27, %v752_v26  ;;  %v754_v30 = vld [vmem:[%s7281_s3 + $0x50] sm:$0xff]  ;;  %v3427_v27 = vld [vmem:[%s7283_s5 + $0xd8] sm:$0xff] }
  0x34   :  { %v3426_v26 = vld [vmem:[%s7283_s5 + $0xd0] sm:$0xff] }
  0x35   :  { %4200 = vmatmul.mubr.msk.f32.vlgmr.msra.gmra.mrb[0].mxu0 %vm87_vm0, %v59_v36  ;;  %4729 = vmatprep.subr.bf16.mxu1 %v4728_v31  ;;  %v3389_v36 = vld [vmem:[%s7281_s3 + $0xb8] sm:$0xff] }
  0x36   :  { %4679 = vmatpush3.bf16.msra.mxu0 %v4676_v33  ;;  %4202 = vmatprep.mubr.msk.f32.mxu0 %vm87_vm0, %v60_v38  ;;  %v3387_v33 = vld [vmem:[%s7281_s3 + $0xa8] sm:$0xff]  ;;  %v3390_v38 = vld [vmem:[%s7281_s3 + $0xc0] sm:$0xff] }
  0x37   :  { %4681 = vmatprep.subr.bf16.mxu0 %v4680_v37  ;;  %4731 = vmatpush3.bf16.msra.mxu1 %v4728_v31  ;;  %v4732_v34 = vpack.c.bf16 %v3387_v33, %v3386_v32  ;;  %v4740_v40 = vpack.c.bf16 %v3391_v39, %v3390_v38  ;;  %v755_v31 = vld [vmem:[%s7281_s3 + $0x58] sm:$0xff]  ;;  %v756_v33 = vld [vmem:[%s7281_s3 + $0x60] sm:$0xff] }
  0x38   :  { %v4776_v32 = vpack.c.bf16 %v755_v31, %v754_v30  ;;  %v3398_v39 = vld [vmem:[%s7281_s3 + $0x100] sm:$0xff]  ;;  %v3429_v30 = vld [vmem:[%s7283_s5 + $0xe8] sm:$0xff] }
  0x39   :  { %4203 = vmatmul.mubr.msk.f32.gmra.mrb[6].mxu0 %vm87_vm0, %v61_v41  ;;  %4733 = vmatprep.subr.bf16.mxu1 %v4732_v34  ;;  %v3392_v41 = vld [vmem:[%s7281_s3 + $0xd0] sm:$0xff] }
  0x3a   :  { %4683 = vmatpush3.bf16.msra.mxu0 %v4680_v37  ;;  %4205 = vmatprep.mubr.msk.f32.mxu0 %vm87_vm0, %v62_v43  ;;  %v4736_v37 = vpack.c.bf16 %v3389_v36, %v3388_v35  ;;  %v758_v36 = vld [vmem:[%s7281_s3 + $0x70] sm:$0xff] }
  0x3b   :  { %4685 = vmatprep.subr.bf16.mxu0 %v4684_v42  ;;  %4735 = vmatpush3.bf16.msra.mxu1 %v4732_v34  ;;  %v757_v34 = vld [vmem:[%s7281_s3 + $0x68] sm:$0xff] }
  0x3c   :  { %4737 = vmatprep.subr.bf16.mxu1 %v4736_v37  ;;  %v4780_v35 = vpack.c.bf16 %v757_v34, %v756_v33  ;;  %v3431_v33 = vld [vmem:[%s7283_s5 + $0xf8] sm:$0xff] }
  0x3d   :  { %4206 = vmatmul.mubr.msk.f32.gmra.mrb[4].mxu0 %vm87_vm0, %v63_v46  ;;  %v4748_v46 = vpack.c.bf16 %v3395_v45, %v3394_v44 }
  0x3e   :  { %4687 = vmatpush3.bf16.msra.mxu0 %v4684_v42  ;;  %4224 = vmatprep.mubr.msk.f32.mxu0 %vm87_vm0, %v310_v48  ;;  %v3393_v42 = vld [vmem:[%s7281_s3 + $0xd8] sm:$0xff] }
  0x3f   :  { %4689 = vmatprep.subr.bf16.mxu0 %v4688_v47  ;;  %4739 = vmatpush3.bf16.msra.mxu1 %v4736_v37  ;;  %v4744_v43 = vpack.c.bf16 %v3393_v42, %v3392_v41  ;;  %v3397_v48 = vld [vmem:[%s7281_s3 + $0xf8] sm:$0xff]  ;;  %v3400_v42 = vld [vmem:[%s7281_s3 + $0x110] sm:$0xff] }
  0x40   :  { %4741 = vmatprep.subr.bf16.mxu1 %v4740_v40  ;;  %v759_v37 = vld [vmem:[%s7281_s3 + $0x78] sm:$0xff] }
  0x41   :  { %v4784_v38 = vpack.c.bf16 %v759_v37, %v758_v36  ;;  %v1130_v36 = vld [vmem:[%s7283_s5 + $0x8] sm:$0xff] }
  0x42   :  { %4691 = vmatpush3.bf16.msra.mxu0 %v4688_v47  ;;  %v3396_v47 = vld [vmem:[%s7281_s3 + $0xf0] sm:$0xff] }
  0x43   :  { %4693 = vmatprep.subr.bf16.mxu0 %v4692_v51  ;;  %4743 = vmatpush3.bf16.msra.mxu1 %v4740_v40  ;;  %v4752_v49 = vpack.c.bf16 %v3397_v48, %v3396_v47  ;;  %v3399_v40 = vld [vmem:[%s7281_s3 + $0x108] sm:$0xff] }
  0x44   :  { %4745 = vmatprep.subr.bf16.mxu1 %v4744_v43  ;;  %v4788_v41 = vpack.c.bf16 %v3399_v40, %v3398_v39  ;;  %v3403_v47 = vld [vmem:[%s7281_s3 + $0x128] sm:$0xff] }
  0x45   :  { %4225 = vmatmul.mubr.msk.f32.vlgmr.msra.gmra.mrb[0].mxu0 %vm87_vm0, %v311_v54  ;;  %v1514_v40 = vld [vmem:[%s7285_s7 + $0x8] sm:$0xff] }
  0x46   :  { %4695 = vmatpush3.bf16.msra.mxu0 %v4692_v51  ;;  %4227 = vmatprep.mubr.msk.f32.mxu0 %vm87_vm0, %v312_v56  ;;  %v745_v51 = vld [vmem:[%s7281_s3 + $0x8] sm:$0xff] }
  0x47   :  { %4697 = vmatprep.subr.bf16.mxu0 %v4696_v55  ;;  %4747 = vmatpush3.bf16.msra.mxu1 %v4744_v43  ;;  %v4756_v52 = vpack.c.bf16 %v745_v51, %v744_v50  ;;  %v3401_v43 = vld [vmem:[%s7281_s3 + $0x118] sm:$0xff]  ;;  %v3404_v51 = vld [vmem:[%s7281_s3 + $0x130] sm:$0xff] }
  0x48   :  { %4749 = vmatprep.subr.bf16.mxu1 %v4748_v46  ;;  %v4792_v44 = vpack.c.bf16 %v3401_v43, %v3400_v42  ;;  %v1513_v42 = vld [vmem:[%s7285_s7] sm:$0xff] }
  0x49   :  { %4228 = vmatmul.mubr.msk.f32.gmra.mrb[8].mxu0 %vm87_vm0, %v313_v59 }
  0x4a   :  { %4699 = vmatpush3.bf16.msra.mxu0 %v4696_v55  ;;  %4230 = vmatprep.mubr.msk.f32.mxu0 %vm87_vm0, %v314_v61 }
  0x4b   :  { %4701 = vmatprep.subr.bf16.mxu0 %v4700_v60  ;;  %4751 = vmatpush3.bf16.msra.mxu1 %v4748_v46  ;;  %v3402_v46 = vld [vmem:[%s7281_s3 + $0x120] sm:$0xff] }
  0x4c   :  { %4753 = vmatprep.subr.bf16.mxu1 %v4752_v49  ;;  %v4796_v50 = vpack.c.bf16 %v3403_v47, %v3402_v46  ;;  %v1528_v46 = vld [vmem:[%s7285_s7 + $0x78] sm:$0xff]  ;;  %v1535_v47 = vld [vmem:[%s7285_s7 + $0xb0] sm:$0xff] }
  0x4d   :  { %4231 = vmatmul.mubr.msk.f32.gmra.mrb[4].mxu0 %vm87_vm0, %v315_v0 }
  0x4e   :  { %4703 = vmatpush3.bf16.msra.mxu0 %v4700_v60  ;;  %4249 = vmatprep.mubr.msk.f32.mxu0 %vm87_vm0, %v440_v2 }
  0x4f   :  { %4705 = vmatprep.subr.bf16.mxu0 %v4704_v1  ;;  %4755 = vmatpush3.bf16.msra.mxu1 %v4752_v49  ;;  %v741_v49 = vld [vmem:[#allocation2 + $0x1f] sm:$0xff] }
  0x50   :  { %4757 = vmatprep.subr.bf16.mxu1 %v4756_v52 }
  0x52   :  { %4707 = vmatpush3.bf16.msra.mxu0 %v4704_v1 }
  0x53   :  { %4709 = vmatprep.subr.bf16.mxu0 %v4708_v5 }
  0x55   :  { %4250 = vmatmul.mubr.msk.f32.vlgmr.msra.gmra.mrb[0].mxu0 %vm87_vm0, %v441_v8 }
  0x56   :  { %4711 = vmatpush3.bf16.msra.mxu0 %v4708_v5  ;;  %4252 = vmatprep.mubr.msk.f32.mxu0 %vm87_vm0, %v442_v10  ;;  %v747_v5 = vld [vmem:[%s7281_s3 + $0x18] sm:$0xff] }
  0x57   :  { %4713 = vmatprep.subr.bf16.mxu0 %v4712_v9  ;;  %v4760_v11 = vpack.c.bf16 %v747_v5, %v746_v4  ;;  %v3413_v4 = vld [vmem:[%s7281_s3 + $0x178] sm:$0xff] }
  0x59   :  { %4253 = vmatmul.mubr.msk.f32.gmra.mrb[10].mxu0 %vm87_vm0, %v443_v13  ;;  %v749_v13 = vld [vmem:[%s7281_s3 + $0x28] sm:$0xff] }
  0x5a   :  { %4715 = vmatpush3.bf16.msra.mxu0 %v4712_v9  ;;  %4255 = vmatprep.mubr.msk.f32.mxu0 %vm87_vm0, %v444_v15 }
  0x5b   :  { %4717 = vmatprep.subr.bf16.mxu0 %v4716_v14 }
  0x5d   :  { %4256 = vmatmul.mubr.msk.f32.gmra.mrb[4].mxu0 %vm87_vm0, %v445_v18  ;;  %v4764_v18 = vpack.c.bf16 %v749_v13, %v748_v12  ;;  %v3417_v12 = vld [vmem:[%s7283_s5 + $0x88] sm:$0xff]  ;;  %v3418_v13 = vld [vmem:[%s7283_s5 + $0x90] sm:$0xff] }
  0x5e   :  { %4719 = vmatpush3.bf16.msra.mxu0 %v4716_v14  ;;  %4274 = vmatprep.mubr.msk.f32.mxu0 %vm87_vm0, %v570_v20  ;;  %v750_v20 = vld [vmem:[%s7281_s3 + $0x30] sm:$0xff] }
  0x5f   :  { %4721 = vmatprep.subr.bf16.mxu0 %v4720_v19 }
  0x62   :  { %4723 = vmatpush3.bf16.msra.mxu0 %v4720_v19 }
  0x65   :  { %4275 = vmatmul.mubr.msk.f32.vlgmr.msra.gmra.mrb[0].mxu0 %vm87_vm0, %v571_v21  ;;  %v751_v21 = vld [vmem:[%s7281_s3 + $0x38] sm:$0xff] }
  0x66   :  { %4277 = vmatprep.mubr.msk.f32.mxu0 %vm87_vm0, %v572_v22 }
  0x69   :  { %4278 = vmatmul.mubr.msk.f32.gmra.mrb[12].mxu0 %vm87_vm0, %v573_v23 }
  0x6a   :  { %4280 = vmatprep.mubr.msk.f32.mxu0 %vm87_vm0, %v574_v24 }
  0x6d   :  { %4281 = vmatmul.mubr.msk.f32.gmra.mrb[4].mxu0 %vm87_vm0, %v575_v25  ;;  %v4768_v25 = vpack.c.bf16 %v751_v21, %v750_v20  ;;  %v3422_v20 = vld [vmem:[%s7283_s5 + $0xb0] sm:$0xff]  ;;  %v3423_v21 = vld [vmem:[%s7283_s5 + $0xb8] sm:$0xff] }
  0xfc   :  { %v4179_v54 = vpop.f32.mrb[2].mxu0 }
  0xfd   :  { %v182_v55 = vpop.f32.mrb[3].mxu0 }
 0x10c   :  { %v4204_v56 = vpop.f32.mrb[6].mxu0 }
 0x10d   :  { %v293_v57 = vpop.f32.mrb[7].mxu0 }
 0x10e   :  { %v3406_v57 = vld [vmem:[%s7281_s3 + $0x140] sm:$0xff] }
 0x11c   :  { %v4229_v58 = vpop.f32.mrb[8].mxu0 }
 0x11d   :  { %v419_v59 = vpop.f32.mrb[9].mxu0  ;;  %v3407_v58 = vld [vmem:[%s7281_s3 + $0x148] sm:$0xff] }
 0x12c   :  { %v4254_v60 = vpop.f32.mrb[10].mxu0 }
 0x12d   :  { %v549_v61 = vpop.f32.mrb[11].mxu0  ;;  %v4804_v60 = vpack.c.bf16 %v3407_v58, %v3406_v57  ;;  %v1548_v57 = vld [vmem:[%s7285_s7 + $0x118] sm:$0xff] }
 0x12e   :  { %v3408_v61 = vld [vmem:[%s7281_s3 + $0x150] sm:$0xff]  ;;  %v1556_v58 = vld [vmem:[%s7285_s7 + $0x158] sm:$0xff] }
 0x138   :  { %v4276_v63 = vpop.f32.mrb[0].mxu0 }
 0x139   :  { %v710_v0 = vadd.f32 %v4276_v63, %v3380_v62  ;;  %v669_v1 = vpop.f32.mrb[1].mxu0 }
 0x13a   :  { %v709_v2 = vadd.f32 %v3380_v62, %v669_v1  ;;  %v3411_v1 = vld [vmem:[%s7281_s3 + $0x168] sm:$0xff] }
 0x13b   :  { %vm712_vm1 = vcmp.gt.f32.partialorder %v710_v0, 0.0  ;;  %v714_v3 = vmul.f32 0.01, %v710_v0 }
 0x13c   :  { %vm711_vm2 = vcmp.gt.f32.partialorder %v709_v2, 0.0  ;;  %v713_v6 = vmul.f32 0.01, %v709_v2  ;;  %v4279_v7 = vpop.f32.mrb[12].mxu0 }
 0x13d   :  { %v716_v8 = vsel %vm712_vm1, %v710_v0, %v714_v3  ;;  %v679_v9 = vpop.f32.mrb[13].mxu0  ;;  %v3410_v0 = vld [vmem:[%s7281_s3 + $0x160] sm:$0xff]  ;;  %v3412_v3 = vld [vmem:[%s7281_s3 + $0x170] sm:$0xff] }
 0x13e   :  { %718 = vst [vmem:[#allocation2 + $0x10] sm:$0xff] %v716_v8  ;;  %v715_v10 = vsel %vm711_vm2, %v709_v2, %v713_v6  ;;  %v4812_v2 = vpack.c.bf16 %v3411_v1, %v3410_v0  ;;  %v4816_v5 = vpack.c.bf16 %v3413_v4, %v3412_v3  ;;  %v5613_v6 = vld [vmem:[#allocation2 + $0x19] sm:$0xff]  ;;  %v1570_v0 = vld [vmem:[%s7285_s7 + $0x1c8] sm:$0xff] }
 0x13f   :  { %717 = vst [vmem:[#allocation2 + $0x8] sm:$0xff] %v715_v10  ;;  %4315 = vmatprep.mubr.f32.mxu1 %v715_v10  ;;  %v1577_v1 = vld [vmem:[%s7285_s7 + $0x200] sm:$0xff] }
 0x140   :  { %v4282_v14 = vpop.f32.mrb[4].mxu0  ;;  %4316 = vmatmul.mubr.f32.vlgmr.msra.gmra.mrb[0].mxu1 %v716_v8 }
 0x141   :  { %v729_v15 = vadd.f32 %v4282_v14, %v3380_v62  ;;  %v687_v16 = vpop.f32.mrb[5].mxu0  ;;  %4759 = vmatpush3.bf16.msra.mxu1 %v4756_v52  ;;  %4318 = vmatprep.mubr.f32.mxu1 %v5252_v53  ;;  %v3405_v52 = vld [vmem:[%s7281_s3 + $0x138] sm:$0xff] }
 0x142   :  { %v728_v17 = vadd.f32 %v3380_v62, %v687_v16  ;;  %4761 = vmatprep.subr.bf16.mxu1 %v4760_v11  ;;  %v4800_v55 = vpack.c.bf16 %v3405_v52, %v3404_v51  ;;  %v3409_v62 = vld [vmem:[%s7281_s3 + $0x158] sm:$0xff]  ;;  %v1542_v52 = vld [vmem:[%s7285_s7 + $0xe8] sm:$0xff] }
 0x143   :  { %vm731_vm3 = vcmp.gt.f32.partialorder %v729_v15, 0.0  ;;  %v733_v19 = vmul.f32 0.01, %v729_v15  ;;  %v4808_v63 = vpack.c.bf16 %v3409_v62, %v3408_v61  ;;  %v1555_v62 = vld [vmem:[%s7285_s7 + $0x150] sm:$0xff] }
 0x144   :  { %vm730_vm4 = vcmp.gt.f32.partialorder %v728_v17, 0.0  ;;  %v732_v22 = vmul.f32 0.01, %v728_v17  ;;  %4319 = vmatmul.mubr.f32.gmra.mrb[2].mxu1 %v5252_v53 }
 0x145   :  { %v735_v23 = vsel %vm731_vm3, %v729_v15, %v733_v19  ;;  %4763 = vmatpush3.bf16.msra.mxu1 %v4760_v11  ;;  %v740_v48 = vld [vmem:[#allocation2 + $0x17] sm:$0xff]  ;;  %v3416_v11 = vld [vmem:[%s7283_s5 + $0x80] sm:$0xff] }
 0x146   :  { %737 = vst [vmem:[#allocation2 + $0x30] sm:$0xff] %v735_v23  ;;  %v734_v24 = vsel %vm730_vm4, %v728_v17, %v732_v22  ;;  %4765 = vmatprep.subr.bf16.mxu1 %v4764_v18  ;;  %v738_v28 = vld [vmem:[#allocation2 + $0x7] sm:$0xff]  ;;  %v739_v45 = vld [vmem:[#allocation2 + $0xf] sm:$0xff]  ;;  %v4820_v14 = vpack.c.bf16 %v3417_v12, %v3416_v11  ;;  %v3419_v15 = vld [vmem:[%s7283_s5 + $0x98] sm:$0xff]  ;;  %v4832_v22 = vpack.c.bf16 %v3423_v21, %v3422_v20 }
 0x147   :  { %736 = vst [vmem:[#allocation2 + $0x28] sm:$0xff] %v734_v24  ;;  %4321 = vmatprep.mubr.f32.mxu1 %v734_v24  ;;  %v969_v59 = vld [vmem:[#allocation2 + $0x9] sm:$0xff]  ;;  %v970_v7 = vld [vmem:[#allocation2 + $0x11] sm:$0xff]  ;;  %v4824_v16 = vpack.c.bf16 %v3419_v15, %v3418_v13  ;;  %v3420_v17 = vld [vmem:[%s7283_s5 + $0xa0] sm:$0xff] }
 0x148   :  { %4322 = vmatmul.mubr.f32.gmra.mrb[4].mxu1 %v735_v23  ;;  %4821 = vmatprep.subr.bf16.mxu0 %v4820_v14  ;;  %v3424_v23 = vld [vmem:[%s7283_s5 + $0xc0] sm:$0xff]  ;;  %v3425_v24 = vld [vmem:[%s7283_s5 + $0xc8] sm:$0xff]  ;;  %v1583_v13 = vld [vmem:[%s7285_s7 + $0x230] sm:$0xff] }
 0x149   :  { %4767 = vmatpush3.bf16.msra.mxu1 %v4764_v18  ;;  %4356 = vmatprep.mubr.f32.mxu1 %v738_v28  ;;  %v3421_v18 = vld [vmem:[%s7283_s5 + $0xa8] sm:$0xff]  ;;  %v4840_v28 = vpack.c.bf16 %v3427_v27, %v3426_v26 }
 0x14a   :  { %4769 = vmatprep.subr.bf16.mxu1 %v4768_v25  ;;  %4823 = vmatpush3.bf16.msra.mxu0 %v4820_v14  ;;  %v4828_v19 = vpack.c.bf16 %v3421_v18, %v3420_v17  ;;  %v1590_v14 = vld [vmem:[%s7285_s7 + $0x268] sm:$0xff] }
 0x14b   :  { %4825 = vmatprep.subr.bf16.mxu0 %v4824_v16  ;;  %v4938_v15 = vpack.c.bf16 %v1590_v14, %v1583_v13 }
 0x14d   :  { %4771 = vmatpush3.bf16.msra.mxu1 %v4768_v25  ;;  %v974_v10 = vld [vmem:[#allocation2 + $0x31] sm:$0xff]  ;;  %v4836_v25 = vpack.c.bf16 %v3425_v24, %v3424_v23 }
 0x14e   :  { %4773 = vmatprep.subr.bf16.mxu1 %v4772_v29  ;;  %v742_v54 = vld [vmem:[#allocation2 + $0x27] sm:$0xff]  ;;  %v743_v56 = vld [vmem:[#allocation2 + $0x2f] sm:$0xff]  ;;  %4827 = vmatpush3.bf16.msra.mxu0 %v4824_v16  ;;  %v3414_v16 = vld [vmem:[%s7282_s4] ss:$0 sm:$0xff] }
 0x14f   :  { %v972_v8 = vld [vmem:[#allocation2 + $0x21] sm:$0xff]  ;;  %v973_v9 = vld [vmem:[#allocation2 + $0x29] sm:$0xff]  ;;  %4829 = vmatprep.subr.bf16.mxu0 %v4828_v19 }
 0x151   :  { %4775 = vmatpush3.bf16.msra.mxu1 %v4772_v29  ;;  %v3428_v29 = vld [vmem:[%s7283_s5 + $0xe0] sm:$0xff] }
 0x152   :  { %4777 = vmatprep.subr.bf16.mxu1 %v4776_v32  ;;  %4831 = vmatpush3.bf16.msra.mxu0 %v4828_v19  ;;  %v4844_v31 = vpack.c.bf16 %v3429_v30, %v3428_v29 }
 0x153   :  { %4833 = vmatprep.subr.bf16.mxu0 %v4832_v22 }
 0x155   :  { %4779 = vmatpush3.bf16.msra.mxu1 %v4776_v32  ;;  %v3430_v32 = vld [vmem:[%s7283_s5 + $0xf0] sm:$0xff] }
 0x156   :  { %4781 = vmatprep.subr.bf16.mxu1 %v4780_v35  ;;  %4835 = vmatpush3.bf16.msra.mxu0 %v4832_v22  ;;  %v4848_v34 = vpack.c.bf16 %v3431_v33, %v3430_v32  ;;  %v1131_v32 = vld [vmem:[%s7283_s5 + $0x10] sm:$0xff]  ;;  %v1132_v33 = vld [vmem:[%s7283_s5 + $0x18] sm:$0xff] }
 0x157   :  { %4837 = vmatprep.subr.bf16.mxu0 %v4836_v25 }
 0x159   :  { %4783 = vmatpush3.bf16.msra.mxu1 %v4780_v35  ;;  %v1129_v35 = vld [vmem:[%s7283_s5] sm:$0xff] }
 0x15a   :  { %4785 = vmatprep.subr.bf16.mxu1 %v4784_v38  ;;  %4839 = vmatpush3.bf16.msra.mxu0 %v4836_v25  ;;  %v5671_v37 = vpack.c.bf16 %v1130_v36, %v1129_v35 }
 0x15b   :  { %4841 = vmatprep.subr.bf16.mxu0 %v4840_v28 }
 0x15d   :  { %4787 = vmatpush3.bf16.msra.mxu1 %v4784_v38 }
 0x15e   :  { %4789 = vmatprep.subr.bf16.mxu1 %v4788_v41  ;;  %4843 = vmatpush3.bf16.msra.mxu0 %v4840_v28 }
 0x15f   :  { %4845 = vmatprep.subr.bf16.mxu0 %v4844_v31 }
 0x160   :  { %4357 = vmatmul.mubr.f32.vlgmr.msra.gmra.mrb[0].mxu1 %v739_v45 }
 0x161   :  { %4359 = vmatprep.mubr.f32.mxu1 %v740_v48  ;;  %4791 = vmatpush3.bf16.msra.mxu1 %v4788_v41  ;;  %v1521_v41 = vld [vmem:[%s7285_s7 + $0x40] sm:$0xff]  ;;  %v1527_v48 = vld [vmem:[%s7285_s7 + $0x70] sm:$0xff] }
 0x162   :  { %4793 = vmatprep.subr.bf16.mxu1 %v4792_v44  ;;  %4847 = vmatpush3.bf16.msra.mxu0 %v4844_v31  ;;  %v4916_v43 = vpack.c.bf16 %v1521_v41, %v1514_v40  ;;  %v1133_v41 = vld [vmem:[%s7283_s5 + $0x20] sm:$0xff] }
 0x163   :  { %4849 = vmatprep.subr.bf16.mxu0 %v4848_v34 }
 0x164   :  { %4360 = vmatmul.mubr.f32.gmra.mrb[6].mxu1 %v741_v49  ;;  %v4920_v49 = vpack.c.bf16 %v1535_v47, %v1528_v46 }
 0x165   :  { %4362 = vmatprep.mubr.f32.mxu1 %v742_v54  ;;  %4795 = vmatpush3.bf16.msra.mxu1 %v4792_v44  ;;  %v1520_v44 = vld [vmem:[%s7285_s7 + $0x38] sm:$0xff]  ;;  %v1549_v54 = vld [vmem:[%s7285_s7 + $0x120] sm:$0xff] }
 0x166   :  { %4797 = vmatprep.subr.bf16.mxu1 %v4796_v50  ;;  %4851 = vmatpush3.bf16.msra.mxu0 %v4848_v34  ;;  %v4918_v45 = vpack.c.bf16 %v1520_v44, %v1513_v42  ;;  %v1134_v42 = vld [vmem:[%s7283_s5 + $0x28] sm:$0xff]  ;;  %v1135_v44 = vld [vmem:[%s7283_s5 + $0x30] sm:$0xff] }
 0x167   :  { %4853 = vmatprep.subr.bf16.mxu0 %v5671_v37 }
 0x168   :  { %4363 = vmatmul.mubr.f32.gmra.mrb[4].mxu1 %v743_v56  ;;  %v1541_v56 = vld [vmem:[%s7285_s7 + $0xe0] sm:$0xff] }
 0x169   :  { %4799 = vmatpush3.bf16.msra.mxu1 %v4796_v50  ;;  %4397 = vmatprep.mubr.f32.mxu1 %v969_v59  ;;  %v1534_v50 = vld [vmem:[%s7285_s7 + $0xa8] sm:$0xff]  ;;  %v1563_v59 = vld [vmem:[%s7285_s7 + $0x190] sm:$0xff] }
 0x16a   :  { %4801 = vmatprep.subr.bf16.mxu1 %v4800_v55  ;;  %v4922_v51 = vpack.c.bf16 %v1534_v50, %v1527_v48  ;;  %v4928_v61 = vpack.c.bf16 %v1563_v59, %v1556_v58  ;;  %v1143_v58 = vld [vmem:[%s7283_s5 + $0x70] sm:$0xff]  ;;  %v1144_v59 = vld [vmem:[%s7283_s5 + $0x78] sm:$0xff] }
 0x16d   :  { %4803 = vmatpush3.bf16.msra.mxu1 %v4800_v55  ;;  %v4924_v55 = vpack.c.bf16 %v1549_v54, %v1542_v52  ;;  %v1140_v52 = vld [vmem:[%s7283_s5 + $0x58] sm:$0xff] }
 0x16e   :  { %4805 = vmatprep.subr.bf16.mxu1 %v4804_v60 }
 0x171   :  { %4807 = vmatpush3.bf16.msra.mxu1 %v4804_v60  ;;  %v4926_v60 = vpack.c.bf16 %v1548_v57, %v1541_v56  ;;  %v1142_v56 = vld [vmem:[%s7283_s5 + $0x68] sm:$0xff] }
 0x172   :  { %4809 = vmatprep.subr.bf16.mxu1 %v4808_v63 }
 0x175   :  { %4811 = vmatpush3.bf16.msra.mxu1 %v4808_v63  ;;  %v1562_v63 = vld [vmem:[%s7285_s7 + $0x188] sm:$0xff] }
 0x176   :  { %4813 = vmatprep.subr.bf16.mxu1 %v4812_v2  ;;  %v4930_v3 = vpack.c.bf16 %v1562_v63, %v1555_v62  ;;  %v3433_v62 = vld [vmem:[%s7283_s5 + $0x108] sm:$0xff] }
 0x179   :  { %4815 = vmatpush3.bf16.msra.mxu1 %v4812_v2 }
 0x17a   :  { %4817 = vmatprep.subr.bf16.mxu1 %v4816_v5 }
 0x17d   :  { %4819 = vmatpush3.bf16.msra.mxu1 %v4816_v5  ;;  %v4932_v5 = vpack.c.bf16 %v1577_v1, %v1570_v0  ;;  %v3434_v0 = vld [vmem:[%s7283_s5 + $0x110] sm:$0xff]  ;;  %v3435_v1 = vld [vmem:[%s7283_s5 + $0x118] sm:$0xff] }
 0x17e   :  { %4917 = vmatprep.subr.bf16.mxu1 %v4916_v43  ;;  %v4860_v43 = vpack.c.bf16 %v1134_v42, %v1133_v41  ;;  %v1575_v42 = vld [vmem:[%s7285_s7 + $0x1f0] sm:$0xff] }
 0x180   :  { %4398 = vmatmul.mubr.f32.vlgmr.msra.gmra.mrb[0].mxu1 %v970_v7  ;;  %v1569_v7 = vld [vmem:[%s7285_s7 + $0x1c0] sm:$0xff] }
 0x181   :  { %4400 = vmatprep.mubr.f32.mxu1 %v5613_v6  ;;  %4919 = vmatpush1.bf16.msra.mxu1 %v4918_v45  ;;  %v1136_v45 = vld [vmem:[%s7283_s5 + $0x38] sm:$0xff] }
 0x182   :  { %4921 = vmatprep.subr.bf16.mxu1 %v4920_v49  ;;  %v4864_v48 = vpack.c.bf16 %v1136_v45, %v1135_v44  ;;  %v1589_v45 = vld [vmem:[%s7285_s7 + $0x260] sm:$0xff] }
 0x184   :  { %4401 = vmatmul.mubr.f32.gmra.mrb[8].mxu1 %v972_v8  ;;  %v1576_v8 = vld [vmem:[%s7285_s7 + $0x1f8] sm:$0xff] }
 0x185   :  { %4403 = vmatprep.mubr.f32.mxu1 %v973_v9  ;;  %4923 = vmatpush1.bf16.msra.mxu1 %v4922_v51  ;;  %v1584_v9 = vld [vmem:[%s7285_s7 + $0x238] sm:$0xff]  ;;  %v4934_v11 = vpack.c.bf16 %v1576_v8, %v1569_v7  ;;  %v1139_v51 = vld [vmem:[%s7283_s5 + $0x50] sm:$0xff] }
 0x186   :  { %4925 = vmatprep.subr.bf16.mxu1 %v4924_v55  ;;  %v4872_v54 = vpack.c.bf16 %v1140_v52, %v1139_v51  ;;  %v1141_v55 = vld [vmem:[%s7283_s5 + $0x60] sm:$0xff]  ;;  %v3438_v7 = vld [vmem:[%s7283_s5 + $0x130] sm:$0xff]  ;;  %v3439_v8 = vld [vmem:[%s7283_s5 + $0x138] sm:$0xff] }
 0x187   :  { %v4876_v57 = vpack.c.bf16 %v1142_v56, %v1141_v55  ;;  %v1603_v52 = vld [vmem:[%s7285_s7 + $0x2d0] sm:$0xff]  ;;  %v1516_v56 = vld [vmem:[%s7285_s7 + $0x18] sm:$0xff] }
 0x188   :  { %4404 = vmatmul.mubr.f32.gmra.mrb[4].mxu1 %v974_v10  ;;  %v1591_v10 = vld [vmem:[%s7285_s7 + $0x270] sm:$0xff] }
 0x189   :  { %1694 = vmatprep.mubr.f32.mxu1 %v5252_v53  ;;  %4927 = vmatpush1.bf16.msra.mxu1 %v4926_v60  ;;  %v4936_v12 = vpack.c.bf16 %v1591_v10, %v1584_v9  ;;  %v4880_v60 = vpack.c.bf16 %v1144_v59, %v1143_v58  ;;  %v4896_v9 = vpack.c.bf16 %v3439_v8, %v3438_v7  ;;  %v2028_v59 = vlaneseq }
 0x18a   :  { %4929 = vmatprep.subr.bf16.mxu1 %v4928_v61  ;;  %v3432_v61 = vld [vmem:[%s7283_s5 + $0x100] sm:$0xff] }
 0x18b   :  { %v4884_v63 = vpack.c.bf16 %v3433_v62, %v3432_v61 }
 0x18d   :  { %4931 = vmatpush1.bf16.msra.mxu1 %v4930_v3  ;;  %v3436_v3 = vld [vmem:[%s7283_s5 + $0x120] sm:$0xff] }
 0x18e   :  { %4933 = vmatprep.subr.bf16.mxu1 %v4932_v5 }
 0x191   :  { %4935 = vmatpush1.bf16.msra.mxu1 %v4934_v11  ;;  %v3440_v11 = vld [vmem:[%s7283_s5 + $0x140] sm:$0xff] }
 0x192   :  { %4937 = vmatprep.subr.bf16.mxu1 %v4936_v12  ;;  %v3441_v12 = vld [vmem:[%s7283_s5 + $0x148] sm:$0xff] }
 0x193   :  { %v4900_v14 = vpack.c.bf16 %v3441_v12, %v3440_v11 }
 0x195   :  { %4939 = vmatpush1.bf16.msra.mxu1 %v4938_v15  ;;  %v3442_v15 = vld [vmem:[%s7283_s5 + $0x150] sm:$0xff] }
 0x217   :  { %v4320_v38 = vpop.f32.mrb[2].mxu1 }
 0x218   :  { %v859_v39 = vpop.f32.mrb[3].mxu1 }
 0x219   :  { %v4856_v39 = vpack.c.bf16 %v1132_v33, %v1131_v32  ;;  %v1547_v32 = vld [vmem:[%s7285_s7 + $0x110] sm:$0xff]  ;;  %v1554_v33 = vld [vmem:[%s7285_s7 + $0x148] sm:$0xff] }
 0x237   :  { %v4361_v2 = vpop.f32.mrb[6].mxu1 }
 0x238   :  { %v952_v4 = vpop.f32.mrb[7].mxu1  ;;  %v4888_v2 = vpack.c.bf16 %v3435_v1, %v3434_v0 }
 0x239   :  { %v3437_v4 = vld [vmem:[%s7283_s5 + $0x128] sm:$0xff] }
 0x23a   :  { %v4892_v5 = vpack.c.bf16 %v3437_v4, %v3436_v3 }
 0x253   :  { %v4399_v17 = vpop.f32.mrb[0].mxu1 }
 0x254   :  { %v1097_v18 = vadd.f32 %v4399_v17, %v3414_v16  ;;  %v1058_v19 = vpop.f32.mrb[1].mxu1 }
 0x255   :  { %v1096_v20 = vadd.f32 %v3414_v16, %v1058_v19  ;;  %v3445_v19 = vld [vmem:[%s7283_s5 + $0x168] sm:$0xff] }
 0x256   :  { %vm1099_vm5 = vcmp.gt.f32.partialorder %v1097_v18, 0.0  ;;  %v1101_v21 = vmul.f32 0.01, %v1097_v18 }
 0x257   :  { %vm1098_vm6 = vcmp.gt.f32.partialorder %v1096_v20, 0.0  ;;  %v1100_v22 = vmul.f32 0.01, %v1096_v20  ;;  %v4402_v23 = vpop.f32.mrb[8].mxu1 }
 0x258   :  { %v5749_v24 = vsel %vm1099_vm5, %v1097_v18, %v1101_v21  ;;  %v1068_v25 = vpop.f32.mrb[9].mxu1  ;;  %v3444_v18 = vld [vmem:[%s7283_s5 + $0x160] sm:$0xff]  ;;  %v3446_v21 = vld [vmem:[%s7283_s5 + $0x170] sm:$0xff] }
 0x259   :  { %1105 = vst [vmem:[#allocation2 + $0x10] sm:$0xff] %v5749_v24  ;;  %v1102_v26 = vsel %vm1098_vm6, %v1096_v20, %v1100_v22  ;;  %v4908_v20 = vpack.c.bf16 %v3445_v19, %v3444_v18  ;;  %v3447_v22 = vld [vmem:[%s7283_s5 + $0x178] sm:$0xff]  ;;  %v1526_v25 = vld [vmem:[%s7285_s7 + $0x68] sm:$0xff] }
 0x25a   :  { %1104 = vst [vmem:[#allocation2 + $0x8] sm:$0xff] %v1102_v26  ;;  %v4912_v23 = vpack.c.bf16 %v3447_v22, %v3446_v21  ;;  %v1532_v19 = vld [vmem:[%s7285_s7 + $0x98] sm:$0xff] }
 0x25b   :  { %v4405_v27 = vpop.f32.mrb[4].mxu1 }
 0x25c   :  { %v1114_v28 = vadd.f32 %v4405_v27, %v3414_v16  ;;  %v1076_v29 = vpop.f32.mrb[5].mxu1  ;;  %v1533_v27 = vld [vmem:[%s7285_s7 + $0xa0] sm:$0xff] }
 0x25d   :  { %v1113_v30 = vadd.f32 %v3414_v16, %v1076_v29  ;;  %v3443_v16 = vld [vmem:[%s7283_s5 + $0x158] sm:$0xff] }
 0x25e   :  { %vm1116_vm7 = vcmp.gt.f32.partialorder %v1114_v28, 0.0  ;;  %v1118_v31 = vmul.f32 0.01, %v1114_v28  ;;  %v4904_v17 = vpack.c.bf16 %v3443_v16, %v3442_v15  ;;  %v1360_v29 = vld [vmem:[#allocation2 + $0x1a] sm:$0xff]  ;;  %v1530_v15 = vld [vmem:[%s7285_s7 + $0x88] sm:$0xff] }
 0x25f   :  { %vm1115_vm8 = vcmp.gt.f32.partialorder %v1113_v30, 0.0  ;;  %v1117_v34 = vmul.f32 0.01, %v1113_v30  ;;  %v1537_v16 = vld [vmem:[%s7285_s7 + $0xc0] sm:$0xff] }
 0x260   :  { %v1120_v35 = vsel %vm1116_vm7, %v1114_v28, %v1118_v31  ;;  %v1146_v40 = vld [vmem:[#allocation2 + $0x11] sm:$0xff] }
 0x261   :  { %1122 = vst [vmem:[#allocation2 + $0x30] sm:$0xff] %v1120_v35  ;;  %v5758_v36 = vsel %vm1115_vm8, %v1113_v30, %v1117_v34  ;;  %v1145_v38 = vld [vmem:[#allocation2 + $0x9] sm:$0xff]  ;;  %v1540_v28 = vld [vmem:[%s7285_s7 + $0xd8] sm:$0xff]  ;;  %v5008_v34 = vpack.c.bf16 %v1554_v33, %v1547_v32 }
 0x262   :  { %1121 = vst [vmem:[#allocation2 + $0x28] sm:$0xff] %v5758_v36  ;;  %4438 = vmatprep.mubr.f32.mxu0 %v1145_v38  ;;  %v1358_v13 = vld [vmem:[#allocation2 + $0xa] sm:$0xff]  ;;  %v5004_v30 = vpack.c.bf16 %v1540_v28, %v1533_v27  ;;  %v1359_v31 = vld [vmem:[#allocation2 + $0x12] sm:$0xff] }
 0x263   :  { %4439 = vmatmul.mubr.f32.vlgmr.msra.gmra.mrb[14].mxu0 %v1146_v40  ;;  %v1568_v38 = vld [vmem:[%s7285_s7 + $0x1b8] sm:$0xff] }
 0x264   :  { %4855 = vmatpush3.bf16.msra.mxu0 %v5671_v37  ;;  %4441 = vmatprep.mubr.f32.mxu0 %v5613_v6  ;;  %v1137_v6 = vld [vmem:[%s7283_s5 + $0x40] sm:$0xff]  ;;  %v1138_v37 = vld [vmem:[%s7283_s5 + $0x48] sm:$0xff]  ;;  %v1536_v27 = vld [vmem:[%s7285_s7 + $0xb8] sm:$0xff] }
 0x265   :  { %4857 = vmatprep.subr.bf16.mxu0 %v4856_v39  ;;  %v4868_v50 = vpack.c.bf16 %v1138_v37, %v1137_v6  ;;  %v1605_v6 = vld [vmem:[%s7285_s7 + $0x2e0] sm:$0xff] }
 0x268   :  { %4859 = vmatpush3.bf16.msra.mxu0 %v4856_v39  ;;  %v1150_v49 = vld [vmem:[#allocation2 + $0x31] sm:$0x3f] }
 0x269   :  { %v1148_v46 = vld [vmem:[#allocation2 + $0x21] sm:$0xff]  ;;  %4861 = vmatprep.subr.bf16.mxu0 %v4860_v43  ;;  %v1149_v47 = vld [vmem:[#allocation2 + $0x29] sm:$0xff]  ;;  %v1363_v41 = vld [vmem:[#allocation2 + $0x32] sm:$0x3f] }
 0x26a   :  { %4442 = vmatmul.mubr.f32.gmra.mrb[16].mxu0 %v1148_v46  ;;  %v1128_v10 = vld [vmem:[#allocation2 + $0x30] sm:$0x3f]  ;;  %v1361_v35 = vld [vmem:[#allocation2 + $0x22] sm:$0xff]  ;;  %v1596_v46 = vld [vmem:[%s7285_s7 + $0x298] sm:$0xff] }
 0x26b   :  { %4444 = vmatprep.mubr.f32.mxu0 %v1149_v47  ;;  %v1362_v39 = vld [vmem:[#allocation2 + $0x2a] sm:$0xff]  ;;  %v5020_v47 = vpack.c.bf16 %v1596_v46, %v1589_v45  ;;  %v1565_v46 = vld [vmem:[%s7285_s7 + $0x1a0] sm:$0xff] }
 0x26c   :  { %4863 = vmatpush3.bf16.msra.mxu0 %v4860_v43  ;;  %v1582_v43 = vld [vmem:[%s7285_s7 + $0x228] sm:$0xff] }
 0x26d   :  { %4865 = vmatprep.subr.bf16.mxu0 %v4864_v48  ;;  %v5016_v44 = vpack.c.bf16 %v1582_v43, %v1575_v42  ;;  %v1550_v42 = vld [vmem:[%s7285_s7 + $0x128] sm:$0xff] }
 0x26e   :  { %4445 = vmatmul.mubr.f32.gmra.mrb[18].mxu0 %v1150_v49  ;;  %v1597_v49 = vld [vmem:[%s7285_s7 + $0x2a0] sm:$0xff]  ;;  %v1558_v45 = vld [vmem:[%s7285_s7 + $0x168] sm:$0xff] }
 0x26f   :  { %4479 = vmatprep.mubr.f32.mxu0 %v1102_v26 }
 0x270   :  { %4867 = vmatpush3.bf16.msra.mxu0 %v4864_v48  ;;  %v1598_v48 = vld [vmem:[%s7285_s7 + $0x2a8] sm:$0xff] }
 0x271   :  { %4869 = vmatprep.subr.bf16.mxu0 %v4868_v50  ;;  %v4940_v37 = vpack.c.bf16 %v1605_v6, %v1598_v48 }
 0x273   :  { %4941 = vmatprep.subr.bf16.mxu1 %v4940_v37 }
 0x274   :  { %4871 = vmatpush3.bf16.msra.mxu0 %v4868_v50  ;;  %v1604_v50 = vld [vmem:[%s7285_s7 + $0x2d8] sm:$0xff] }
 0x275   :  { %4873 = vmatprep.subr.bf16.mxu0 %v4872_v54  ;;  %v4942_v51 = vpack.c.bf16 %v1604_v50, %v1597_v49  ;;  %v4956_v49 = vpack.c.bf16 %v1565_v46, %v1558_v45  ;;  %v1557_v50 = vld [vmem:[%s7285_s7 + $0x160] sm:$0xff]  ;;  %v1580_v46 = vld [vmem:[%s7285_s7 + $0x218] sm:$0xff] }
 0x276   :  { %v1573_v45 = vld [vmem:[%s7285_s7 + $0x1e0] sm:$0xff] }
 0x277   :  { %4943 = vmatpush1.bf16.msra.mxu1 %v4942_v51  ;;  %v1564_v51 = vld [vmem:[%s7285_s7 + $0x198] sm:$0xff] }
 0x278   :  { %4875 = vmatpush3.bf16.msra.mxu0 %v4872_v54  ;;  %v1610_v54 = vld [vmem:[%s7285_s7 + $0x308] sm:$0xff] }
 0x279   :  { %4877 = vmatprep.subr.bf16.mxu0 %v4876_v57  ;;  %v5024_v55 = vpack.c.bf16 %v1610_v54, %v1603_v52  ;;  %v1572_v54 = vld [vmem:[%s7285_s7 + $0x1d8] sm:$0xff] }
 0x27c   :  { %4879 = vmatpush3.bf16.msra.mxu0 %v4876_v57  ;;  %v1523_v57 = vld [vmem:[%s7285_s7 + $0x50] sm:$0xff] }
 0x27d   :  { %4881 = vmatprep.subr.bf16.mxu0 %v4880_v60  ;;  %v4944_v58 = vpack.c.bf16 %v1523_v57, %v1516_v56  ;;  %v4958_v56 = vpack.c.bf16 %v1564_v51, %v1557_v50  ;;  %v6027_v57 = vld [vmem:[#allocation2 + $0x18] sm:$0xff]  ;;  %v4990_v50 = vpack.c.bf16 %v1580_v46, %v1573_v45 }
 0x27f   :  { %4945 = vmatprep.subr.bf16.mxu1 %v4944_v58 }
 0x280   :  { %4883 = vmatpush3.bf16.msra.mxu0 %v4880_v60  ;;  %v5911_v60 = vshrl.u32 %v2028_v59, 7 }
 0x281   :  { %4885 = vmatprep.subr.bf16.mxu0 %v4884_v63 }
 0x282   :  { %v2182_v61 = vadd.s32 384, %v5911_v60  ;;  %v2183_v62 = vadd.s32 392, %v5911_v60  ;;  %v2166_v3 = vadd.s32 256, %v5911_v60  ;;  %v2167_v4 = vadd.s32 264, %v5911_v60 }
 0x283   :  { %4480 = vmatmul.mubr.f32.vlgmr.msra.gmra.mrb[14].mxu0 %v5749_v24  ;;  %v1519_v24 = vld [vmem:[%s7285_s7 + $0x30] sm:$0xff]  ;;  %v2158_v45 = vadd.s32 192, %v5911_v60  ;;  %v2159_v46 = vadd.s32 200, %v5911_v60 }
 0x284   :  { %4887 = vmatpush3.bf16.msra.mxu0 %v4884_v63  ;;  %4482 = vmatprep.mubr.f32.mxu0 %v5252_v53  ;;  %v5000_v26 = vpack.c.bf16 %v1526_v25, %v1519_v24  ;;  %v5915_v63 = vand.u32 127, %v2028_v59  ;;  %v2294_v0 = vand.u32 63, %v2182_v61  ;;  %v2295_v1 = vand.u32 63, %v2183_v62  ;;  %v1571_v59 = vld [vmem:[%s7285_s7 + $0x1d0] sm:$0xff]  ;;  %v1578_v61 = vld [vmem:[%s7285_s7 + $0x208] sm:$0xff] }
 0x285   :  { %4889 = vmatprep.subr.bf16.mxu0 %v4888_v2  ;;  %v2278_v7 = vand.u32 63, %v2166_v3  ;;  %v2279_v11 = vand.u32 63, %v2167_v4  ;;  %v4948_v25 = vpack.c.bf16 %v1537_v16, %v1530_v15  ;;  %v1586_v62 = vld [vmem:[%s7285_s7 + $0x248] sm:$0xff]  ;;  %v1585_v4 = vld [vmem:[%s7285_s7 + $0x240] sm:$0xff] }
 0x286   :  { %vm2406_vm9 = vcmp.eq.s32.totalorder %v2294_v0, %v5915_v63  ;;  %vm2407_vm10 = vcmp.eq.s32.totalorder %v2295_v1, %v5915_v63  ;;  %v1593_v0 = vld [vmem:[%s7285_s7 + $0x280] sm:$0xff]  ;;  %v4962_v1 = vpack.c.bf16 %v1578_v61, %v1571_v59  ;;  %v6162_v59 = vadd.s32 8, %v5911_v60 }
 0x287   :  { %4483 = vmatmul.mubr.f32.gmra.mrb[16].mxu0 %v5252_v53  ;;  %vm5060_vm11 = vmpackc.low %vm2407_vm10, %vm2406_vm9  ;;  %vm5938_vm13 = vcmp.eq.s32.totalorder %v2278_v7, %v5915_v63  ;;  %vm5943_vm0 = vcmp.eq.s32.totalorder %v2279_v11, %v5915_v63  ;;  %v4964_v3 = vpack.c.bf16 %v1593_v0, %v1586_v62  ;;  %v1600_v7 = vld [vmem:[%s7285_s7 + $0x2b8] sm:$0xff]  ;;  %v1599_v11 = vld [vmem:[%s7285_s7 + $0x2b0] sm:$0xff]  ;;  %v2152_v61 = vadd.s32 144, %v5911_v60 }
 0x288   :  { %4485 = vmatprep.mubr.f32.mxu0 %v5758_v36  ;;  %4891 = vmatpush3.bf16.msra.mxu0 %v4888_v2  ;;  %v1561_v36 = vld [vmem:[%s7285_s7 + $0x180] sm:$0xff]  ;;  %v5253_v2 = vmov 1.0|1.0   ;;  %vm5062_vm1 = vmpackc.low %vm5943_vm0, %vm5938_vm13  ;;  %v2153_v62 = vadd.s32 152, %v5911_v60 }
 0x289   :  { %4893 = vmatprep.subr.bf16.mxu0 %v4892_v5  ;;  %v5012_v40 = vpack.c.bf16 %v1568_v38, %v1561_v36 }
 0x28b   :  { %4486 = vmatmul.mubr.f32.gmra.mrb[18].mxu0 %v1128_v10  ;;  %v1522_v10 = vld [vmem:[%s7285_s7 + $0x48] sm:$0xff] }
 0x28c   :  { %4895 = vmatpush3.bf16.msra.mxu0 %v4892_v5  ;;  %4520 = vmatprep.mubr.f32.mxu0 %v1358_v13  ;;  %v3448_v5 = vld [vmem:[%s7284_s6] ss:$0 sm:$0xff] }
 0x28d   :  { %4897 = vmatprep.subr.bf16.mxu0 %v4896_v9 }
 0x290   :  { %4899 = vmatpush3.bf16.msra.mxu0 %v4896_v9  ;;  %v1515_v9 = vld [vmem:[%s7285_s7 + $0x10] sm:$0xff] }
 0x291   :  { %4901 = vmatprep.subr.bf16.mxu0 %v4900_v14  ;;  %v4946_v18 = vpack.c.bf16 %v1522_v10, %v1515_v9 }
 0x294   :  { %4903 = vmatpush3.bf16.msra.mxu0 %v4900_v14 }
 0x295   :  { %4905 = vmatprep.subr.bf16.mxu0 %v4904_v17 }
 0x298   :  { %4907 = vmatpush3.bf16.msra.mxu0 %v4904_v17 }
 0x299   :  { %4909 = vmatprep.subr.bf16.mxu0 %v4908_v20 }
 0x29c   :  { %4911 = vmatpush3.bf16.msra.mxu0 %v4908_v20 }
 0x29d   :  { %4913 = vmatprep.subr.bf16.mxu0 %v4912_v23 }
 0x2a0   :  { %4915 = vmatpush3.bf16.msra.mxu0 %v4912_v23 }
 0x2a1   :  { %5001 = vmatprep.subr.bf16.mxu0 %v5000_v26 }
 0x2a3   :  { %4521 = vmatmul.mubr.f32.vlgmr.msra.gmra.mrb[14].mxu0 %v1359_v31  ;;  %v1551_v31 = vld [vmem:[%s7285_s7 + $0x130] sm:$0xff] }
 0x2a4   :  { %4523 = vmatprep.mubr.f32.mxu0 %v1360_v29  ;;  %5003 = vmatpush3.bf16.msra.mxu0 %v5000_v26  ;;  %v1529_v26 = vld [vmem:[%s7285_s7 + $0x80] sm:$0xff] }
 0x2a5   :  { %5005 = vmatprep.subr.bf16.mxu0 %v5004_v30  ;;  %v4950_v36 = vpack.c.bf16 %v1536_v27, %v1529_v26  ;;  %v1553_v26 = vld [vmem:[%s7285_s7 + $0x140] sm:$0xff] }
 0x2a7   :  { %4524 = vmatmul.mubr.f32.gmra.mrb[16].mxu0 %v1361_v35 }
 0x2a8   :  { %4526 = vmatprep.mubr.f32.mxu0 %v1362_v39  ;;  %5007 = vmatpush3.bf16.msra.mxu0 %v5004_v30  ;;  %v1544_v30 = vld [vmem:[%s7285_s7 + $0xf8] sm:$0xff] }
 0x2a9   :  { %5009 = vmatprep.subr.bf16.mxu0 %v5008_v34 }
 0x2ab   :  { %4527 = vmatmul.mubr.f32.gmra.mrb[18].mxu0 %v1363_v41  ;;  %v1543_v41 = vld [vmem:[%s7285_s7 + $0xf0] sm:$0xff] }
 0x2ac   :  { %5011 = vmatpush3.bf16.msra.mxu0 %v5008_v34  ;;  %v4954_v37 = vpack.c.bf16 %v1550_v42, %v1543_v41  ;;  %v1581_v41 = vld [vmem:[%s7285_s7 + $0x220] sm:$0xff] }
 0x2ad   :  { %5013 = vmatprep.subr.bf16.mxu0 %v5012_v40 }
 0x2b0   :  { %5015 = vmatpush3.bf16.msra.mxu0 %v5012_v40  ;;  %v4952_v40 = vpack.c.bf16 %v1551_v31, %v1544_v30  ;;  %v1545_v30 = vld [vmem:[%s7285_s7 + $0x100] sm:$0xff]  ;;  %v1552_v31 = vld [vmem:[%s7285_s7 + $0x138] sm:$0xff] }
 0x2b1   :  { %5017 = vmatprep.subr.bf16.mxu0 %v5016_v44 }
 0x2b4   :  { %5019 = vmatpush3.bf16.msra.mxu0 %v5016_v44 }
 0x2b5   :  { %5021 = vmatprep.subr.bf16.mxu0 %v5020_v47 }
 0x2b8   :  { %5023 = vmatpush3.bf16.msra.mxu0 %v5020_v47 }
 0x2b9   :  { %5025 = vmatprep.subr.bf16.mxu0 %v5024_v55 }
 0x2bc   :  { %5027 = vmatpush3.bf16.msra.mxu0 %v5024_v55 }
 0x2bd   :  { %5061 = vmatprep.subr.msk.bf16.mxu0 %vm5060_vm11, %v5253_v2 }
 0x376   :  { %v4522_v8 = vpop.f32.mrb[14].mxu0 }
 0x377   :  { %v1490_v12 = vadd.f32 %v4522_v8, %v3448_v5  ;;  %v1447_v13 = vpop.f32.mrb[15].mxu0  ;;  %v1607_v8 = vld [vmem:[%s7285_s7 + $0x2f0] sm:$0xff] }
 0x378   :  { %v1489_v14 = vadd.f32 %v3448_v5, %v1447_v13  ;;  %v4968_v10 = vpack.c.bf16 %v1607_v8, %v1600_v7  ;;  %v1518_v13 = vld [vmem:[%s7285_s7 + $0x28] sm:$0xff]  ;;  %v1608_v7 = vld [vmem:[%s7285_s7 + $0x2f8] sm:$0xff]  ;;  %v6176_v8 = vadd.s32 16, %v5911_v60 }
 0x379   :  { %v1502_v17 = vmul.f32 0.01, %v1490_v12  ;;  %vm1496_vm14 = vcmp.gt.f32.partialorder %v1490_v12, 0.0 }
 0x37a   :  { %vm1495_vm15 = vcmp.gt.f32.partialorder %v1489_v14, 0.0  ;;  %v1501_v20 = vmul.f32 0.01, %v1489_v14  ;;  %v4525_v21 = vpop.f32.mrb[16].mxu0 }
 0x37b   :  { %v1492_v23 = vadd.f32 %v4525_v21, %v3448_v5  ;;  %v1457_v24 = vpop.f32.mrb[17].mxu0  ;;  %v5961_v32 = vsel %vm1496_vm14, %v1490_v12, %v1502_v17  ;;  %v1606_v12 = vld [vmem:[%s7285_s7 + $0x2e8] sm:$0xff]  ;;  %v1517_v17 = vld [vmem:[%s7285_s7 + $0x20] sm:$0xff] }
 0x37c   :  { %v5953_v28 = vsel %vm1495_vm15, %v1489_v14, %v1501_v20  ;;  %v1491_v29 = vadd.f32 %v3448_v5, %v1457_v24  ;;  %v1525_v14 = vld [vmem:[%s7285_s7 + $0x60] sm:$0xff]  ;;  %v4970_v15 = vpack.c.bf16 %v1606_v12, %v1599_v11  ;;  %v1539_v20 = vld [vmem:[%s7285_s7 + $0xd0] sm:$0xff]  ;;  %v1538_v24 = vld [vmem:[%s7285_s7 + $0xc8] sm:$0xff]  ;;  %v2247_v11 = vand.u32 63, %v6162_v59 }
 0x37d   :  { %v1504_v33 = vmul.f32 0.01, %v1492_v23  ;;  %3449 = vmatmul.mubr.msk.f32.vlgmr.msra.gmra.mrb[10].mxu1 %vm1611_vm12, %v5953_v28  ;;  %4557 = vmatprep.mubr.msk.f32.mxu0 %vm1611_vm12, %v5953_v28  ;;  %vm1498_vm2 = vcmp.gt.f32.partialorder %v1492_v23, 0.0  ;;  %v4972_v16 = vpack.c.bf16 %v1525_v14, %v1518_v13  ;;  %v4976_v22 = vpack.c.bf16 %v1539_v20, %v1532_v19 }
 0x37e   :  { %vm1497_vm3 = vcmp.gt.f32.partialorder %v1491_v29, 0.0  ;;  %v1503_v34 = vmul.f32 0.01, %v1491_v29  ;;  %4947 = vmatpush1.bf16.msra.mxu1 %v4946_v18  ;;  %v4528_v35 = vpop.f32.mrb[18].mxu0  ;;  %4558 = vmatmul.mubr.msk.f32.vlgmr.msra.gmra.mrb[20].mxu0 %vm1611_vm12, %v5961_v32  ;;  %v1524_v18 = vld [vmem:[%s7285_s7 + $0x58] sm:$0xff]  ;;  %v2264_v12 = vand.u32 63, %v2152_v61  ;;  %vm6216_vm10 = vcmp.eq.s32.totalorder %v2247_v11, %v5915_v63 }
 0x37f   :  { %v1494_v38 = vadd.f32 %v4528_v35, %v3448_v5  ;;  %v1467_v39 = vpop.f32.mrb[19].mxu0  ;;  %1700 = vmatprep.mubr.f32.mxu1 %v5252_v53  ;;  %4949 = vmatprep.subr.bf16.mxu1 %v4948_v25  ;;  %v5999_v48 = vsel %vm1498_vm2, %v1492_v23, %v1504_v33  ;;  %v4974_v21 = vpack.c.bf16 %v1524_v18, %v1517_v17  ;;  %v1531_v23 = vld [vmem:[%s7285_s7 + $0x90] sm:$0xff]  ;;  %v1546_v25 = vld [vmem:[%s7285_s7 + $0x108] sm:$0xff]  ;;  %v1560_v33 = vld [vmem:[%s7285_s7 + $0x178] sm:$0xff]  ;;  %v2265_v13 = vand.u32 63, %v2153_v62 }
 0x380   :  { %v1493_v43 = vadd.f32 %v3448_v5, %v1467_v39  ;;  %v5980_v44 = vsel %vm1497_vm3, %v1491_v29, %v1503_v34  ;;  %5063 = vmatpush3.bf16.msk.msra.mxu0 %vm5062_vm1, %v5253_v2  ;;  %v1592_v5 = vld [vmem:[%s7285_s7 + $0x278] sm:$0xff]  ;;  %v4978_v27 = vpack.c.bf16 %v1538_v24, %v1531_v23  ;;  %v4980_v29 = vpack.c.bf16 %v1553_v26, %v1546_v25  ;;  %v1567_v34 = vld [vmem:[%s7285_s7 + $0x1b0] sm:$0xff]  ;;  %v1566_v39 = vld [vmem:[%s7285_s7 + $0x1a8] sm:$0xff] }
 0x381   :  { %v1506_v47 = vmul.f32 0.01, %v1494_v38  ;;  %3450 = vmatmul.mubr.msk.f32.gmra.mrb[12].mxu1 %vm1611_vm12, %v5961_v32  ;;  %4560 = vmatprep.mubr.msk.f32.mxu0 %vm1611_vm12, %v5980_v44  ;;  %vm1500_vm4 = vcmp.gt.f32.partialorder %v1494_v38, 0.0  ;;  %v4966_v9 = vpack.c.bf16 %v1592_v5, %v1585_v4  ;;  %v4982_v35 = vpack.c.bf16 %v1552_v31, %v1545_v30  ;;  %v1601_v5 = vld [vmem:[%s7285_s7 + $0x2c0] sm:$0xff] }
 0x382   :  { %vm1499_vm5 = vcmp.gt.f32.partialorder %v1493_v43, 0.0  ;;  %v1505_v6 = vmul.f32 0.01, %v1493_v43  ;;  %4951 = vmatpush1.bf16.msra.mxu1 %v4950_v36  ;;  %4561 = vmatmul.mubr.msk.f32.gmra.mrb[22].mxu0 %vm1611_vm12, %v5999_v48  ;;  %v4984_v36 = vpack.c.bf16 %v1567_v34, %v1560_v33  ;;  %v2155_v17 = vadd.s32 168, %v5911_v60 }
 0x383   :  { %1706 = vmatprep.mubr.f32.mxu1 %v5252_v53  ;;  %4953 = vmatprep.subr.bf16.mxu1 %v4952_v40  ;;  %v1579_v53 = vld [vmem:[%s7285_s7 + $0x210] sm:$0xff]  ;;  %v6023_v55 = vsel %vm1500_vm4, %v1494_v38, %v1506_v47  ;;  %v1574_v40 = vld [vmem:[%s7285_s7 + $0x1e8] sm:$0xff]  ;;  %v1588_v47 = vld [vmem:[%s7285_s7 + $0x258] sm:$0xff]  ;;  %v4998_v18 = vpack.c.bf16 %v1608_v7, %v1601_v5  ;;  %v2248_v19 = vand.u32 63, %v6176_v8  ;;  %v2156_v25 = vadd.s32 176, %v5911_v60 }
 0x384   :  { %v6010_v52 = vsel %vm1499_vm5, %v1493_v43, %v1505_v6  ;;  %v4960_v58 = vpack.c.bf16 %v1579_v53, %v1572_v54  ;;  %v1559_v38 = vld [vmem:[%s7285_s7 + $0x170] sm:$0xff]  ;;  %v4988_v43 = vpack.c.bf16 %v1581_v41, %v1574_v40  ;;  %v1594_v53 = vld [vmem:[%s7285_s7 + $0x288] sm:$0xff]  ;;  %v2157_v26 = vadd.s32 184, %v5911_v60 }
 0x385   :  { %3451 = vmatmul.mubr.msk.f32.gmra.mrb[14].mxu1 %vm1611_vm12, %v5980_v44  ;;  %4563 = vmatprep.mubr.msk.f32.mxu0 %vm1611_vm12, %v6010_v52  ;;  %v4986_v42 = vpack.c.bf16 %v1566_v39, %v1559_v38  ;;  %v1595_v6 = vld [vmem:[%s7285_s7 + $0x290] sm:$0xff]  ;;  %vm6223_vm11 = vcmp.eq.s32.totalorder %v2264_v12, %v5915_v63  ;;  %vm6228_vm13 = vcmp.eq.s32.totalorder %v2265_v13, %v5915_v63  ;;  %v2267_v31 = vand.u32 63, %v2155_v17 }
 0x386   :  { %4955 = vmatpush1.bf16.msra.mxu1 %v4954_v37  ;;  %4564 = vmatmul.mubr.msk.f32.gmra.mrb[24].mxu0 %vm1611_vm12, %v6023_v55  ;;  %v2150_v37 = vadd.s32 128, %v5911_v60  ;;  %v4992_v51 = vpack.c.bf16 %v1595_v6, %v1588_v47  ;;  %v1587_v54 = vld [vmem:[%s7285_s7 + $0x250] sm:$0xff]  ;;  %vm6238_vm15 = vcmp.eq.s32.totalorder %v2248_v19, %v5915_v63  ;;  %vm5032_vm1 = vmpackc.low %vm6228_vm13, %vm6223_vm11  ;;  %v2268_v38 = vand.u32 63, %v2156_v25 }
 0x387   :  { %1712 = vmatprep.mubr.f32.mxu1 %v6027_v57  ;;  %4957 = vmatprep.subr.bf16.mxu1 %v4956_v49  ;;  %v2151_v49 = vadd.s32 136, %v5911_v60  ;;  %v2269_v39 = vand.u32 63, %v2157_v26  ;;  %v2140_v40 = vadd.s32 48, %v5911_v60  ;;  %v2141_v41 = vadd.s32 56, %v5911_v60 }
 0x388   :  { %v2262_v0 = vand.u32 63, %v2150_v37  ;;  %vm6263_vm3 = vcmp.eq.s32.totalorder %v2267_v31, %v5915_v63  ;;  %v2143_v47 = vadd.s32 72, %v5911_v60  ;;  %v2160_v6 = vadd.s32 208, %v5911_v60 }
 0x389   :  { %3452 = vmatmul.mubr.msk.f32.gmra.mrb[16].mxu1 %vm1611_vm12, %v5999_v48  ;;  %v2161_v37 = vadd.s32 216, %v5911_v60  ;;  %v2271_v61 = vand.u32 63, %v2159_v46  ;;  %v2144_v5 = vadd.s32 80, %v5911_v60  ;;  %v2145_v7 = vadd.s32 88, %v5911_v60 }
 0x38a   :  { %4959 = vmatpush1.bf16.msra.mxu1 %v4958_v56  ;;  %1718 = vmatprep.mubr.f32.mxu1 %v6027_v57  ;;  %v1602_v56 = vld [vmem:[%s7285_s7 + $0x2c8] sm:$0xff]  ;;  %vm6186_vm6 = vcmp.eq.s32.totalorder %v2262_v0, %v5915_v63  ;;  %v2255_v62 = vand.u32 63, %v2143_v47  ;;  %v2272_v0 = vand.u32 63, %v2160_v6  ;;  %v2162_v12 = vadd.s32 224, %v5911_v60 }
 0x38b   :  { %4961 = vmatprep.subr.bf16.mxu1 %v4960_v58  ;;  %v1609_v58 = vld [vmem:[%s7285_s7 + $0x300] sm:$0xff]  ;;  %v2163_v13 = vadd.s32 232, %v5911_v60  ;;  %v2256_v17 = vand.u32 63, %v2144_v5  ;;  %v2146_v19 = vadd.s32 96, %v5911_v60  ;;  %v2164_v25 = vadd.s32 240, %v5911_v60 }
 0x38c   :  { %v4996_v4 = vpack.c.bf16 %v1609_v58, %v1602_v56  ;;  %v2270_v58 = vand.u32 63, %v2158_v45  ;;  %v2274_v23 = vand.u32 63, %v2162_v12  ;;  %v2165_v26 = vadd.s32 248, %v5911_v60 }
 0x38d   :  { %3453 = vmatmul.mubr.msk.f32.gmra.mrb[18].mxu1 %vm1611_vm12, %v6010_v52  ;;  %v2275_v24 = vand.u32 63, %v2163_v13  ;;  %v2276_v33 = vand.u32 63, %v2164_v25  ;;  %v2169_v45 = vadd.s32 280, %v5911_v60  ;;  %v2174_v11 = vadd.s32 320, %v5911_v60 }
 0x38e   :  { %4963 = vmatpush1.bf16.msra.mxu1 %v4962_v1  ;;  %1724 = vmatprep.mubr.f32.mxu1 %v6027_v57  ;;  %v2263_v1 = vand.u32 63, %v2151_v49  ;;  %v2277_v34 = vand.u32 63, %v2165_v26  ;;  %v2187_v49 = vadd.s32 424, %v5911_v60  ;;  %v2194_v25 = vadd.s32 480, %v5911_v60 }
 0x38f   :  { %4965 = vmatprep.subr.bf16.mxu1 %v4964_v3  ;;  %v4994_v3 = vpack.c.bf16 %v1594_v53, %v1587_v54  ;;  %v2253_v54 = vand.u32 63, %v2141_v41  ;;  %v2281_v6 = vand.u32 63, %v2169_v45  ;;  %v2286_v14 = vand.u32 63, %v2174_v11 }
 0x390   :  { %vm6191_vm7 = vcmp.eq.s32.totalorder %v2263_v1, %v5915_v63  ;;  %v2273_v1 = vand.u32 63, %v2161_v37  ;;  %v2186_v37 = vadd.s32 416, %v5911_v60  ;;  %v2299_v53 = vand.u32 63, %v2187_v49 }
 0x391   :  { %3454 = vmatmul.mubr.msk.f32.gmra.mrb[20].mxu1 %vm1611_vm12, %v6023_v55  ;;  %vm5028_vm8 = vmpackc.low %vm6191_vm7, %vm6186_vm6  ;;  %v6594_v11 = vshra.s32 %v5915_v63, 6  ;;  %v2240_v49 = vadd.s32 848, %v5911_v60 }
 0x392   :  { %4967 = vmatpush1.bf16.msra.mxu1 %v4966_v9  ;;  %1795 = vmatprep.mubr.f32.mxu1 %v6027_v57  ;;  %v6179_v9 = vadd.s32 24, %v5911_v60 }
 0x393   :  { %4969 = vmatprep.subr.bf16.mxu1 %v4968_v10  ;;  %v2246_v10 = vand.u32 63, %v5911_v60 }
 0x394   :  { %v2249_v20 = vand.u32 63, %v6179_v9 }
 0x395   :  { %vm6211_vm9 = vcmp.eq.s32.totalorder %v2246_v10, %v5915_v63  ;;  %v2191_v10 = vadd.s32 456, %v5911_v60 }
 0x396   :  { %4971 = vmatpush1.bf16.msra.mxu1 %v4970_v15  ;;  %vm5030_vm14 = vmpackc.low %vm6216_vm10, %vm6211_vm9  ;;  %vm6243_vm0 = vcmp.eq.s32.totalorder %v2249_v20, %v5915_v63  ;;  %vm6307_vm9 = vcmp.eq.s32.totalorder %v2269_v39, %v5915_v63  ;;  %v2147_v20 = vadd.s32 104, %v5911_v60  ;;  %v2184_v39 = vadd.s32 400, %v5911_v60 }
 0x397   :  { %4973 = vmatprep.subr.bf16.mxu1 %v4972_v16  ;;  %v2154_v16 = vadd.s32 160, %v5911_v60  ;;  %vm5034_vm4 = vmpackc.low %vm6243_vm0, %vm6238_vm15  ;;  %vm6342_vm15 = vcmp.eq.s32.totalorder %v2270_v58, %v5915_v63  ;;  %vm6347_vm0 = vcmp.eq.s32.totalorder %v2271_v61, %v5915_v63  ;;  %v2188_v61 = vadd.s32 432, %v5911_v60 }
 0x398   :  { %v2296_v46 = vand.u32 63, %v2184_v39  ;;  %v2303_v13 = vand.u32 63, %v2191_v10  ;;  %v2192_v15 = vadd.s32 464, %v5911_v60  ;;  %v6589_v10 = vand.u32 31, %v6162_v59 }
 0x399   :  { %3455 = vmatmul.mubr.msk.f32.vlgmr.msra.gmra.mrb[22].mxu1 %vm1611_vm12, %v5953_v28  ;;  %v2266_v30 = vand.u32 63, %v2154_v16  ;;  %v2193_v16 = vadd.s32 472, %v5911_v60 }
 0x39a   :  { %4975 = vmatpush1.bf16.msra.mxu1 %v4974_v21  ;;  %1801 = vmatprep.mubr.f32.mxu1 %v6027_v57  ;;  %v6201_v21 = vadd.s32 32, %v5911_v60 }
 0x39b   :  { %4977 = vmatprep.subr.bf16.mxu1 %v4976_v22  ;;  %v6204_v22 = vadd.s32 40, %v5911_v60  ;;  %vm6258_vm2 = vcmp.eq.s32.totalorder %v2266_v30, %v5915_v63  ;;  %v2259_v30 = vand.u32 63, %v2147_v20  ;;  %v2176_v20 = vadd.s32 336, %v5911_v60 }
 0x39c   :  { %vm5036_vm5 = vmpackc.low %vm6263_vm3, %vm6258_vm2  ;;  %vm6371_vm3 = vcmp.eq.s32.totalorder %v2255_v62, %v5915_v63  ;;  %v2172_v62 = vadd.s32 304, %v5911_v60 }
 0x39d   :  { %3456 = vmatmul.mubr.msk.f32.gmra.mrb[24].mxu1 %vm1611_vm12, %v5961_v32 }
 0x39e   :  { %4979 = vmatpush1.bf16.msra.mxu1 %v4978_v27  ;;  %1807 = vmatprep.mubr.f32.mxu1 %v6027_v57  ;;  %v2178_v27 = vadd.s32 352, %v5911_v60 }
 0x39f   :  { %4981 = vmatprep.subr.bf16.mxu1 %v4980_v29  ;;  %v2258_v29 = vand.u32 63, %v2146_v19  ;;  %v2305_v19 = vand.u32 63, %v2193_v16 }
 0x3a1   :  { %3457 = vmatmul.mubr.msk.f32.gmra.mrb[26].mxu1 %vm1611_vm12, %v5980_v44 }
 0x3a2   :  { %4983 = vmatpush1.bf16.msra.mxu1 %v4982_v35  ;;  %1813 = vmatprep.mubr.f32.mxu1 %v6027_v57  ;;  %v2250_v35 = vand.u32 63, %v6201_v21 }
 0x3a3   :  { %4985 = vmatprep.subr.bf16.mxu1 %v4984_v36  ;;  %v2251_v36 = vand.u32 63, %v6204_v22 }
 0x3a4   :  { %vm6290_vm6 = vcmp.eq.s32.totalorder %v2250_v35, %v5915_v63  ;;  %v2180_v35 = vadd.s32 368, %v5911_v60 }
 0x3a5   :  { %3458 = vmatmul.mubr.msk.f32.gmra.mrb[28].mxu1 %vm1611_vm12, %v5999_v48  ;;  %vm6295_vm7 = vcmp.eq.s32.totalorder %v2251_v36, %v5915_v63 }
 0x3a6   :  { %4987 = vmatpush1.bf16.msra.mxu1 %v4986_v42  ;;  %1819 = vmatprep.mubr.f32.mxu1 %v6027_v57  ;;  %vm5038_vm10 = vmpackc.low %vm6295_vm7, %vm6290_vm6  ;;  %v2292_v39 = vand.u32 63, %v2180_v35 }
 0x3a7   :  { %4989 = vmatprep.subr.bf16.mxu1 %v4988_v43  ;;  %vm5044_vm6 = vmpackc.low %vm6347_vm0, %vm6342_vm15  ;;  %vm6439_vm0 = vcmp.eq.s32.totalorder %v2258_v29, %v5915_v63  ;;  %v2168_v43 = vadd.s32 272, %v5911_v60  ;;  %v2306_v29 = vand.u32 63, %v2194_v25 }
 0x3a9   :  { %3459 = vmatmul.mubr.msk.f32.gmra.mrb[30].mxu1 %vm1611_vm12, %v6010_v52  ;;  %v2280_v47 = vand.u32 63, %v2168_v43 }
 0x3aa   :  { %4991 = vmatpush1.bf16.msra.mxu1 %v4990_v50  ;;  %1825 = vmatprep.mubr.f32.mxu1 %v6027_v57  ;;  %v2170_v50 = vadd.s32 288, %v5911_v60 }
 0x3ab   :  { %4993 = vmatprep.subr.bf16.mxu1 %v4992_v51  ;;  %v2252_v51 = vand.u32 63, %v2140_v40  ;;  %v2185_v40 = vadd.s32 408, %v5911_v60 }
 0x3ac   :  { %v2282_v56 = vand.u32 63, %v2170_v50  ;;  %v2037_v50 = vadd.s32 128, %v5915_v63 }
 0x3ad   :  { %3460 = vmatmul.mubr.msk.f32.gmra.mrb[32].mxu1 %vm1611_vm12, %v6023_v55  ;;  %vm6328_vm13 = vcmp.eq.s32.totalorder %v2252_v51, %v5915_v63  ;;  %v2171_v51 = vadd.s32 296, %v5911_v60 }
 0x3ae   :  { %4995 = vmatpush1.bf16.msra.mxu1 %v4994_v3  ;;  %1896 = vmatprep.mubr.f32.mxu1 %v6027_v57 }
 0x3af   :  { %4997 = vmatprep.subr.bf16.mxu1 %v4996_v4  ;;  %v2283_v58 = vand.u32 63, %v2171_v51  ;;  %v2284_v4 = vand.u32 63, %v2172_v62  ;;  %v2198_v51 = vadd.s32 512, %v5911_v60  ;;  %v2201_v62 = vadd.s32 536, %v5911_v60 }
 0x3b2   :  { %4999 = vmatpush1.bf16.msra.mxu1 %v4998_v18  ;;  %v2257_v18 = vand.u32 63, %v2145_v7  ;;  %v2190_v7 = vadd.s32 448, %v5911_v60 }
 0x3b3   :  { %5029 = vmatprep.subr.msk.bf16.mxu1 %vm5028_vm8, %v5253_v2  ;;  %vm6302_vm8 = vcmp.eq.s32.totalorder %v2268_v38, %v5915_v63  ;;  %v2149_v38 = vadd.s32 120, %v5911_v60 }
 0x3b4   :  { %vm5040_vm11 = vmpackc.low %vm6307_vm9, %vm6302_vm8  ;;  %vm6412_vm9 = vcmp.eq.s32.totalorder %v2256_v17, %v5915_v63  ;;  %v2302_v12 = vand.u32 63, %v2190_v7 }
 0x3b5   :  { %3461 = vmatmul.mubr.msk.f32.vlgmr.msra.gmra.mrb[34].mxu1 %vm1611_vm12, %v5953_v28  ;;  %v2142_v28 = vadd.s32 64, %v5911_v60  ;;  %v2261_v42 = vand.u32 63, %v2149_v38  ;;  %v2181_v38 = vadd.s32 376, %v5911_v60 }
 0x3b6   :  { %1902 = vmatprep.mubr.f32.mxu1 %v6027_v57  ;;  %5031 = vmatpush3.bf16.msk.msra.mxu1 %vm5030_vm14, %v5253_v2  ;;  %vm6333_vm14 = vcmp.eq.s32.totalorder %v2253_v54, %v5915_v63  ;;  %v2298_v54 = vand.u32 63, %v2186_v37 }
 0x3b7   :  { %5033 = vmatprep.subr.msk.bf16.mxu1 %vm5032_vm1, %v5253_v2  ;;  %vm5042_vm1 = vmpackc.low %vm6333_vm14, %vm6328_vm13  ;;  %vm2387_vm13 = vcmp.eq.s32.totalorder %v2275_v24, %v5915_v63  ;;  %v2288_v24 = vand.u32 63, %v2176_v20  ;;  %v2220_v20 = vadd.s32 688, %v5911_v60 }
 0x3b9   :  { %3462 = vmatmul.mubr.msk.f32.gmra.mrb[36].mxu1 %vm1611_vm12, %v5961_v32  ;;  %v2254_v32 = vand.u32 63, %v2142_v28  ;;  %v2297_v28 = vand.u32 63, %v2185_v40  ;;  %v2214_v40 = vadd.s32 640, %v5911_v60  ;;  %v2332_v35 = vand.u32 63, %v2220_v20 }
 0x3ba   :  { %1908 = vmatprep.mubr.f32.mxu1 %v6027_v57  ;;  %5035 = vmatpush3.bf16.msk.msra.mxu1 %vm5034_vm4, %v5253_v2  ;;  %vm6376_vm4 = vcmp.eq.s32.totalorder %v2272_v0, %v5915_v63  ;;  %v2173_v0 = vadd.s32 312, %v5911_v60 }
 0x3bb   :  { %5037 = vmatprep.subr.msk.bf16.mxu1 %vm5036_vm5, %v5253_v2  ;;  %vm6366_vm2 = vcmp.eq.s32.totalorder %v2254_v32, %v5915_v63  ;;  %vm6381_vm5 = vcmp.eq.s32.totalorder %v2273_v1, %v5915_v63  ;;  %v2189_v32 = vadd.s32 440, %v5911_v60  ;;  %v2300_v1 = vand.u32 63, %v2188_v61 }
 0x3bc   :  { %vm5046_vm7 = vmpackc.low %vm6371_vm3, %vm6366_vm2  ;;  %vm6451_vm2 = vcmp.eq.s32.totalorder %v2276_v33, %v5915_v63  ;;  %vm6456_vm3 = vcmp.eq.s32.totalorder %v2277_v34, %v5915_v63  ;;  %v2285_v5 = vand.u32 63, %v2173_v0  ;;  %v2290_v33 = vand.u32 63, %v2178_v27 }
 0x3bd   :  { %3463 = vmatmul.mubr.msk.f32.gmra.mrb[38].mxu1 %vm1611_vm12, %v5980_v44  ;;  %vm5048_vm8 = vmpackc.low %vm6381_vm5, %vm6376_vm4  ;;  %v2301_v3 = vand.u32 63, %v2189_v32  ;;  %v2175_v44 = vadd.s32 328, %v5911_v60  ;;  %v2326_v43 = vand.u32 63, %v2214_v40  ;;  %v6582_v61 = vshra.s32 %v2037_v50, 6 }
 0x3be   :  { %1914 = vmatprep.mubr.f32.mxu1 %v6027_v57  ;;  %5039 = vmatpush3.bf16.msk.msra.mxu1 %vm5038_vm10, %v5253_v2  ;;  %vm6417_vm10 = vcmp.eq.s32.totalorder %v2257_v18, %v5915_v63  ;;  %v2304_v18 = vand.u32 63, %v2192_v15  ;;  %v2200_v32 = vadd.s32 528, %v5911_v60  ;;  %v2310_v0 = vand.u32 63, %v2198_v51 }
 0x3bf   :  { %5041 = vmatprep.subr.msk.bf16.mxu1 %vm5040_vm11, %v5253_v2  ;;  %vm6424_vm11 = vcmp.eq.s32.totalorder %v2274_v23, %v5915_v63  ;;  %vm5050_vm14 = vmpackc.low %vm6417_vm10, %vm6412_vm9  ;;  %vm2409_vm9 = vcmp.eq.s32.totalorder %v2297_v28, %v5915_v63  ;;  %v2287_v17 = vand.u32 63, %v2175_v44  ;;  %v2177_v23 = vadd.s32 344, %v5911_v60 }
 0x3c0   :  { %vm5052_vm15 = vmpackc.low %vm2387_vm13, %vm6424_vm11  ;;  %vm2392_vm11 = vcmp.eq.s32.totalorder %v2280_v47, %v5915_v63  ;;  %vm2393_vm13 = vcmp.eq.s32.totalorder %v2281_v6, %v5915_v63  ;;  %v2231_v28 = vadd.s32 776, %v5911_v60  ;;  %v2202_v44 = vadd.s32 544, %v5911_v60 }
 0x3c1   :  { %3464 = vmatmul.mubr.msk.f32.gmra.mrb[40].mxu1 %vm1611_vm12, %v5999_v48  ;;  %v2289_v26 = vand.u32 63, %v2177_v23  ;;  %v2195_v48 = vadd.s32 488, %v5911_v60  ;;  %v2221_v23 = vadd.s32 696, %v5911_v60  ;;  %v2224_v50 = vadd.s32 720, %v5911_v60 }
 0x3c2   :  { %1920 = vmatprep.mubr.f32.mxu1 %v6027_v57  ;;  %5043 = vmatpush3.bf16.msk.msra.mxu1 %vm5042_vm1, %v5253_v2  ;;  %vm6444_vm1 = vcmp.eq.s32.totalorder %v2259_v30, %v5915_v63  ;;  %v2179_v30 = vadd.s32 360, %v5911_v60  ;;  %v2343_v6 = vand.u32 63, %v2231_v28  ;;  %v2225_v51 = vadd.s32 728, %v5911_v60 }
 0x3c3   :  { %5045 = vmatprep.subr.msk.bf16.mxu1 %vm5044_vm6, %v5253_v2  ;;  %vm5054_vm4 = vmpackc.low %vm6444_vm1, %vm6439_vm0  ;;  %vm2373_vm6 = vcmp.eq.s32.totalorder %v2261_v42, %v5915_v63  ;;  %vm2411_vm0 = vcmp.eq.s32.totalorder %v2299_v53, %v5915_v63  ;;  %vm2394_vm1 = vcmp.eq.s32.totalorder %v2282_v56, %v5915_v63  ;;  %v2307_v31 = vand.u32 63, %v2195_v48 }
 0x3c4   :  { %v2291_v34 = vand.u32 63, %v2179_v30  ;;  %v2293_v42 = vand.u32 63, %v2181_v38  ;;  %v2216_v53 = vadd.s32 656, %v5911_v60  ;;  %v2217_v56 = vadd.s32 664, %v5911_v60 }
 0x3c5   :  { %3465 = vmatmul.mubr.msk.f32.gmra.mrb[42].mxu1 %vm1611_vm12, %v6010_v52  ;;  %v2196_v52 = vadd.s32 496, %v5911_v60  ;;  %v2223_v38 = vadd.s32 712, %v5911_v60  ;;  %v2337_v15 = vand.u32 63, %v2225_v51  ;;  %v2243_v51 = vadd.s32 872, %v5911_v60 }
 0x3c6   :  { %1926 = vmatprep.mubr.f32.mxu1 %v6027_v57  ;;  %5047 = vmatpush3.bf16.msk.msra.mxu1 %vm5046_vm7, %v5253_v2  ;;  %v2197_v57 = vadd.s32 504, %v5911_v60  ;;  %v2329_v7 = vand.u32 63, %v2217_v56 }
 0x3c7   :  { %5049 = vmatprep.subr.msk.bf16.mxu1 %vm5048_vm8, %v5253_v2  ;;  %vm2408_vm8 = vcmp.eq.s32.totalorder %v2296_v46, %v5915_v63  ;;  %v2308_v36 = vand.u32 63, %v2196_v52  ;;  %v2230_v46 = vadd.s32 768, %v5911_v60  ;;  %v2204_v52 = vadd.s32 560, %v5911_v60 }
 0x3c8   :  { %vm5064_vm10 = vmpackc.low %vm2409_vm9, %vm2408_vm8  ;;  %vm2397_vm8 = vcmp.eq.s32.totalorder %v2285_v5, %v5915_v63  ;;  %v2328_v5 = vand.u32 63, %v2216_v53 }
 0x3c9   :  { %3466 = vmatmul.mubr.msk.f32.gmra.mrb[44].mxu1 %vm1611_vm12, %v6023_v55  ;;  %v2148_v55 = vadd.s32 112, %v5911_v60  ;;  %vm5056_vm12 = vmpackc.low %vm6456_vm3, %vm6451_vm2  ;;  %5065 = vmatprep.subr.msk.bf16.mxu0 %vm5064_vm10, %v5253_v2  ;;  %vm2395_vm2 = vcmp.eq.s32.totalorder %v2283_v58, %v5915_v63  ;;  %vm2414_vm10 = vcmp.eq.s32.totalorder %v2302_v12, %v5915_v63  ;;  %v2342_v47 = vand.u32 63, %v2230_v46 }
 0x3ca   :  { %5051 = vmatpush3.bf16.msk.msra.mxu1 %vm5050_vm14, %v5253_v2  ;;  %vm5066_vm14 = vmpackc.low %vm2393_vm13, %vm2392_vm11  ;;  %vm2415_vm11 = vcmp.eq.s32.totalorder %v2303_v13, %v5915_v63  ;;  %vm2398_vm13 = vcmp.eq.s32.totalorder %v2286_v14, %v5915_v63  ;;  %v6580_v58 = vand.u32 31, %v5911_v60  ;;  %v2312_v12 = vand.u32 63, %v2200_v32 }
 0x3cb   :  { %5053 = vmatprep.subr.msk.bf16.mxu1 %vm5052_vm15, %v5253_v2  ;;  %v2260_v41 = vand.u32 63, %v2148_v55  ;;  %5067 = vmatpush3.bf16.msk.msra.mxu0 %vm5066_vm14, %v5253_v2  ;;  %vm2410_vm15 = vcmp.eq.s32.totalorder %v2298_v54, %v5915_v63  ;;  %vm5076_vm14 = vmpackc.low %vm2415_vm11, %vm2414_vm10  ;;  %vm2403_vm10 = vcmp.eq.s32.totalorder %v2291_v34, %v5915_v63  ;;  %v2309_v55 = vand.u32 63, %v2197_v57 }
 0x3cc   :  { %vm5068_vm3 = vmpackc.low %vm2411_vm0, %vm2410_vm15  ;;  %vm2399_vm15 = vcmp.eq.s32.totalorder %v2287_v17, %v5915_v63  ;;  %v2199_v54 = vadd.s32 520, %v5911_v60  ;;  %v2313_v13 = vand.u32 63, %v2201_v62  ;;  %v2203_v14 = vadd.s32 552, %v5911_v60 }
 0x3cd   :  { %vm2372_vm5 = vcmp.eq.s32.totalorder %v2260_v41, %v5915_v63  ;;  %5069 = vmatprep.subr.msk.bf16.mxu0 %vm5068_vm3, %v5253_v2  ;;  %vm5078_vm0 = vmpackc.low %vm2399_vm15, %vm2398_vm13  ;;  %v2215_v41 = vadd.s32 648, %v5911_v60  ;;  %vm2420_vm13 = vcmp.eq.s32.totalorder %v2308_v36, %v5915_v63  ;;  %v2205_v57 = vadd.s32 568, %v5911_v60 }
 0x3ce   :  { %5055 = vmatpush3.bf16.msk.msra.mxu1 %vm5054_vm4, %v5253_v2  ;;  %vm5058_vm7 = vmpackc.low %vm2373_vm6, %vm2372_vm5  ;;  %vm2413_vm5 = vcmp.eq.s32.totalorder %v2301_v3, %v5915_v63  ;;  %vm2396_vm6 = vcmp.eq.s32.totalorder %v2284_v4, %v5915_v63  ;;  %v2218_v3 = vadd.s32 672, %v5911_v60  ;;  %v2219_v4 = vadd.s32 680, %v5911_v60 }
 0x3cf   :  { %5057 = vmatprep.subr.msk.bf16.mxu1 %vm5056_vm12, %v5253_v2  ;;  %vm5070_vm4 = vmpackc.low %vm2395_vm2, %vm2394_vm1  ;;  %vm2412_vm12 = vcmp.eq.s32.totalorder %v2300_v1, %v5915_v63  ;;  %vm2416_vm1 = vcmp.eq.s32.totalorder %v2304_v18, %v5915_v63  ;;  %vm2417_vm2 = vcmp.eq.s32.totalorder %v2305_v19, %v5915_v63  ;;  %v2327_v45 = vand.u32 63, %v2215_v41 }
 0x3d0   :  { %5071 = vmatpush3.bf16.msk.msra.mxu0 %vm5070_vm4, %v5253_v2  ;;  %vm5074_vm9 = vmpackc.low %vm2397_vm8, %vm2396_vm6  ;;  %vm2400_vm4 = vcmp.eq.s32.totalorder %v2288_v24, %v5915_v63  ;;  %vm2418_vm6 = vcmp.eq.s32.totalorder %v2306_v29, %v5915_v63  ;;  %vm2402_vm8 = vcmp.eq.s32.totalorder %v2290_v33, %v5915_v63  ;;  %v2311_v1 = vand.u32 63, %v2199_v54 }
 0x3d1   :  { %vm5080_vm3 = vmpackc.low %vm2417_vm2, %vm2416_vm1  ;;  %vm2405_vm1 = vcmp.eq.s32.totalorder %v2293_v42, %v5915_v63  ;;  %vm2438_vm2 = vcmp.eq.s32.totalorder %v2326_v43, %v5915_v63  ;;  %v2330_v16 = vand.u32 63, %v2218_v3  ;;  %v2331_v17 = vand.u32 63, %v2219_v4 }
 0x3d2   :  { %5059 = vmatpush3.bf16.msk.msra.mxu1 %vm5058_vm7, %v5253_v2  ;;  %vm5072_vm7 = vmpackc.low %vm2413_vm5, %vm2412_vm12  ;;  %vm2401_vm12 = vcmp.eq.s32.totalorder %v2289_v26, %v5915_v63  ;;  %v6621_v24 = vand.u32 31, %v6176_v8  ;;  %v2314_v29 = vand.u32 63, %v2202_v44  ;;  %v2315_v30 = vand.u32 63, %v2203_v14 }
 0x3d3   :  { %5073 = vmatprep.subr.msk.bf16.mxu0 %vm5072_vm7, %v5253_v2  ;;  %vm5082_vm5 = vmpackc.low %vm2401_vm12, %vm2400_vm4  ;;  %vm2419_vm7 = vcmp.eq.s32.totalorder %v2307_v31, %v5915_v63  ;;  %v2333_v36 = vand.u32 63, %v2221_v23  ;;  %v2207_v46 = vadd.s32 584, %v5911_v60  ;;  %v2335_v32 = vand.u32 63, %v2223_v38 }
 0x3d4   :  { %5075 = vmatpush3.bf16.msk.msra.mxu0 %vm5074_vm9, %v5253_v2  ;;  %vm5084_vm9 = vmpackc.low %vm2419_vm7, %vm2418_vm6  ;;  %vm6560_vm6 = vcmp.eq.s32.totalorder %v2343_v6, %v5915_v63  ;;  %v2317_v6 = vand.u32 63, %v2205_v57  ;;  %v6731_v62 = vand.u32 31, %v6201_v21  ;;  %v2336_v14 = vand.u32 63, %v2224_v50 }
 0x3d5   :  { %5077 = vmatprep.subr.msk.bf16.mxu0 %vm5076_vm14, %v5253_v2  ;;  %vm5086_vm11 = vmpackc.low %vm2403_vm10, %vm2402_vm8  ;;  %vm2421_vm14 = vcmp.eq.s32.totalorder %v2309_v55, %v5915_v63  ;;  %vm2057_vm8 = vcmp.eq.s32.totalorder %v6580_v58, %v6582_v61  ;;  %vm6604_vm10 = vcmp.eq.s32.totalorder %v2311_v1, %v5915_v63  ;;  %v2222_v55 = vadd.s32 704, %v5911_v60 }
 0x3d6   :  { %vm5088_vm15 = vmpackc.low %vm2421_vm14, %vm2420_vm13  ;;  %vm6614_vm13 = vcmp.eq.s32.totalorder %v2329_v7, %v5915_v63  ;;  %vm2056_vm14 = vcmp.eq.s32.totalorder %v6580_v58, %v6594_v11  ;;  %v2319_v4 = vand.u32 63, %v2207_v46  ;;  %v2209_v7 = vadd.s32 600, %v5911_v60 }
 0x3d7   :  { %v2334_v56 = vand.u32 63, %v2222_v55  ;;  %v2227_v18 = vadd.s32 744, %v5911_v60  ;;  %v6792_v19 = vand.u32 31, %v6204_v22  ;;  %v2211_v33 = vadd.s32 616, %v5911_v60 }
 0x3d8   :  { %5079 = vmatpush3.bf16.msk.msra.mxu0 %vm5078_vm0, %v5253_v2  ;;  %vm2404_vm0 = vcmp.eq.s32.totalorder %v2292_v39, %v5915_v63  ;;  %v6670_v39 = vand.u32 31, %v6179_v9  ;;  %v2321_v27 = vand.u32 63, %v2209_v7  ;;  %v2228_v57 = vadd.s32 752, %v5911_v60 }
 0x3d9   :  { %5081 = vmatprep.subr.msk.bf16.mxu0 %vm5080_vm3, %v5253_v2  ;;  %vm2439_vm3 = vcmp.eq.s32.totalorder %v2327_v45, %v5915_v63  ;;  %vm5090_vm4 = vmpackc.low %vm2405_vm1, %vm2404_vm0  ;;  %vm6634_vm1 = vcmp.eq.s32.totalorder %v2312_v12, %v5915_v63  ;;  %v2206_v45 = vadd.s32 576, %v5911_v60  ;;  %v2039_v55 = vadd.s32 384, %v5915_v63 }
 0x3da   :  { %vm5092_vm12 = vmpackc.low %vm2439_vm3, %vm2438_vm2  ;;  %vm6639_vm2 = vcmp.eq.s32.totalorder %v2313_v13, %v5915_v63  ;;  %v2323_v46 = vand.u32 63, %v2211_v33  ;;  %v2340_v54 = vand.u32 63, %v2228_v57  ;;  %v2235_v44 = vadd.s32 808, %v5911_v60 }
 0x3db   :  { %5093 = vmatprep.subr.msk.bf16.mxu1 %vm5092_vm12, %v5253_v2  ;;  %vm6658_vm12 = vcmp.eq.s32.totalorder %v2331_v17, %v5915_v63  ;;  %v2318_v21 = vand.u32 63, %v2206_v45  ;;  %v2226_v17 = vadd.s32 736, %v5911_v60  ;;  %v2239_v57 = vadd.s32 840, %v5911_v60 }
 0x3dc   :  { %5083 = vmatpush3.bf16.msk.msra.mxu0 %vm5082_vm5, %v5253_v2  ;;  %vm6555_vm5 = vcmp.eq.s32.totalorder %v2342_v47, %v5915_v63  ;;  %v2316_v47 = vand.u32 63, %v2204_v52  ;;  %v2339_v52 = vand.u32 63, %v2227_v18  ;;  %v2040_v18 = vadd.s32 512, %v5915_v63 }
 0x3dd   :  { %5085 = vmatprep.subr.msk.bf16.mxu0 %vm5084_vm9, %v5253_v2  ;;  %vm7292_vm7 = vmpackc.low %vm6560_vm6, %vm6555_vm5  ;;  %vm6599_vm9 = vcmp.eq.s32.totalorder %v2310_v0, %v5915_v63  ;;  %v2338_v34 = vand.u32 63, %v2226_v17  ;;  %v2236_v17 = vadd.s32 816, %v5911_v60 }
 0x3de   :  { %vm5094_vm0 = vmpackc.low %vm6604_vm10, %vm6599_vm9  ;;  %vm6700_vm9 = vcmp.eq.s32.totalorder %v2315_v30, %v5915_v63  ;;  %v2210_v30 = vadd.s32 608, %v5911_v60 }
 0x3e0   :  { %5087 = vmatpush3.bf16.msk.msra.mxu0 %vm5086_vm11, %v5253_v2  ;;  %vm6609_vm11 = vcmp.eq.s32.totalorder %v2328_v5, %v5915_v63  ;;  %v2208_v5 = vadd.s32 592, %v5911_v60  ;;  %v2322_v45 = vand.u32 63, %v2210_v30  ;;  %v2348_v30 = vand.u32 63, %v2236_v17 }
 0x3e1   :  { %5089 = vmatprep.subr.msk.bf16.mxu0 %vm5088_vm15, %v5253_v2  ;;  %vm2064_vm15 = vcmp.eq.s32.totalorder %v6589_v10, %v6582_v61  ;;  %vm5096_vm3 = vmpackc.low %vm6614_vm13, %vm6609_vm11  ;;  %vm6721_vm11 = vcmp.eq.s32.totalorder %v2332_v35, %v5915_v63  ;;  %vm6726_vm13 = vcmp.eq.s32.totalorder %v2333_v36, %v5915_v63  ;;  %v2229_v35 = vadd.s32 760, %v5911_v60 }
 0x3e3   :  { %v2341_v53 = vand.u32 63, %v2229_v35 }
 0x3e4   :  { %5091 = vmatpush3.bf16.msk.msra.mxu0 %vm5090_vm4, %v5253_v2  ;;  %vm6653_vm4 = vcmp.eq.s32.totalorder %v2330_v16, %v5915_v63 }
 0x3e5   :  { %5125 = vmatprep.subr.msk.bf16.mxu0 %vm7292_vm7, %v5253_v2  ;;  %vm6695_vm7 = vcmp.eq.s32.totalorder %v2314_v29, %v5915_v63  ;;  %vm5100_vm10 = vmpackc.low %vm6658_vm12, %vm6653_vm4  ;;  %vm6767_vm4 = vcmp.eq.s32.totalorder %v2316_v47, %v5915_v63  ;;  %vm6772_vm12 = vcmp.eq.s32.totalorder %v2317_v6, %v5915_v63  ;;  %v2212_v47 = vadd.s32 624, %v5911_v60 }
 0x3e6   :  { %v2213_v6 = vadd.s32 632, %v5911_v60 }
 0x3e7   :  { %v2324_v7 = vand.u32 63, %v2212_v47 }
 0x3e8   :  { %v2325_v13 = vand.u32 63, %v2213_v6 }
 0x450   :  { %v1696_v25 = vpop.f32.mrb[10].mxu1 }
 0x451   :  { %v1698_v26 = vpop.f32.mrb[11].mxu1  ;;  %v6627_v48 = vpop.f32.mrb[20].mxu0 }
 0x452   :  { %v6643_v31 = vpop.f32.mrb[21].mxu0  ;;  %3617 = vmatprep.mubr.msk.f32.mxu1 %vm2057_vm8, %v1698_v26  ;;  %vm2063_vm8 = vcmp.eq.s32.totalorder %v6589_v10, %v6594_v11  ;;  %v2320_v26 = vand.u32 63, %v2208_v5  ;;  %v2245_v5 = vadd.s32 888, %v5911_v60 }
 0x453   :  { %3618 = vmatmul.mubr.msk.f32.vlgmr.msra.gmra.mrb[46].mxu1 %vm2056_vm14, %v1696_v25  ;;  %vm5098_vm14 = vmpackc.low %vm6639_vm2, %vm6634_vm1  ;;  %vm7383_vm1 = vcmp.eq.s32.totalorder %v6621_v24, %v6582_v61  ;;  %v2347_v25 = vand.u32 63, %v2235_v44 }
 0x454   :  { %v1702_v40 = vpop.f32.mrb[12].mxu1  ;;  %5095 = vmatpush3.bf16.msk.msra.mxu1 %vm5094_vm0, %v5253_v2  ;;  %vm2078_vm0 = vcmp.eq.s32.totalorder %v6670_v39, %v6582_v61  ;;  %vm5104_vm2 = vmpackc.low %vm6726_vm13, %vm6721_vm11  ;;  %vm6832_vm11 = vcmp.eq.s32.totalorder %v2336_v14, %v5915_v63  ;;  %vm6837_vm13 = vcmp.eq.s32.totalorder %v2337_v15, %v5915_v63  ;;  %v2041_v15 = vadd.s32 640, %v5915_v63 }
 0x455   :  { %v1704_v41 = vpop.f32.mrb[13].mxu1  ;;  %v6682_v42 = vpop.f32.mrb[22].mxu0  ;;  %5097 = vmatprep.subr.msk.bf16.mxu1 %vm5096_vm3, %v5253_v2  ;;  %vm5102_vm3 = vmpackc.low %vm6700_vm9, %vm6695_vm7  ;;  %vm6820_vm7 = vcmp.eq.s32.totalorder %v2319_v4, %v5915_v63  ;;  %v2234_v4 = vadd.s32 800, %v5911_v60 }
 0x456   :  { %v6706_v28 = vpop.f32.mrb[23].mxu0  ;;  %3619 = vmatprep.mubr.msk.f32.mxu1 %vm2064_vm15, %v1704_v41  ;;  %vm2070_vm15 = vcmp.eq.s32.totalorder %v6621_v24, %v6594_v11  ;;  %v2233_v41 = vadd.s32 792, %v5911_v60 }
 0x457   :  { %3620 = vmatmul.mubr.msk.f32.gmra.mrb[48].mxu1 %vm2063_vm8, %v1702_v40  ;;  %vm6780_vm8 = vcmp.eq.s32.totalorder %v2334_v56, %v5915_v63  ;;  %v2232_v40 = vadd.s32 784, %v5911_v60  ;;  %v2346_v16 = vand.u32 63, %v2234_v4  ;;  %v2355_v4 = vand.u32 63, %v2243_v51 }
 0x458   :  { %v1708_v0 = vpop.f32.mrb[14].mxu1  ;;  %5099 = vmatpush3.bf16.msk.msra.mxu1 %vm5098_vm14, %v5253_v2  ;;  %vm6785_vm14 = vcmp.eq.s32.totalorder %v2335_v32, %v5915_v63  ;;  %v2038_v32 = vadd.s32 256, %v5915_v63 }
 0x459   :  { %v1710_v1 = vpop.f32.mrb[15].mxu1  ;;  %v6743_v3 = vpop.f32.mrb[24].mxu0  ;;  %5101 = vmatprep.subr.msk.bf16.mxu1 %vm5100_vm10, %v5253_v2  ;;  %vm2077_vm10 = vcmp.eq.s32.totalorder %v6670_v39, %v6594_v11  ;;  %vm5108_vm9 = vmpackc.low %vm6785_vm14, %vm6780_vm8  ;;  %vm6894_vm14 = vcmp.eq.s32.totalorder %v2338_v34, %v5915_v63 }
 0x45a   :  { %v6757_v12 = vpop.f32.mrb[25].mxu0  ;;  %3621 = vmatprep.mubr.msk.f32.mxu1 %vm7383_vm1, %v1710_v1  ;;  %vm5106_vm1 = vmpackc.low %vm6772_vm12, %vm6767_vm4  ;;  %vm6872_vm4 = vcmp.eq.s32.totalorder %v2320_v26, %v5915_v63  ;;  %vm6877_vm12 = vcmp.eq.s32.totalorder %v2321_v27, %v5915_v63  ;;  %v6912_v1 = vshra.s32 %v2039_v55, 6  ;;  %v6953_v59 = vshra.s32 %v2038_v32, 6 }
 0x45b   :  { %3622 = vmatmul.mubr.msk.f32.gmra.mrb[50].mxu1 %vm2070_vm15, %v1708_v0  ;;  %vm6815_vm15 = vcmp.eq.s32.totalorder %v2318_v21, %v5915_v63  ;;  %vm5112_vm8 = vmpackc.low %vm6837_vm13, %vm6832_vm11  ;;  %v2344_v21 = vand.u32 63, %v2232_v40  ;;  %vm6938_vm11 = vcmp.eq.s32.totalorder %v2323_v46, %v5915_v63  ;;  %vm6944_vm13 = vcmp.eq.s32.totalorder %v2340_v54, %v5915_v63 }
 0x45c   :  { %v1714_v20 = vpop.f32.mrb[16].mxu1  ;;  %5103 = vmatpush3.bf16.msk.msra.mxu1 %vm5102_vm3, %v5253_v2  ;;  %vm2092_vm3 = vcmp.eq.s32.totalorder %v6792_v19, %v6582_v61  ;;  %v2237_v26 = vadd.s32 824, %v5911_v60  ;;  %v2351_v40 = vand.u32 63, %v2239_v57  ;;  %v2242_v46 = vadd.s32 864, %v5911_v60 }
 0x45d   :  { %v1716_v23 = vpop.f32.mrb[17].mxu1  ;;  %5105 = vmatprep.subr.msk.bf16.mxu1 %vm5104_vm2, %v5253_v2  ;;  %vm5110_vm2 = vmpackc.low %vm6820_vm7, %vm6815_vm15  ;;  %vm6933_vm7 = vcmp.eq.s32.totalorder %v2322_v45, %v5915_v63  ;;  %v2352_v45 = vand.u32 63, %v2240_v49 }
 0x45e   :  { %3623 = vmatprep.mubr.msk.f32.mxu1 %vm2078_vm0, %v1716_v23  ;;  %vm2084_vm0 = vcmp.eq.s32.totalorder %v6731_v62, %v6594_v11  ;;  %v2349_v34 = vand.u32 63, %v2237_v26 }
 0x45f   :  { %3624 = vmatmul.mubr.msk.f32.gmra.mrb[52].mxu1 %vm2077_vm10, %v1714_v20  ;;  %vm7404_vm10 = vcmp.eq.s32.totalorder %v6731_v62, %v6582_v61  ;;  %v2345_v61 = vand.u32 63, %v2233_v41  ;;  %v2241_v41 = vadd.s32 856, %v5911_v60 }
 0x460   :  { %v1720_v36 = vpop.f32.mrb[18].mxu1  ;;  %5107 = vmatpush3.bf16.msk.msra.mxu1 %vm5106_vm1, %v5253_v2  ;;  %vm6899_vm1 = vcmp.eq.s32.totalorder %v2339_v52, %v5915_v63  ;;  %v2238_v52 = vadd.s32 832, %v5911_v60 }
 0x461   :  { %v1722_v38 = vpop.f32.mrb[19].mxu1  ;;  %5109 = vmatprep.subr.msk.bf16.mxu1 %vm5108_vm9, %v5253_v2  ;;  %vm2091_vm9 = vcmp.eq.s32.totalorder %v6792_v19, %v6594_v11  ;;  %vm5116_vm15 = vmpackc.low %vm6899_vm1, %vm6894_vm14  ;;  %vm6979_vm14 = vcmp.eq.s32.totalorder %v2344_v21, %v5915_v63  ;;  %vm6984_vm1 = vcmp.eq.s32.totalorder %v2345_v61, %v5915_v63  ;;  %v2353_v50 = vand.u32 63, %v2241_v41 }
 0x462   :  { %3625 = vmatprep.mubr.msk.f32.mxu1 %vm7404_vm10, %v1722_v38  ;;  %vm6969_vm10 = vcmp.eq.s32.totalorder %v2324_v7, %v5915_v63  ;;  %v2350_v38 = vand.u32 63, %v2238_v52  ;;  %v2244_v11 = vadd.s32 880, %v5911_v60 }
 0x463   :  { %3626 = vmatmul.mubr.msk.f32.gmra.mrb[54].mxu1 %vm2084_vm0, %v1720_v36  ;;  %vm5114_vm0 = vmpackc.low %vm6877_vm12, %vm6872_vm4 }
 0x464   :  { %v1726_v56 = vpop.f32.mrb[20].mxu1  ;;  %5111 = vmatpush3.bf16.msk.msra.mxu1 %vm5110_vm2, %v5253_v2  ;;  %vm2059_vm2 = vcmp.eq.s32.totalorder %v6580_v58, %v6912_v1  ;;  %vm5118_vm4 = vmpackc.low %vm6938_vm11, %vm6933_vm7  ;;  %vm7007_vm11 = vcmp.eq.s32.totalorder %v2346_v16, %v5915_v63  ;;  %v2356_v16 = vand.u32 63, %v2244_v11 }
 0x465   :  { %v1728_v0 = vpop.f32.mrb[21].mxu1  ;;  %5113 = vmatprep.subr.msk.bf16.mxu1 %vm5112_vm8, %v5253_v2  ;;  %vm6974_vm8 = vcmp.eq.s32.totalorder %v2325_v13, %v5915_v63  ;;  %vm5128_vm7 = vmpackc.low %vm6984_vm1, %vm6979_vm14  ;;  %vm7073_vm1 = vcmp.eq.s32.totalorder %v2350_v38, %v5915_v63 }
 0x466   :  { %3627 = vmatprep.mubr.msk.f32.mxu1 %vm2092_vm3, %v1728_v0  ;;  %vm6949_vm3 = vcmp.eq.s32.totalorder %v2341_v53, %v5915_v63  ;;  %v2354_v0 = vand.u32 63, %v2242_v46 }
 0x467   :  { %3628 = vmatmul.mubr.msk.f32.gmra.mrb[56].mxu1 %vm2091_vm9, %v1726_v56  ;;  %vm5120_vm12 = vmpackc.low %vm6949_vm3, %vm6944_vm13  ;;  %vm2058_vm9 = vcmp.eq.s32.totalorder %v6580_v58, %v6953_v59  ;;  %vm7012_vm13 = vcmp.eq.s32.totalorder %v2347_v25, %v5915_v63  ;;  %v2042_v56 = vadd.s32 768, %v5915_v63  ;;  %v2053_v25 = vshra.s32 %v2040_v18, 6 }
 0x468   :  { %5115 = vmatpush3.bf16.msk.msra.mxu1 %vm5114_vm0, %v5253_v2  ;;  %vm5122_vm0 = vmpackc.low %vm6974_vm8, %vm6969_vm10  ;;  %vm2072_vm10 = vcmp.eq.s32.totalorder %v6621_v24, %v6953_v59  ;;  %vm2080_vm8 = vcmp.eq.s32.totalorder %v6670_v39, %v6912_v1 }
 0x469   :  { %5117 = vmatprep.subr.msk.bf16.mxu1 %vm5116_vm15, %v5253_v2  ;;  %vm2066_vm15 = vcmp.eq.s32.totalorder %v6589_v10, %v6912_v1  ;;  %vm7429_vm3 = vmpackc.low %vm6560_vm6, %vm6555_vm5  ;;  %vm7040_vm6 = vcmp.eq.s32.totalorder %v2348_v30, %v5915_v63  ;;  %v7130_v61 = vshra.s32 %v2042_v56, 6 }
 0x46a   :  { %vm5132_vm5 = vmpackc.low %vm7012_vm13, %vm7007_vm11  ;;  %vm7105_vm11 = vcmp.eq.s32.totalorder %v2352_v45, %v5915_v63  ;;  %vm7110_vm13 = vcmp.eq.s32.totalorder %v2353_v50, %v5915_v63 }
 0x46c   :  { %v1797_v27 = vpop.f32.mrb[22].mxu1  ;;  %5119 = vmatpush3.bf16.msk.msra.mxu1 %vm5118_vm4, %v5253_v2  ;;  %vm2073_vm4 = vcmp.eq.s32.totalorder %v6621_v24, %v6912_v1 }
 0x46d   :  { %v1799_v8 = vpop.f32.mrb[23].mxu1  ;;  %5121 = vmatprep.subr.msk.bf16.mxu1 %vm5120_vm12, %v5253_v2  ;;  %vm7046_vm12 = vcmp.eq.s32.totalorder %v2349_v34, %v5915_v63 }
 0x46e   :  { %3661 = vmatprep.mubr.msk.f32.mxu0 %vm2059_vm2, %v1799_v8  ;;  %vm2065_vm2 = vcmp.eq.s32.totalorder %v6589_v10, %v6953_v59  ;;  %vm5136_vm14 = vmpackc.low %vm7046_vm12, %vm7040_vm6  ;;  %vm7144_vm6 = vcmp.eq.s32.totalorder %v2355_v4, %v5915_v63  ;;  %vm2093_vm12 = vcmp.eq.s32.totalorder %v6792_v19, %v6953_v59 }
 0x46f   :  { %3662 = vmatmul.mubr.msk.f32.vlgmr.msra.gmra.mrb[26].mxu0 %vm2058_vm9, %v1797_v27  ;;  %vm7078_vm9 = vcmp.eq.s32.totalorder %v2351_v40, %v5915_v63 }
 0x470   :  { %5127 = vmatpush3.bf16.msk.msra.mxu0 %vm7429_vm3, %v5253_v2  ;;  %v1803_v35 = vpop.f32.mrb[24].mxu1  ;;  %5123 = vmatpush3.bf16.msk.msra.mxu1 %vm5122_vm0, %v5253_v2  ;;  %vm2079_vm0 = vcmp.eq.s32.totalorder %v6670_v39, %v6953_v59  ;;  %vm2086_vm3 = vcmp.eq.s32.totalorder %v6731_v62, %v6953_v59  ;;  %v2054_v59 = vshra.s32 %v2041_v15, 6 }
 0x471   :  { %v1805_v36 = vpop.f32.mrb[25].mxu1  ;;  %5129 = vmatprep.subr.msk.bf16.mxu0 %vm5128_vm7, %v5253_v2 }
 0x472   :  { %3663 = vmatprep.mubr.msk.f32.mxu0 %vm2066_vm15, %v1805_v36  ;;  %vm2087_vm15 = vcmp.eq.s32.totalorder %v6731_v62, %v6912_v1 }
 0x473   :  { %3664 = vmatmul.mubr.msk.f32.gmra.mrb[28].mxu0 %vm2065_vm2, %v1803_v35  ;;  %vm2094_vm2 = vcmp.eq.s32.totalorder %v6792_v19, %v6912_v1  ;;  %v2357_v1 = vand.u32 63, %v2245_v5 }
 0x474   :  { %5131 = vmatpush3.bf16.msk.msra.mxu0 %vm5128_vm7, %v5253_v2  ;;  %v1809_v9 = vpop.f32.mrb[26].mxu1  ;;  %vm5140_vm7 = vmpackc.low %vm7078_vm9, %vm7073_vm1 }
 0x475   :  { %v1811_v43 = vpop.f32.mrb[27].mxu1  ;;  %5133 = vmatprep.subr.msk.bf16.mxu0 %vm5132_vm5, %v5253_v2  ;;  %vm7176_vm1 = vcmp.eq.s32.totalorder %v2357_v1, %v5915_v63 }
 0x476   :  { %3665 = vmatprep.mubr.msk.f32.mxu0 %vm2073_vm4, %v1811_v43  ;;  %vm5144_vm4 = vmpackc.low %vm7110_vm13, %vm7105_vm11  ;;  %vm2069_vm11 = vcmp.eq.s32.totalorder %v6589_v10, %v7130_v61  ;;  %vm2067_vm13 = vcmp.eq.s32.totalorder %v6589_v10, %v2053_v25 }
 0x477   :  { %3666 = vmatmul.mubr.msk.f32.gmra.mrb[30].mxu0 %vm2072_vm10, %v1809_v9  ;;  %vm2062_vm10 = vcmp.eq.s32.totalorder %v6580_v58, %v7130_v61 }
 0x478   :  { %5135 = vmatpush3.bf16.msk.msra.mxu0 %vm5132_vm5, %v5253_v2  ;;  %v1815_v54 = vpop.f32.mrb[28].mxu1  ;;  %vm7139_vm5 = vcmp.eq.s32.totalorder %v2354_v0, %v5915_v63 }
 0x479   :  { %v1817_v53 = vpop.f32.mrb[29].mxu1  ;;  %5137 = vmatprep.subr.msk.bf16.mxu0 %vm5136_vm14, %v5253_v2 }
 0x47a   :  { %3667 = vmatprep.mubr.msk.f32.mxu0 %vm2080_vm8, %v1817_v53  ;;  %vm5148_vm8 = vmpackc.low %vm7144_vm6, %vm7139_vm5  ;;  %vm2074_vm5 = vcmp.eq.s32.totalorder %v6621_v24, %v2053_v25  ;;  %vm2090_vm6 = vcmp.eq.s32.totalorder %v6731_v62, %v7130_v61 }
 0x47b   :  { %3668 = vmatmul.mubr.msk.f32.gmra.mrb[32].mxu0 %vm2079_vm0, %v1815_v54  ;;  %vm2061_vm0 = vcmp.eq.s32.totalorder %v6580_v58, %v2054_v59 }
 0x47c   :  { %5139 = vmatpush3.bf16.msk.msra.mxu0 %vm5136_vm14, %v5253_v2  ;;  %v1821_v7 = vpop.f32.mrb[30].mxu1  ;;  %vm7171_vm14 = vcmp.eq.s32.totalorder %v2356_v16, %v5915_v63 }
 0x47d   :  { %v1823_v13 = vpop.f32.mrb[31].mxu1  ;;  %5141 = vmatprep.subr.msk.bf16.mxu0 %vm5140_vm7, %v5253_v2  ;;  %vm5152_vm9 = vmpackc.low %vm7176_vm1, %vm7171_vm14  ;;  %vm2089_vm14 = vcmp.eq.s32.totalorder %v6731_v62, %v2054_v59  ;;  %vm2088_vm1 = vcmp.eq.s32.totalorder %v6731_v62, %v2053_v25 }
 0x47e   :  { %3669 = vmatprep.mubr.msk.f32.mxu0 %vm2087_vm15, %v1823_v13  ;;  %vm2060_vm15 = vcmp.eq.s32.totalorder %v6580_v58, %v2053_v25 }
 0x47f   :  { %3670 = vmatmul.mubr.msk.f32.gmra.mrb[34].mxu0 %vm2086_vm3, %v1821_v7  ;;  %vm2076_vm3 = vcmp.eq.s32.totalorder %v6621_v24, %v7130_v61 }
 0x480   :  { %5143 = vmatpush3.bf16.msk.msra.mxu0 %vm5140_vm7, %v5253_v2  ;;  %v1827_v17 = vpop.f32.mrb[32].mxu1  ;;  %vm2068_vm7 = vcmp.eq.s32.totalorder %v6589_v10, %v2054_v59 }
 0x481   :  { %v1829_v20 = vpop.f32.mrb[33].mxu1  ;;  %5145 = vmatprep.subr.msk.bf16.mxu0 %vm5144_vm4, %v5253_v2 }
 0x482   :  { %3671 = vmatprep.mubr.msk.f32.mxu0 %vm2094_vm2, %v1829_v20  ;;  %vm2075_vm2 = vcmp.eq.s32.totalorder %v6621_v24, %v2054_v59 }
 0x483   :  { %3672 = vmatmul.mubr.msk.f32.gmra.mrb[36].mxu0 %vm2093_vm12, %v1827_v17  ;;  %vm2082_vm12 = vcmp.eq.s32.totalorder %v6670_v39, %v2054_v59 }
 0x484   :  { %5147 = vmatpush3.bf16.msk.msra.mxu0 %vm5144_vm4, %v5253_v2  ;;  %4598 = vmatprep.mubr.msk.f32.mxu0 %vm2062_vm10, %v6643_v31  ;;  %vm2083_vm4 = vcmp.eq.s32.totalorder %v6670_v39, %v7130_v61  ;;  %vm2097_vm10 = vcmp.eq.s32.totalorder %v6792_v19, %v7130_v61 }
 0x485   :  { %5149 = vmatprep.subr.msk.bf16.mxu0 %vm5148_vm8, %v5253_v2 }
 0x488   :  { %5151 = vmatpush3.bf16.msk.msra.mxu0 %vm5148_vm8, %v5253_v2  ;;  %v1898_v26 = vpop.f32.mrb[34].mxu1  ;;  %vm2081_vm8 = vcmp.eq.s32.totalorder %v6670_v39, %v2053_v25  ;;  %v5254_v39 = vmov 0.0|0.0  }
 0x489   :  { %v1900_v27 = vpop.f32.mrb[35].mxu1  ;;  %5153 = vmatprep.subr.msk.bf16.mxu0 %vm5152_vm9, %v5253_v2  ;;  %5156 = vmatprep.subr.bf16.mxu1 %v5254_v39 }
 0x48a   :  { %3705 = vmatprep.mubr.msk.f32.mxu1 %vm2061_vm0, %v1900_v27  ;;  %vm2095_vm0 = vcmp.eq.s32.totalorder %v6792_v19, %v2053_v25 }
 0x48b   :  { %3706 = vmatmul.mubr.msk.f32.vlgmr.msra.gmra.mrb[58].mxu1 %vm2060_vm15, %v1898_v26  ;;  %vm5255_vm15 = vmmov 0  }
 0x48c   :  { %5155 = vmatpush3.bf16.msk.msra.mxu0 %vm5152_vm9, %v5253_v2  ;;  %v1904_v31 = vpop.f32.mrb[36].mxu1  ;;  %vm2096_vm9 = vcmp.eq.s32.totalorder %v6792_v19, %v2054_v59 }
 0x48d   :  { %v1906_v8 = vpop.f32.mrb[37].mxu1  ;;  %5172 = vmatprep.subr.bf16.mxu0 %v5254_v39 }
 0x48e   :  { %3707 = vmatprep.mubr.msk.f32.mxu1 %vm2068_vm7, %v1906_v8  ;;  %vm3082_vm7 = vcmask 1045504  }
 0x48f   :  { %4599 = vmatmul.mubr.msk.f32.vlgmr.msra.gmra.mrb[38].mxu0 %vm2069_vm11, %v6627_v48  ;;  %3708 = vmatmul.mubr.msk.f32.gmra.mrb[60].mxu1 %vm2067_vm13, %v1904_v31  ;;  %vm5256_vm11 = vmmov 1  }
 0x490   :  { %4601 = vmatprep.mubr.msk.f32.mxu0 %vm2076_vm3, %v6706_v28  ;;  %v1910_v58 = vpop.f32.mrb[38].mxu1  ;;  %vm5164_vm13 = vmpackc.low %vm3082_vm7, %vm5256_vm11 }
 0x491   :  { %v1912_v2 = vpop.f32.mrb[39].mxu1 }
 0x492   :  { %3709 = vmatprep.mubr.msk.f32.mxu1 %vm2075_vm2, %v1912_v2  ;;  %vm3078_vm2 = vcmask 375808  }
 0x493   :  { %4602 = vmatmul.mubr.msk.f32.gmra.mrb[40].mxu0 %vm2083_vm4, %v6682_v42  ;;  %3710 = vmatmul.mubr.msk.f32.gmra.mrb[62].mxu1 %vm2074_vm5, %v1910_v58  ;;  %vm3175_vm5 = vcmask 261120  }
 0x494   :  { %4604 = vmatprep.mubr.msk.f32.mxu0 %vm2090_vm6, %v6757_v12  ;;  %v1916_v10 = vpop.f32.mrb[40].mxu1 }
 0x495   :  { %v1918_v48 = vpop.f32.mrb[41].mxu1 }
 0x496   :  { %3711 = vmatprep.mubr.msk.f32.mxu1 %vm2082_vm12, %v1918_v48 }
 0x497   :  { %4605 = vmatmul.mubr.msk.f32.gmra.mrb[42].mxu0 %vm2097_vm10, %v6743_v3  ;;  %3712 = vmatmul.mubr.msk.f32.gmra.mrb[64].mxu1 %vm2081_vm8, %v1916_v10  ;;  %v7224_v3 = vld [vmem:[#allocation2 + $0x18] sm:$0xff] }
 0x498   :  { %v1922_v24 = vpop.f32.mrb[42].mxu1  ;;  %4641 = vmatprep.mubr.msk.f32.mxu0 %vm5255_vm15, %v7224_v3 }
 0x499   :  { %v1924_v42 = vpop.f32.mrb[43].mxu1 }
 0x49a   :  { %3713 = vmatprep.mubr.msk.f32.mxu1 %vm2089_vm14, %v1924_v42 }
 0x49b   :  { %3714 = vmatmul.mubr.msk.f32.gmra.mrb[66].mxu1 %vm2088_vm1, %v1922_v24 }
 0x49c   :  { %v1928_v28 = vpop.f32.mrb[44].mxu1 }
 0x49d   :  { %v1930_v12 = vpop.f32.mrb[45].mxu1 }
 0x49e   :  { %3715 = vmatprep.mubr.msk.f32.mxu1 %vm2096_vm9, %v1930_v12 }
 0x49f   :  { %3716 = vmatmul.mubr.msk.f32.gmra.mrb[68].mxu1 %vm2095_vm0, %v1928_v28 }
 0x4a0   :  { %4619 = vmatprep.mubr.msk.f32.mxu1 %vm5255_vm15, %v7224_v3 }
 0x526   :  { %v4001_v62 = vpop.f32.mrb[46].mxu1 }
 0x527   :  { %v4002_v29 = vpop.f32.mrb[47].mxu1 }
 0x528   :  { %v4003_v19 = vadd.f32 %v4002_v29, %v4001_v62 }
 0x52a   :  { %v4004_v30 = vpop.f32.mrb[48].mxu1 }
 0x52b   :  { %v4005_v33 = vpop.f32.mrb[49].mxu1 }
 0x52c   :  { %v4006_v34 = vadd.f32 %v4005_v33, %v4004_v30 }
 0x52e   :  { %v4007_v52 = vpop.f32.mrb[50].mxu1 }
 0x52f   :  { %v4008_v57 = vpop.f32.mrb[51].mxu1 }
 0x530   :  { %v4009_v35 = vadd.f32 %v4008_v57, %v4007_v52 }
 0x532   :  { %v4010_v36 = vpop.f32.mrb[52].mxu1 }
 0x533   :  { %v4011_v37 = vpop.f32.mrb[53].mxu1 }
 0x534   :  { %v4012_v49 = vadd.f32 %v4011_v37, %v4010_v36 }
 0x536   :  { %v4013_v55 = vpop.f32.mrb[54].mxu1 }
 0x537   :  { %v4014_v38 = vpop.f32.mrb[55].mxu1 }
 0x538   :  { %v4015_v40 = vadd.f32 %v4014_v38, %v4013_v55 }
 0x53a   :  { %v4016_v41 = vpop.f32.mrb[56].mxu1 }
 0x53b   :  { %v4017_v9 = vpop.f32.mrb[57].mxu1 }
 0x53c   :  { %v4018_v43 = vadd.f32 %v4017_v9, %v4016_v41 }
 0x542   :  { %v4051_v45 = vpop.f32.mrb[26].mxu0 }
 0x543   :  { %v4052_v46 = vpop.f32.mrb[27].mxu0 }
 0x544   :  { %v4053_v47 = vadd.f32 %v4052_v46, %v4051_v45  ;;  %v3074_v45 = vshra.s32 %v5915_v63, 5 }
 0x546   :  { %v2856_v6 = vadd.f32 %v4053_v47, %v4003_v19  ;;  %v4054_v50 = vpop.f32.mrb[28].mxu0  ;;  %vm3075_vm3 = vcmp.eq.s32.totalorder %v3074_v45, %v5911_v60  ;;  %v3169_v60 = vld [vmem:[%s7287_s9 + $0x10] sm:$0xff] }
 0x547   :  { %v4055_v51 = vpop.f32.mrb[29].mxu0 }
 0x548   :  { %v4056_v54 = vadd.f32 %v4055_v51, %v4054_v50  ;;  %v3168_v50 = vld [vmem:[%s7287_s9 + $0x8] sm:$0xff] }
 0x54a   :  { %v2861_v53 = vadd.f32 %v4056_v54, %v4006_v34  ;;  %v4057_v56 = vpop.f32.mrb[30].mxu0  ;;  %v3739_v54 = vsel %vm3075_vm3, 1.0, %v7224_v3 }
 0x54b   :  { %v4058_v32 = vpop.f32.mrb[31].mxu0 }
 0x54c   :  { %v4059_v0 = vadd.f32 %v4058_v32, %v4057_v56  ;;  %v3742_v32 = vld [vmem:[%s7286_s8] ss:$0 sm:$0xff] }
 0x54e   :  { %v2866_v21 = vadd.f32 %v4059_v0, %v4009_v35  ;;  %v4060_v4 = vpop.f32.mrb[32].mxu0 }
 0x54f   :  { %v4061_v11 = vpop.f32.mrb[33].mxu0 }
 0x550   :  { %v4062_v5 = vadd.f32 %v4061_v11, %v4060_v4 }
 0x552   :  { %v2871_v7 = vadd.f32 %v4062_v5, %v4012_v49  ;;  %v4063_v13 = vpop.f32.mrb[34].mxu0  ;;  %v3260_v5 = vld [vmem:[%s7289_s11] sm:$0xff] }
 0x553   :  { %v4064_v61 = vpop.f32.mrb[35].mxu0 }
 0x554   :  { %v4065_v44 = vadd.f32 %v4064_v61, %v4063_v13  ;;  %v3262_v61 = vld [vmem:[%s7289_s11 + $0x10] sm:$0xff] }
 0x556   :  { %v2876_v14 = vadd.f32 %v4065_v44, %v4015_v40  ;;  %v4066_v15 = vpop.f32.mrb[36].mxu0  ;;  %v3263_v44 = vld [vmem:[%s7289_s11 + $0x18] sm:$0xff] }
 0x557   :  { %v4067_v16 = vpop.f32.mrb[37].mxu0 }
 0x558   :  { %v4068_v1 = vadd.f32 %v4067_v16, %v4066_v15 }
 0x55a   :  { %v2881_v17 = vadd.f32 %v4068_v1, %v4018_v43  ;;  %v3744_v1 = vld [vmem:[%s7288_s10] ss:$0 sm:$0xff] }
 0x55e   :  { %v4101_v18 = vpop.f32.mrb[58].mxu1 }
 0x55f   :  { %v4102_v20 = vpop.f32.mrb[59].mxu1 }
 0x560   :  { %v4103_v59 = vadd.f32 %v4102_v20, %v4101_v18 }
 0x562   :  { %v4600_v23 = vpop.f32.mrb[38].mxu0  ;;  %v4104_v22 = vpop.f32.mrb[60].mxu1  ;;  %v2951_v25 = vadd.f32 %v4103_v59, %v2856_v6  ;;  %v3167_v6 = vld [vmem:[%s7287_s9] sm:$0xff] }
 0x563   :  { %v3045_v26 = vpop.f32.mrb[39].mxu0  ;;  %v4105_v27 = vpop.f32.mrb[61].mxu1  ;;  %v5167_v63 = vpack.c.bf16 %v3168_v50, %v3167_v6 }
 0x564   :  { %v3046_v31 = vadd.f32 %v3045_v26, %v2951_v25  ;;  %v4106_v8 = vadd.f32 %v4105_v27, %v4104_v22 }
 0x566   :  { %v2956_v58 = vadd.f32 %v4106_v8, %v2861_v53  ;;  %v4603_v2 = vpop.f32.mrb[40].mxu0  ;;  %v4107_v10 = vpop.f32.mrb[62].mxu1  ;;  %v3170_v53 = vld [vmem:[%s7287_s9 + $0x18] sm:$0xff] }
 0x567   :  { %v3055_v48 = vpop.f32.mrb[41].mxu0  ;;  %v4108_v24 = vpop.f32.mrb[63].mxu1  ;;  %v5170_v56 = vpack.c.bf16 %v3170_v53, %v3169_v60 }
 0x568   :  { %v3051_v42 = vadd.f32 %v4600_v23, %v2956_v58  ;;  %v4109_v28 = vadd.f32 %v4108_v24, %v4107_v10  ;;  %v3745_v23 = vld [vmem:[%s7290_s12] ss:$0 sm:$0xff] }
 0x56a   :  { %v5157_v12 = vpack.c.bf16 %v3051_v42, %v3046_v31  ;;  %v2961_v62 = vadd.f32 %v4109_v28, %v2866_v21  ;;  %v4606_v29 = vpop.f32.mrb[42].mxu0  ;;  %v4110_v19 = vpop.f32.mrb[64].mxu1 }
 0x56b   :  { %v3065_v30 = vpop.f32.mrb[43].mxu0  ;;  %v4111_v33 = vpop.f32.mrb[65].mxu1 }
 0x56c   :  { %v3056_v34 = vadd.f32 %v3055_v48, %v2961_v62  ;;  %v4112_v52 = vadd.f32 %v4111_v33, %v4110_v19  ;;  %5158 = vmatpush3.bf16.msra.mxu1 %v5157_v12 }
 0x56d   :  { %5159 = vmatprep.subr.bf16.mxu1 %v5254_v39 }
 0x56e   :  { %v2966_v57 = vadd.f32 %v4112_v52, %v2871_v7  ;;  %v4113_v35 = vpop.f32.mrb[66].mxu1  ;;  %v3261_v7 = vld [vmem:[%s7289_s11 + $0x8] sm:$0xff] }
 0x56f   :  { %v4114_v36 = vpop.f32.mrb[67].mxu1  ;;  %v5173_v13 = vpack.c.bf16 %v3261_v7, %v3260_v5 }
 0x570   :  { %v3061_v37 = vadd.f32 %v4603_v2, %v2966_v57  ;;  %v4115_v49 = vadd.f32 %v4114_v36, %v4113_v35 }
 0x571   :  { %5174 = vmatpush3.bf16.msra.mxu0 %v5173_v13 }
 0x572   :  { %v5160_v55 = vpack.c.bf16 %v3061_v37, %v3056_v34  ;;  %v2971_v38 = vadd.f32 %v4115_v49, %v2876_v14  ;;  %v4116_v40 = vpop.f32.mrb[68].mxu1  ;;  %5175 = vmatprep.subr.bf16.mxu0 %v5254_v39  ;;  %v5176_v14 = vpack.c.bf16 %v3263_v44, %v3262_v61 }
 0x573   :  { %v4117_v41 = vpop.f32.mrb[69].mxu1 }
 0x574   :  { %v3066_v9 = vadd.f32 %v3065_v30, %v2971_v38  ;;  %v4118_v43 = vadd.f32 %v4117_v41, %v4116_v40  ;;  %5161 = vmatpush3.bf16.msra.mxu1 %v5160_v55 }
 0x575   :  { %5162 = vmatprep.subr.bf16.mxu1 %v5254_v39  ;;  %5177 = vmatpush3.bf16.msra.mxu0 %v5176_v14 }
 0x576   :  { %v2976_v46 = vadd.f32 %v4118_v43, %v2881_v17 }
 0x578   :  { %v3071_v47 = vadd.f32 %v4606_v29, %v2976_v46 }
 0x57a   :  { %v5163_v51 = vpack.c.bf16 %v3071_v47, %v3066_v9 }
 0x57c   :  { %5165 = vmatpush3.bf16.msk.msra.mxu1 %vm5164_vm13, %v5163_v51 }
 0x57d   :  { %5166 = vmatprep.subr.bf16.mxu1 %v5254_v39 }
 0x57f   :  { %4620 = vmatmul.mubr.msk.f32.vlgmr.msra.gmra.mrb[70].mxu1 %vm3078_vm2, %v3739_v54 }
 0x580   :  { %5168 = vmatpush3.bf16.msra.mxu1 %v5167_v63  ;;  %4630 = vmatprep.mubr.msk.f32.mxu1 %vm5255_vm15, %v7224_v3 }
 0x581   :  { %5169 = vmatprep.subr.bf16.mxu1 %v5254_v39 }
 0x584   :  { %5171 = vmatpush3.bf16.msra.mxu1 %v5170_v56 }
 0x652   :  { %v3152_v0 = vpop.f32.mrb[70].mxu1 }
 0x653   :  { %v3163_v21 = vadd.f32 %v3742_v32, %v3152_v0  ;;  %v4621_v4 = vpop.f32.mrb[71].mxu1  ;;  %3172 = vrot.lane.b32.xlu0 %v3152_v0, %s5257_s0 }
 0x655   :  { %vm3164_vm4 = vcmp.gt.f32.partialorder %v3163_v21, 0.0  ;;  %v3165_v3 = vmul.f32 0.01, %v3163_v21 }
 0x657   :  { %v3166_v11 = vsel %vm3164_vm4, %v3163_v21, %v3165_v3 }
 0x658   :  { %4631 = vmatmul.mubr.msk.f32.vlgmr.msra.gmra.mrb[72].mxu1 %vm3175_vm5, %v3166_v11 }
 0x6c5   :  { %v3173_v15 = vpop.permute.xlu0 %3172 }
 0x72b   :  { %v3245_v16 = vpop.f32.mrb[72].mxu1 }
 0x72c   :  { %v3246_v17 = vadd.f32 %v3245_v16, %v3173_v15  ;;  %v4632_v18 = vpop.f32.mrb[73].mxu1 }
 0x72e   :  { %v3256_v20 = vadd.f32 %v3744_v1, %v3246_v17 }
 0x730   :  { %vm3257_vm6 = vcmp.gt.f32.partialorder %v3256_v20, 0.0  ;;  %v3258_v39 = vmul.f32 0.01, %v3256_v20 }
 0x732   :  { %v3259_v59 = vsel %vm3257_vm6, %v3256_v20, %v3258_v39 }
 0x733   :  { %4642 = vmatmul.mubr.msk.f32.vlgmr.msra.gmra.mrb[44].mxu0 %vm3175_vm5, %v3259_v59 }
 0x806   :  { %v3340_v22 = vpop.f32.mrb[44].mxu0 }
 0x807   :  { %v3341_v25 = vadd.f32 %v3745_v23, %v3340_v22  ;;  %v4643_v26 = vpop.f32.mrb[45].mxu0 }
 0x809   :  { %3344 = vst [vmem:[%s7291_s13] sm:$0x3] %v3341_v25 }
 0x80a   :  { %3349 = vsyncpa [#allocation4], 1 }

</bundles_post_ra>
